<compile_context>
chip_gen: v5e
topology: v5e:2x2
jax: 0.10.0
libtpu: 0.0.40
codegen_flags: <defaults>
</compile_context>

<pallas_src>
import numpy as np
import jax
import jax.numpy as jnp
from jax.experimental import pallas as pl
from jax.experimental.pallas import tpu as pltpu


# ---------------------------------------------------------------------------
# Bilinear upsampling weights (same math as get_upsampling_weight in models.py)
# ---------------------------------------------------------------------------
def bilinear_filter_1d(kernel_size):
    factor = (kernel_size + 1) // 2
    if kernel_size % 2 == 1:
        center = factor - 1
    else:
        center = factor - 0.5
    og = np.arange(kernel_size)
    return (1.0 - np.abs(og - center) / factor).astype(np.float32)


def get_upsampling_weight(in_channels, out_channels, kernel_size):
    filt1d = bilinear_filter_1d(kernel_size)
    filt = filt1d[:, None] * filt1d[None, :]
    weight = np.zeros((in_channels, out_channels, kernel_size, kernel_size), np.float32)
    weight[range(in_channels), range(out_channels), :, :] = filt
    return weight


def build_upsample_matrix(in_size, kernel_size, stride, padding):
    """Transposed-conv scatter matrix: U[o, i] = filt1d[o + padding - stride * i]."""
    out_size = (in_size - 1) * stride - 2 * padding + kernel_size
    f = bilinear_filter_1d(kernel_size)
    U = np.zeros((out_size, in_size), np.float32)
    for o in range(out_size):
        for i in range(in_size):
            t = o + padding - stride * i
            if 0 <= t < kernel_size:
                U[o, i] += f[t]
    return U


# ---------------------------------------------------------------------------
# Tile selection: VMEM-footprint-aware, generation-aware.
# ---------------------------------------------------------------------------
def _vmem_capacity_bytes():
    try:
        info = pltpu.get_tpu_info()
        cap = getattr(info, "vmem_capacity_bytes", None)
        if cap:
            return int(cap)
    except Exception:
        pass
    return 64 * 1024 * 1024  # conservative (v7x has the smallest VMEM)


def _pick_tiles(num_classes, out_h, out_w, h5, w5, feat):
    """Choose (class_block, oh_tile, vmem_limit_bytes) from the full footprint."""
    cap = _vmem_capacity_bytes()
    budget = int(cap * 0.6)  # headroom for compiler-internal scratch

    # class-block must satisfy the sublane rule on the weight/bias blocks:
    # a divisor of num_classes that is either the full class dim or a multiple of 8.
    cb_cands = [d for d in range(num_classes, 0, -1)
                if num_classes % d == 0 and (d == num_classes or d % 8 == 0)]
    # OH-tile: divisor of OH, multiple of 8; prefer ~128 rows per step so the
    # big output writeback gets many pipeline steps on every generation.
    toh_cands = [t for t in range(out_h, 0, -1)
                 if out_h % t == 0 and (t % 8 == 0 or t == out_h)]
    toh_cands.sort(key=lambda t: abs(t - 128))

    def footprint(cb, toh):
        fp = 2 * cb * toh * out_w * 4          # output tile (double-buffered)
        fp += 2 * feat * h5 * w5 * 4           # encoder features (double-buffered)
        fp += 2 * cb * feat * 4 + 2 * cb * 4   # score5 weight + bias
        fp += 2 * w5 * out_w * 4               # Ux^T
        fp += 2 * toh * h5 * 4                 # Uy row tile
        fp += cb * h5 * out_w * 4              # horizontal-pass scratch (1 copy)
        return fp

    best = None
    for toh in toh_cands:
        for cb in cb_cands:
            fp = footprint(cb, toh)
            if fp <= budget:
                vmem_limit = int(min(cap, max(int(1.5 * fp), 32 * 1024 * 1024)))
                return cb, toh, vmem_limit
            if best is None or fp < best[2]:
                best = (cb, toh, fp)
    cb, toh, fp = best
    if fp > cap:
        raise ValueError(
            f"FCN32s head tiles do not fit VMEM: need {fp} bytes, have {cap}")
    return cb, toh, int(min(cap, int(1.25 * fp)))


# ---------------------------------------------------------------------------
# Fused Pallas kernel: score5 (1x1 conv) + separable bilinear 32x upsample
# ---------------------------------------------------------------------------
def _fcn32s_head_kernel(x_ref, w_ref, b_ref, uxt_ref, uy_ref, o_ref, sx_ref):
    """Grid = (batch, class-block, OH-tile).

    x_ref:   [F, H5*W5]   encoder features (channel-major, spatial on lanes)
    w_ref:   [CB, F]      score5 weight rows for this class block
    b_ref:   [CB, 1]      score5 bias
    uxt_ref: [W5, OW]     horizontal bilinear scatter matrix (transposed)
    uy_ref:  [TOH, H5]    Uy rows for this OH tile
    o_ref:   [CB, TOH, OW] output tile (lane-dense stores when OW % 128 == 0)
    sx_ref:  [CB, H5, OW] VMEM scratch: horizontal-pass result, persists
                          across the OH-tile grid axis.
    """
    cb, h5, _ = sx_ref.shape
    w5 = uxt_ref.shape[0]

    # Cold path: run score5 + the horizontal bilinear pass once per
    # (batch, class-block); the result is reused by every OH tile.
    @pl.when(pl.program_id(2) == 0)
    def _():
        # score5: [CB, F] @ [F, H5*W5] + b  (classes on M, spatial on lanes)
        score = (jnp.dot(w_ref[...], x_ref[...],
                         preferred_element_type=jnp.float32) + b_ref[...])
        # Horizontal upsample per source row h: [CB, W5] @ [W5, OW] -> [CB, OW].
        # Amortized over all OH tiles; the tiny lane slices of `score` only
        # run here, never in the hot per-step path.
        for h in range(h5):
            sx_ref[:, h, :] = jnp.dot(score[:, h * w5:(h + 1) * w5], uxt_ref[...],
                                      preferred_element_type=jnp.float32)

    # Hot path: vertical pass per class with exact contraction depth H5
    # (no zero-padded block-diagonal matmul): [TOH, H5] @ [H5, OW].
    for c in range(cb):
        o_ref[c] = jnp.dot(uy_ref[...], sx_ref[c],
                           preferred_element_type=jnp.float32)


def fcn32s_head(x5, w, b, ux_t, uy):
    """Fused score5 + upscore.  x5: [N, 512, H5, W5] -> [N, C, OH, OW]."""
    N, F, H5, W5 = x5.shape
    C = w.shape[0]
    OW = ux_t.shape[1]
    OH = uy.shape[0]

    cb, toh, vmem_limit = _pick_tiles(C, OH, OW, H5, W5, F)
    n_cb = C // cb
    n_oh = OH // toh

    x_flat = x5.reshape(N, F, H5 * W5)   # free reshape (contiguous NCHW)
    b2 = b.reshape(C, 1)

    out = pl.pallas_call(
        _fcn32s_head_kernel,
        out_shape=jax.ShapeDtypeStruct((N, C, OH, OW), jnp.float32),
        grid=(N, n_cb, n_oh),
        in_specs=[
            # features: block index only depends on n, so the unchanged index
            # across (j, t) steps skips re-DMA of the feature tile.
            pl.BlockSpec((None, F, H5 * W5), lambda n, j, t: (n, 0, 0)),
            pl.BlockSpec((cb, F), lambda n, j, t: (j, 0)),
            pl.BlockSpec((cb, 1), lambda n, j, t: (j, 0)),
            pl.BlockSpec((W5, OW), lambda n, j, t: (0, 0)),
            pl.BlockSpec((toh, H5), lambda n, j, t: (t, 0)),
        ],
        out_specs=pl.BlockSpec((None, cb, toh, OW), lambda n, j, t: (n, j, t, 0)),
        scratch_shapes=[pltpu.VMEM((cb, H5, OW), jnp.float32)],
        compiler_params=pltpu.CompilerParams(
            dimension_semantics=("parallel", "parallel", "arbitrary"),
            vmem_limit_bytes=vmem_limit),
    )(x_flat, w, b2, ux_t, uy)
    return out


# ---------------------------------------------------------------------------
# Synthetic encoder (the `encorder` constructor argument is an external module;
# here it is a deterministic plain-JAX stand-in producing VGG-like pyramids).
# ---------------------------------------------------------------------------
def make_encoder_params(key, in_channels):
    k3, k4, k5 = jax.random.split(key, 3)
    scale = 0.1
    return {
        "p3": scale * jax.random.normal(k3, (256, in_channels), jnp.float32),
        "p4": scale * jax.random.normal(k4, (512, in_channels), jnp.float32),
        "p5": scale * jax.random.normal(k5, (512, in_channels), jnp.float32),
    }


def encoder(x, enc_params):
    # TODO(synk): real FCN32s uses a learned VGG-style encoder passed in at
    # construction; it is not part of this module, so a fixed pool+project stub
    # is used for the feature pyramid.
    def pool_proj(x, stride, proj):
        N, C, H, W = x.shape
        xp = x.reshape(N, C, H // stride, stride, W // stride, stride).mean(axis=(3, 5))
        return jnp.einsum('oc,nchw->nohw', proj, xp)

    x3 = pool_proj(x, 8, enc_params["p3"])     # [N, 256, H/8,  W/8 ]
    x4 = pool_proj(x, 16, enc_params["p4"])    # [N, 512, H/16, W/16]
    x5 = pool_proj(x, 32, enc_params["p5"])    # [N, 512, H/32, W/32]
    return x3, x4, x5


def fcn32s_forward(x, params):
    x3, x4, x5 = encoder(x, params["encoder"])
    return fcn32s_head(x5, params["score5_w"], params["score5_b"],
                       params["ux_t"], params["uy"])


if __name__ == "__main__":
    num_classes = 21                     # VOC-style class count (not a multiple of 8)
    N, Cin, H, W = 2, 3, 256, 256        # H,W multiples of 32; OW = W is 128-multiple
    K, S, P = 64, 32, 16

    key = jax.random.PRNGKey(0)
    k_x, k_enc, k_w, k_b = jax.random.split(key, 4)

    x = jax.random.normal(k_x, (N, Cin, H, W), jnp.float32)
    enc_params = make_encoder_params(k_enc, Cin)

    # score5: Conv2d(512, num_classes, 1) — deterministic uniform init (kaiming-like bound)
    bound = 1.0 / np.sqrt(512.0)
    score5_w = jax.random.uniform(k_w, (num_classes, 512), jnp.float32, -bound, bound)
    score5_b = jax.random.uniform(k_b, (num_classes,), jnp.float32, -bound, bound)

    # upscore: fixed bilinear weights, factored into row/column scatter matrices
    H5, W5 = H // 32, W // 32
    OH = (H5 - 1) * S - 2 * P + K
    OW = (W5 - 1) * S - 2 * P + K
    uy = build_upsample_matrix(H5, K, S, P)                 # [OH, H5]
    ux_t = build_upsample_matrix(W5, K, S, P).T.copy()      # [W5, OW]

    params = {
        "encoder": enc_params,
        "score5_w": score5_w,
        "score5_b": score5_b,
        "ux_t": jnp.asarray(ux_t),
        "uy": jnp.asarray(uy),
    }

    out = jax.block_until_ready(fcn32s_forward(x, params))
    assert out.shape == (N, num_classes, H, W), out.shape

    # ---------------- reference check (plain JAX / XLA) ----------------
    _, _, x5 = encoder(x, enc_params)
    ref_score = jnp.einsum('nchw,kc->nkhw', x5, score5_w) + score5_b[None, :, None, None]
    w_up = get_upsampling_weight(num_classes, num_classes, K)            # [Cin, Cout, K, K]
    w_oihw = jnp.asarray(np.transpose(w_up, (1, 0, 2, 3))[:, :, ::-1, ::-1].copy())
    ref_out = jax.lax.conv_general_dilated(
        ref_score, w_oihw,
        window_strides=(1, 1),
        padding=((K - 1 - P, K - 1 - P), (K - 1 - P, K - 1 - P)),
        lhs_dilation=(S, S),
        dimension_numbers=('NCHW', 'OIHW', 'NCHW'))
    np.testing.assert_allclose(np.asarray(out), np.asarray(ref_out), rtol=1e-4, atol=1e-4)

    print("KERNEL_OK")
</pallas_src>

<mosaic_0001>
module attributes {stable_mosaic.version = 11 : i64} {
  func.func @_fcn32s_head_kernel(%arg0: i32, %arg1: i32, %arg2: i32, %arg3: memref<1x512x64xf32, #tpu.memory_space<vmem>>, %arg4: memref<21x512xf32, #tpu.memory_space<vmem>>, %arg5: memref<21x1xf32, #tpu.memory_space<vmem>>, %arg6: memref<8x256xf32, #tpu.memory_space<vmem>>, %arg7: memref<128x8xf32, #tpu.memory_space<vmem>>, %arg8: memref<1x21x128x256xf32, #tpu.memory_space<vmem>>, %arg9: memref<21x8x256xf32, #tpu.memory_space<vmem>>) attributes {dimension_semantics = [#tpu.dimension_semantics<parallel>, #tpu.dimension_semantics<parallel>, #tpu.dimension_semantics<arbitrary>], iteration_bounds = array<i64: 2, 1, 2>, scalar_prefetch = 0 : i64, scratch_operands = 1 : i64, tpu.core_type = #tpu.core_type<tc>, window_params = [{transform_indices = @transform_0, window_bounds = array<i64: 1, 512, 64>}, {transform_indices = @transform_1, window_bounds = array<i64: 21, 512>}, {transform_indices = @transform_2, window_bounds = array<i64: 21, 1>}, {pipeline_mode = #tpu.pipeline_mode<synchronous>, transform_indices = @transform_3, window_bounds = array<i64: 8, 256>}, {transform_indices = @transform_4, window_bounds = array<i64: 128, 8>}, {transform_indices = @transform_5, window_bounds = array<i64: 1, 21, 128, 256>}]} {
    %c0_i32 = arith.constant 0 : i32
    %0 = arith.cmpi eq, %arg2, %c0_i32 : i32
    %1 = arith.extui %0 : i1 to i32
    %c0_i32_0 = arith.constant 0 : i32
    %2 = arith.cmpi ne, %1, %c0_i32_0 : i32
    scf.if %2 {
      %c0_189 = arith.constant 0 : index
      %c0_190 = arith.constant 0 : index
      %150 = vector.load %arg4[%c0_189, %c0_190] : memref<21x512xf32, #tpu.memory_space<vmem>>, vector<21x512xf32>
      %c0_191 = arith.constant 0 : index
      %c0_192 = arith.constant 0 : index
      %c0_193 = arith.constant 0 : index
      %151 = vector.load %arg3[%c0_191, %c0_192, %c0_193] : memref<1x512x64xf32, #tpu.memory_space<vmem>>, vector<1x512x64xf32>
      %152 = vector.shape_cast %151 : vector<1x512x64xf32> to vector<512x64xf32>
      %cst_194 = arith.constant dense<0.000000e+00> : vector<21x64xf32>
      %153 = tpu.matmul %150, %152, %cst_194 {dimension_numbers = #tpu.dot_dimension_numbers<[1], [0], [0], [1], [0, 0, 1, 1], [], []>} : vector<21x512xf32>, vector<512x64xf32>, vector<21x64xf32> -> vector<21x64xf32>
      %c0_195 = arith.constant 0 : index
      %c0_196 = arith.constant 0 : index
      %154 = vector.load %arg5[%c0_195, %c0_196] : memref<21x1xf32, #tpu.memory_space<vmem>>, vector<21x1xf32>
      %155 = vector.broadcast %154 : vector<21x1xf32> to vector<21x64xf32>
      %156 = arith.addf %153, %155 : vector<21x64xf32>
      %157 = vector.extract_strided_slice %156 {offsets = [0, 0], sizes = [21, 8], strides = [1, 1]} : vector<21x64xf32> to vector<21x8xf32>
      %c0_197 = arith.constant 0 : index
      %c0_198 = arith.constant 0 : index
      %158 = vector.load %arg6[%c0_197, %c0_198] : memref<8x256xf32, #tpu.memory_space<vmem>>, vector<8x256xf32>
      %cst_199 = arith.constant dense<0.000000e+00> : vector<21x256xf32>
      %159 = tpu.matmul %157, %158, %cst_199 {dimension_numbers = #tpu.dot_dimension_numbers<[1], [0], [0], [1], [0, 0, 1, 1], [], []>} : vector<21x8xf32>, vector<8x256xf32>, vector<21x256xf32> -> vector<21x256xf32>
      %c0_200 = arith.constant 0 : index
      %c0_201 = arith.constant 0 : index
      %c0_202 = arith.constant 0 : index
      %160 = vector.load %arg9[%c0_200, %c0_201, %c0_202] : memref<21x8x256xf32, #tpu.memory_space<vmem>>, vector<21x1x256xf32>
      %161 = vector.shape_cast %160 : vector<21x1x256xf32> to vector<21x256xf32>
      %162 = vector.shape_cast %159 : vector<21x256xf32> to vector<21x1x256xf32>
      tpu.vector_store %arg9[%c0_200, %c0_201, %c0_202], %162 {strides = array<i32>} : memref<21x8x256xf32, #tpu.memory_space<vmem>>, vector<21x1x256xf32>,
      %163 = vector.extract_strided_slice %156 {offsets = [0, 8], sizes = [21, 8], strides = [1, 1]} : vector<21x64xf32> to vector<21x8xf32>
      %c0_203 = arith.constant 0 : index
      %c0_204 = arith.constant 0 : index
      %164 = vector.load %arg6[%c0_203, %c0_204] : memref<8x256xf32, #tpu.memory_space<vmem>>, vector<8x256xf32>
      %cst_205 = arith.constant dense<0.000000e+00> : vector<21x256xf32>
      %165 = tpu.matmul %163, %164, %cst_205 {dimension_numbers = #tpu.dot_dimension_numbers<[1], [0], [0], [1], [0, 0, 1, 1], [], []>} : vector<21x8xf32>, vector<8x256xf32>, vector<21x256xf32> -> vector<21x256xf32>
      %c0_206 = arith.constant 0 : index
      %c1_207 = arith.constant 1 : index
      %c0_208 = arith.constant 0 : index
      %166 = vector.load %arg9[%c0_206, %c1_207, %c0_208] : memref<21x8x256xf32, #tpu.memory_space<vmem>>, vector<21x1x256xf32>
      %167 = vector.shape_cast %166 : vector<21x1x256xf32> to vector<21x256xf32>
      %168 = vector.shape_cast %165 : vector<21x256xf32> to vector<21x1x256xf32>
      tpu.vector_store %arg9[%c0_206, %c1_207, %c0_208], %168 {strides = array<i32>} : memref<21x8x256xf32, #tpu.memory_space<vmem>>, vector<21x1x256xf32>,
      %169 = vector.extract_strided_slice %156 {offsets = [0, 16], sizes = [21, 8], strides = [1, 1]} : vector<21x64xf32> to vector<21x8xf32>
      %c0_209 = arith.constant 0 : index
      %c0_210 = arith.constant 0 : index
      %170 = vector.load %arg6[%c0_209, %c0_210] : memref<8x256xf32, #tpu.memory_space<vmem>>, vector<8x256xf32>
      %cst_211 = arith.constant dense<0.000000e+00> : vector<21x256xf32>
      %171 = tpu.matmul %169, %170, %cst_211 {dimension_numbers = #tpu.dot_dimension_numbers<[1], [0], [0], [1], [0, 0, 1, 1], [], []>} : vector<21x8xf32>, vector<8x256xf32>, vector<21x256xf32> -> vector<21x256xf32>
      %c0_212 = arith.constant 0 : index
      %c2_213 = arith.constant 2 : index
      %c0_214 = arith.constant 0 : index
      %172 = vector.load %arg9[%c0_212, %c2_213, %c0_214] : memref<21x8x256xf32, #tpu.memory_space<vmem>>, vector<21x1x256xf32>
      %173 = vector.shape_cast %172 : vector<21x1x256xf32> to vector<21x256xf32>
      %174 = vector.shape_cast %171 : vector<21x256xf32> to vector<21x1x256xf32>
      tpu.vector_store %arg9[%c0_212, %c2_213, %c0_214], %174 {strides = array<i32>} : memref<21x8x256xf32, #tpu.memory_space<vmem>>, vector<21x1x256xf32>,
      %175 = vector.extract_strided_slice %156 {offsets = [0, 24], sizes = [21, 8], strides = [1, 1]} : vector<21x64xf32> to vector<21x8xf32>
      %c0_215 = arith.constant 0 : index
      %c0_216 = arith.constant 0 : index
      %176 = vector.load %arg6[%c0_215, %c0_216] : memref<8x256xf32, #tpu.memory_space<vmem>>, vector<8x256xf32>
      %cst_217 = arith.constant dense<0.000000e+00> : vector<21x256xf32>
      %177 = tpu.matmul %175, %176, %cst_217 {dimension_numbers = #tpu.dot_dimension_numbers<[1], [0], [0], [1], [0, 0, 1, 1], [], []>} : vector<21x8xf32>, vector<8x256xf32>, vector<21x256xf32> -> vector<21x256xf32>
      %c0_218 = arith.constant 0 : index
      %c3_219 = arith.constant 3 : index
      %c0_220 = arith.constant 0 : index
      %178 = vector.load %arg9[%c0_218, %c3_219, %c0_220] : memref<21x8x256xf32, #tpu.memory_space<vmem>>, vector<21x1x256xf32>
      %179 = vector.shape_cast %178 : vector<21x1x256xf32> to vector<21x256xf32>
      %180 = vector.shape_cast %177 : vector<21x256xf32> to vector<21x1x256xf32>
      tpu.vector_store %arg9[%c0_218, %c3_219, %c0_220], %180 {strides = array<i32>} : memref<21x8x256xf32, #tpu.memory_space<vmem>>, vector<21x1x256xf32>,
      %181 = vector.extract_strided_slice %156 {offsets = [0, 32], sizes = [21, 8], strides = [1, 1]} : vector<21x64xf32> to vector<21x8xf32>
      %c0_221 = arith.constant 0 : index
      %c0_222 = arith.constant 0 : index
      %182 = vector.load %arg6[%c0_221, %c0_222] : memref<8x256xf32, #tpu.memory_space<vmem>>, vector<8x256xf32>
      %cst_223 = arith.constant dense<0.000000e+00> : vector<21x256xf32>
      %183 = tpu.matmul %181, %182, %cst_223 {dimension_numbers = #tpu.dot_dimension_numbers<[1], [0], [0], [1], [0, 0, 1, 1], [], []>} : vector<21x8xf32>, vector<8x256xf32>, vector<21x256xf32> -> vector<21x256xf32>
      %c0_224 = arith.constant 0 : index
      %c4_225 = arith.constant 4 : index
      %c0_226 = arith.constant 0 : index
      %184 = vector.load %arg9[%c0_224, %c4_225, %c0_226] : memref<21x8x256xf32, #tpu.memory_space<vmem>>, vector<21x1x256xf32>
      %185 = vector.shape_cast %184 : vector<21x1x256xf32> to vector<21x256xf32>
      %186 = vector.shape_cast %183 : vector<21x256xf32> to vector<21x1x256xf32>
      tpu.vector_store %arg9[%c0_224, %c4_225, %c0_226], %186 {strides = array<i32>} : memref<21x8x256xf32, #tpu.memory_space<vmem>>, vector<21x1x256xf32>,
      %187 = vector.extract_strided_slice %156 {offsets = [0, 40], sizes = [21, 8], strides = [1, 1]} : vector<21x64xf32> to vector<21x8xf32>
      %c0_227 = arith.constant 0 : index
      %c0_228 = arith.constant 0 : index
      %188 = vector.load %arg6[%c0_227, %c0_228] : memref<8x256xf32, #tpu.memory_space<vmem>>, vector<8x256xf32>
      %cst_229 = arith.constant dense<0.000000e+00> : vector<21x256xf32>
      %189 = tpu.matmul %187, %188, %cst_229 {dimension_numbers = #tpu.dot_dimension_numbers<[1], [0], [0], [1], [0, 0, 1, 1], [], []>} : vector<21x8xf32>, vector<8x256xf32>, vector<21x256xf32> -> vector<21x256xf32>
      %c0_230 = arith.constant 0 : index
      %c5_231 = arith.constant 5 : index
      %c0_232 = arith.constant 0 : index
      %190 = vector.load %arg9[%c0_230, %c5_231, %c0_232] : memref<21x8x256xf32, #tpu.memory_space<vmem>>, vector<21x1x256xf32>
      %191 = vector.shape_cast %190 : vector<21x1x256xf32> to vector<21x256xf32>
      %192 = vector.shape_cast %189 : vector<21x256xf32> to vector<21x1x256xf32>
      tpu.vector_store %arg9[%c0_230, %c5_231, %c0_232], %192 {strides = array<i32>} : memref<21x8x256xf32, #tpu.memory_space<vmem>>, vector<21x1x256xf32>,
      %193 = vector.extract_strided_slice %156 {offsets = [0, 48], sizes = [21, 8], strides = [1, 1]} : vector<21x64xf32> to vector<21x8xf32>
      %c0_233 = arith.constant 0 : index
      %c0_234 = arith.constant 0 : index
      %194 = vector.load %arg6[%c0_233, %c0_234] : memref<8x256xf32, #tpu.memory_space<vmem>>, vector<8x256xf32>
      %cst_235 = arith.constant dense<0.000000e+00> : vector<21x256xf32>
      %195 = tpu.matmul %193, %194, %cst_235 {dimension_numbers = #tpu.dot_dimension_numbers<[1], [0], [0], [1], [0, 0, 1, 1], [], []>} : vector<21x8xf32>, vector<8x256xf32>, vector<21x256xf32> -> vector<21x256xf32>
      %c0_236 = arith.constant 0 : index
      %c6_237 = arith.constant 6 : index
      %c0_238 = arith.constant 0 : index
      %196 = vector.load %arg9[%c0_236, %c6_237, %c0_238] : memref<21x8x256xf32, #tpu.memory_space<vmem>>, vector<21x1x256xf32>
      %197 = vector.shape_cast %196 : vector<21x1x256xf32> to vector<21x256xf32>
      %198 = vector.shape_cast %195 : vector<21x256xf32> to vector<21x1x256xf32>
      tpu.vector_store %arg9[%c0_236, %c6_237, %c0_238], %198 {strides = array<i32>} : memref<21x8x256xf32, #tpu.memory_space<vmem>>, vector<21x1x256xf32>,
      %199 = vector.extract_strided_slice %156 {offsets = [0, 56], sizes = [21, 8], strides = [1, 1]} : vector<21x64xf32> to vector<21x8xf32>
      %c0_239 = arith.constant 0 : index
      %c0_240 = arith.constant 0 : index
      %200 = vector.load %arg6[%c0_239, %c0_240] : memref<8x256xf32, #tpu.memory_space<vmem>>, vector<8x256xf32>
      %cst_241 = arith.constant dense<0.000000e+00> : vector<21x256xf32>
      %201 = tpu.matmul %199, %200, %cst_241 {dimension_numbers = #tpu.dot_dimension_numbers<[1], [0], [0], [1], [0, 0, 1, 1], [], []>} : vector<21x8xf32>, vector<8x256xf32>, vector<21x256xf32> -> vector<21x256xf32>
      %c0_242 = arith.constant 0 : index
      %c7_243 = arith.constant 7 : index
      %c0_244 = arith.constant 0 : index
      %202 = vector.load %arg9[%c0_242, %c7_243, %c0_244] : memref<21x8x256xf32, #tpu.memory_space<vmem>>, vector<21x1x256xf32>
      %203 = vector.shape_cast %202 : vector<21x1x256xf32> to vector<21x256xf32>
      %204 = vector.shape_cast %201 : vector<21x256xf32> to vector<21x1x256xf32>
      tpu.vector_store %arg9[%c0_242, %c7_243, %c0_244], %204 {strides = array<i32>} : memref<21x8x256xf32, #tpu.memory_space<vmem>>, vector<21x1x256xf32>,
    } else {
    }
    %c0 = arith.constant 0 : index
    %c0_1 = arith.constant 0 : index
    %3 = vector.load %arg7[%c0, %c0_1] : memref<128x8xf32, #tpu.memory_space<vmem>>, vector<128x8xf32>
    %c0_2 = arith.constant 0 : index
    %c0_3 = arith.constant 0 : index
    %c0_4 = arith.constant 0 : index
    %4 = vector.load %arg9[%c0_2, %c0_3, %c0_4] : memref<21x8x256xf32, #tpu.memory_space<vmem>>, vector<1x8x256xf32>
    %5 = vector.shape_cast %4 : vector<1x8x256xf32> to vector<8x256xf32>
    %cst = arith.constant dense<0.000000e+00> : vector<128x256xf32>
    %6 = tpu.matmul %3, %5, %cst {dimension_numbers = #tpu.dot_dimension_numbers<[1], [0], [0], [1], [0, 0, 1, 1], [], []>} : vector<128x8xf32>, vector<8x256xf32>, vector<128x256xf32> -> vector<128x256xf32>
    %c0_5 = arith.constant 0 : index
    %c0_6 = arith.constant 0 : index
    %c0_7 = arith.constant 0 : index
    %c0_8 = arith.constant 0 : index
    %7 = vector.load %arg8[%c0_5, %c0_6, %c0_7, %c0_8] : memref<1x21x128x256xf32, #tpu.memory_space<vmem>>, vector<1x1x128x256xf32>
    %8 = vector.shape_cast %7 : vector<1x1x128x256xf32> to vector<128x256xf32>
    %9 = vector.shape_cast %6 : vector<128x256xf32> to vector<1x1x128x256xf32>
    tpu.vector_store %arg8[%c0_5, %c0_6, %c0_7, %c0_8], %9 {strides = array<i32>} : memref<1x21x128x256xf32, #tpu.memory_space<vmem>>, vector<1x1x128x256xf32>,
    %c0_9 = arith.constant 0 : index
    %c0_10 = arith.constant 0 : index
    %10 = vector.load %arg7[%c0_9, %c0_10] : memref<128x8xf32, #tpu.memory_space<vmem>>, vector<128x8xf32>
    %c1 = arith.constant 1 : index
    %c0_11 = arith.constant 0 : index
    %c0_12 = arith.constant 0 : index
    %11 = vector.load %arg9[%c1, %c0_11, %c0_12] : memref<21x8x256xf32, #tpu.memory_space<vmem>>, vector<1x8x256xf32>
    %12 = vector.shape_cast %11 : vector<1x8x256xf32> to vector<8x256xf32>
    %cst_13 = arith.constant dense<0.000000e+00> : vector<128x256xf32>
    %13 = tpu.matmul %10, %12, %cst_13 {dimension_numbers = #tpu.dot_dimension_numbers<[1], [0], [0], [1], [0, 0, 1, 1], [], []>} : vector<128x8xf32>, vector<8x256xf32>, vector<128x256xf32> -> vector<128x256xf32>
    %c0_14 = arith.constant 0 : index
    %c1_15 = arith.constant 1 : index
    %c0_16 = arith.constant 0 : index
    %c0_17 = arith.constant 0 : index
    %14 = vector.load %arg8[%c0_14, %c1_15, %c0_16, %c0_17] : memref<1x21x128x256xf32, #tpu.memory_space<vmem>>, vector<1x1x128x256xf32>
    %15 = vector.shape_cast %14 : vector<1x1x128x256xf32> to vector<128x256xf32>
    %16 = vector.shape_cast %13 : vector<128x256xf32> to vector<1x1x128x256xf32>
    tpu.vector_store %arg8[%c0_14, %c1_15, %c0_16, %c0_17], %16 {strides = array<i32>} : memref<1x21x128x256xf32, #tpu.memory_space<vmem>>, vector<1x1x128x256xf32>,
    %c0_18 = arith.constant 0 : index
    %c0_19 = arith.constant 0 : index
    %17 = vector.load %arg7[%c0_18, %c0_19] : memref<128x8xf32, #tpu.memory_space<vmem>>, vector<128x8xf32>
    %c2 = arith.constant 2 : index
    %c0_20 = arith.constant 0 : index
    %c0_21 = arith.constant 0 : index
    %18 = vector.load %arg9[%c2, %c0_20, %c0_21] : memref<21x8x256xf32, #tpu.memory_space<vmem>>, vector<1x8x256xf32>
    %19 = vector.shape_cast %18 : vector<1x8x256xf32> to vector<8x256xf32>
    %cst_22 = arith.constant dense<0.000000e+00> : vector<128x256xf32>
    %20 = tpu.matmul %17, %19, %cst_22 {dimension_numbers = #tpu.dot_dimension_numbers<[1], [0], [0], [1], [0, 0, 1, 1], [], []>} : vector<128x8xf32>, vector<8x256xf32>, vector<128x256xf32> -> vector<128x256xf32>
    %c0_23 = arith.constant 0 : index
    %c2_24 = arith.constant 2 : index
    %c0_25 = arith.constant 0 : index
    %c0_26 = arith.constant 0 : index
    %21 = vector.load %arg8[%c0_23, %c2_24, %c0_25, %c0_26] : memref<1x21x128x256xf32, #tpu.memory_space<vmem>>, vector<1x1x128x256xf32>
    %22 = vector.shape_cast %21 : vector<1x1x128x256xf32> to vector<128x256xf32>
    %23 = vector.shape_cast %20 : vector<128x256xf32> to vector<1x1x128x256xf32>
    tpu.vector_store %arg8[%c0_23, %c2_24, %c0_25, %c0_26], %23 {strides = array<i32>} : memref<1x21x128x256xf32, #tpu.memory_space<vmem>>, vector<1x1x128x256xf32>,
    %c0_27 = arith.constant 0 : index
    %c0_28 = arith.constant 0 : index
    %24 = vector.load %arg7[%c0_27, %c0_28] : memref<128x8xf32, #tpu.memory_space<vmem>>, vector<128x8xf32>
    %c3 = arith.constant 3 : index
    %c0_29 = arith.constant 0 : index
    %c0_30 = arith.constant 0 : index
    %25 = vector.load %arg9[%c3, %c0_29, %c0_30] : memref<21x8x256xf32, #tpu.memory_space<vmem>>, vector<1x8x256xf32>
    %26 = vector.shape_cast %25 : vector<1x8x256xf32> to vector<8x256xf32>
    %cst_31 = arith.constant dense<0.000000e+00> : vector<128x256xf32>
    %27 = tpu.matmul %24, %26, %cst_31 {dimension_numbers = #tpu.dot_dimension_numbers<[1], [0], [0], [1], [0, 0, 1, 1], [], []>} : vector<128x8xf32>, vector<8x256xf32>, vector<128x256xf32> -> vector<128x256xf32>
    %c0_32 = arith.constant 0 : index
    %c3_33 = arith.constant 3 : index
    %c0_34 = arith.constant 0 : index
    %c0_35 = arith.constant 0 : index
    %28 = vector.load %arg8[%c0_32, %c3_33, %c0_34, %c0_35] : memref<1x21x128x256xf32, #tpu.memory_space<vmem>>, vector<1x1x128x256xf32>
    %29 = vector.shape_cast %28 : vector<1x1x128x256xf32> to vector<128x256xf32>
    %30 = vector.shape_cast %27 : vector<128x256xf32> to vector<1x1x128x256xf32>
    tpu.vector_store %arg8[%c0_32, %c3_33, %c0_34, %c0_35], %30 {strides = array<i32>} : memref<1x21x128x256xf32, #tpu.memory_space<vmem>>, vector<1x1x128x256xf32>,
    %c0_36 = arith.constant 0 : index
    %c0_37 = arith.constant 0 : index
    %31 = vector.load %arg7[%c0_36, %c0_37] : memref<128x8xf32, #tpu.memory_space<vmem>>, vector<128x8xf32>
    %c4 = arith.constant 4 : index
    %c0_38 = arith.constant 0 : index
    %c0_39 = arith.constant 0 : index
    %32 = vector.load %arg9[%c4, %c0_38, %c0_39] : memref<21x8x256xf32, #tpu.memory_space<vmem>>, vector<1x8x256xf32>
    %33 = vector.shape_cast %32 : vector<1x8x256xf32> to vector<8x256xf32>
    %cst_40 = arith.constant dense<0.000000e+00> : vector<128x256xf32>
    %34 = tpu.matmul %31, %33, %cst_40 {dimension_numbers = #tpu.dot_dimension_numbers<[1], [0], [0], [1], [0, 0, 1, 1], [], []>} : vector<128x8xf32>, vector<8x256xf32>, vector<128x256xf32> -> vector<128x256xf32>
    %c0_41 = arith.constant 0 : index
    %c4_42 = arith.constant 4 : index
    %c0_43 = arith.constant 0 : index
    %c0_44 = arith.constant 0 : index
    %35 = vector.load %arg8[%c0_41, %c4_42, %c0_43, %c0_44] : memref<1x21x128x256xf32, #tpu.memory_space<vmem>>, vector<1x1x128x256xf32>
    %36 = vector.shape_cast %35 : vector<1x1x128x256xf32> to vector<128x256xf32>
    %37 = vector.shape_cast %34 : vector<128x256xf32> to vector<1x1x128x256xf32>
    tpu.vector_store %arg8[%c0_41, %c4_42, %c0_43, %c0_44], %37 {strides = array<i32>} : memref<1x21x128x256xf32, #tpu.memory_space<vmem>>, vector<1x1x128x256xf32>,
    %c0_45 = arith.constant 0 : index
    %c0_46 = arith.constant 0 : index
    %38 = vector.load %arg7[%c0_45, %c0_46] : memref<128x8xf32, #tpu.memory_space<vmem>>, vector<128x8xf32>
    %c5 = arith.constant 5 : index
    %c0_47 = arith.constant 0 : index
    %c0_48 = arith.constant 0 : index
    %39 = vector.load %arg9[%c5, %c0_47, %c0_48] : memref<21x8x256xf32, #tpu.memory_space<vmem>>, vector<1x8x256xf32>
    %40 = vector.shape_cast %39 : vector<1x8x256xf32> to vector<8x256xf32>
    %cst_49 = arith.constant dense<0.000000e+00> : vector<128x256xf32>
    %41 = tpu.matmul %38, %40, %cst_49 {dimension_numbers = #tpu.dot_dimension_numbers<[1], [0], [0], [1], [0, 0, 1, 1], [], []>} : vector<128x8xf32>, vector<8x256xf32>, vector<128x256xf32> -> vector<128x256xf32>
    %c0_50 = arith.constant 0 : index
    %c5_51 = arith.constant 5 : index
    %c0_52 = arith.constant 0 : index
    %c0_53 = arith.constant 0 : index
    %42 = vector.load %arg8[%c0_50, %c5_51, %c0_52, %c0_53] : memref<1x21x128x256xf32, #tpu.memory_space<vmem>>, vector<1x1x128x256xf32>
    %43 = vector.shape_cast %42 : vector<1x1x128x256xf32> to vector<128x256xf32>
    %44 = vector.shape_cast %41 : vector<128x256xf32> to vector<1x1x128x256xf32>
    tpu.vector_store %arg8[%c0_50, %c5_51, %c0_52, %c0_53], %44 {strides = array<i32>} : memref<1x21x128x256xf32, #tpu.memory_space<vmem>>, vector<1x1x128x256xf32>,
    %c0_54 = arith.constant 0 : index
    %c0_55 = arith.constant 0 : index
    %45 = vector.load %arg7[%c0_54, %c0_55] : memref<128x8xf32, #tpu.memory_space<vmem>>, vector<128x8xf32>
    %c6 = arith.constant 6 : index
    %c0_56 = arith.constant 0 : index
    %c0_57 = arith.constant 0 : index
    %46 = vector.load %arg9[%c6, %c0_56, %c0_57] : memref<21x8x256xf32, #tpu.memory_space<vmem>>, vector<1x8x256xf32>
    %47 = vector.shape_cast %46 : vector<1x8x256xf32> to vector<8x256xf32>
    %cst_58 = arith.constant dense<0.000000e+00> : vector<128x256xf32>
    %48 = tpu.matmul %45, %47, %cst_58 {dimension_numbers = #tpu.dot_dimension_numbers<[1], [0], [0], [1], [0, 0, 1, 1], [], []>} : vector<128x8xf32>, vector<8x256xf32>, vector<128x256xf32> -> vector<128x256xf32>
    %c0_59 = arith.constant 0 : index
    %c6_60 = arith.constant 6 : index
    %c0_61 = arith.constant 0 : index
    %c0_62 = arith.constant 0 : index
    %49 = vector.load %arg8[%c0_59, %c6_60, %c0_61, %c0_62] : memref<1x21x128x256xf32, #tpu.memory_space<vmem>>, vector<1x1x128x256xf32>
    %50 = vector.shape_cast %49 : vector<1x1x128x256xf32> to vector<128x256xf32>
    %51 = vector.shape_cast %48 : vector<128x256xf32> to vector<1x1x128x256xf32>
    tpu.vector_store %arg8[%c0_59, %c6_60, %c0_61, %c0_62], %51 {strides = array<i32>} : memref<1x21x128x256xf32, #tpu.memory_space<vmem>>, vector<1x1x128x256xf32>,
    %c0_63 = arith.constant 0 : index
    %c0_64 = arith.constant 0 : index
    %52 = vector.load %arg7[%c0_63, %c0_64] : memref<128x8xf32, #tpu.memory_space<vmem>>, vector<128x8xf32>
    %c7 = arith.constant 7 : index
    %c0_65 = arith.constant 0 : index
    %c0_66 = arith.constant 0 : index
    %53 = vector.load %arg9[%c7, %c0_65, %c0_66] : memref<21x8x256xf32, #tpu.memory_space<vmem>>, vector<1x8x256xf32>
    %54 = vector.shape_cast %53 : vector<1x8x256xf32> to vector<8x256xf32>
    %cst_67 = arith.constant dense<0.000000e+00> : vector<128x256xf32>
    %55 = tpu.matmul %52, %54, %cst_67 {dimension_numbers = #tpu.dot_dimension_numbers<[1], [0], [0], [1], [0, 0, 1, 1], [], []>} : vector<128x8xf32>, vector<8x256xf32>, vector<128x256xf32> -> vector<128x256xf32>
    %c0_68 = arith.constant 0 : index
    %c7_69 = arith.constant 7 : index
    %c0_70 = arith.constant 0 : index
    %c0_71 = arith.constant 0 : index
    %56 = vector.load %arg8[%c0_68, %c7_69, %c0_70, %c0_71] : memref<1x21x128x256xf32, #tpu.memory_space<vmem>>, vector<1x1x128x256xf32>
    %57 = vector.shape_cast %56 : vector<1x1x128x256xf32> to vector<128x256xf32>
    %58 = vector.shape_cast %55 : vector<128x256xf32> to vector<1x1x128x256xf32>
    tpu.vector_store %arg8[%c0_68, %c7_69, %c0_70, %c0_71], %58 {strides = array<i32>} : memref<1x21x128x256xf32, #tpu.memory_space<vmem>>, vector<1x1x128x256xf32>,
    %c0_72 = arith.constant 0 : index
    %c0_73 = arith.constant 0 : index
    %59 = vector.load %arg7[%c0_72, %c0_73] : memref<128x8xf32, #tpu.memory_space<vmem>>, vector<128x8xf32>
    %c8 = arith.constant 8 : index
    %c0_74 = arith.constant 0 : index
    %c0_75 = arith.constant 0 : index
    %60 = vector.load %arg9[%c8, %c0_74, %c0_75] : memref<21x8x256xf32, #tpu.memory_space<vmem>>, vector<1x8x256xf32>
    %61 = vector.shape_cast %60 : vector<1x8x256xf32> to vector<8x256xf32>
    %cst_76 = arith.constant dense<0.000000e+00> : vector<128x256xf32>
    %62 = tpu.matmul %59, %61, %cst_76 {dimension_numbers = #tpu.dot_dimension_numbers<[1], [0], [0], [1], [0, 0, 1, 1], [], []>} : vector<128x8xf32>, vector<8x256xf32>, vector<128x256xf32> -> vector<128x256xf32>
    %c0_77 = arith.constant 0 : index
    %c8_78 = arith.constant 8 : index
    %c0_79 = arith.constant 0 : index
    %c0_80 = arith.constant 0 : index
    %63 = vector.load %arg8[%c0_77, %c8_78, %c0_79, %c0_80] : memref<1x21x128x256xf32, #tpu.memory_space<vmem>>, vector<1x1x128x256xf32>
    %64 = vector.shape_cast %63 : vector<1x1x128x256xf32> to vector<128x256xf32>
    %65 = vector.shape_cast %62 : vector<128x256xf32> to vector<1x1x128x256xf32>
    tpu.vector_store %arg8[%c0_77, %c8_78, %c0_79, %c0_80], %65 {strides = array<i32>} : memref<1x21x128x256xf32, #tpu.memory_space<vmem>>, vector<1x1x128x256xf32>,
    %c0_81 = arith.constant 0 : index
    %c0_82 = arith.constant 0 : index
    %66 = vector.load %arg7[%c0_81, %c0_82] : memref<128x8xf32, #tpu.memory_space<vmem>>, vector<128x8xf32>
    %c9 = arith.constant 9 : index
    %c0_83 = arith.constant 0 : index
    %c0_84 = arith.constant 0 : index
    %67 = vector.load %arg9[%c9, %c0_83, %c0_84] : memref<21x8x256xf32, #tpu.memory_space<vmem>>, vector<1x8x256xf32>
    %68 = vector.shape_cast %67 : vector<1x8x256xf32> to vector<8x256xf32>
    %cst_85 = arith.constant dense<0.000000e+00> : vector<128x256xf32>
    %69 = tpu.matmul %66, %68, %cst_85 {dimension_numbers = #tpu.dot_dimension_numbers<[1], [0], [0], [1], [0, 0, 1, 1], [], []>} : vector<128x8xf32>, vector<8x256xf32>, vector<128x256xf32> -> vector<128x256xf32>
    %c0_86 = arith.constant 0 : index
    %c9_87 = arith.constant 9 : index
    %c0_88 = arith.constant 0 : index
    %c0_89 = arith.constant 0 : index
    %70 = vector.load %arg8[%c0_86, %c9_87, %c0_88, %c0_89] : memref<1x21x128x256xf32, #tpu.memory_space<vmem>>, vector<1x1x128x256xf32>
    %71 = vector.shape_cast %70 : vector<1x1x128x256xf32> to vector<128x256xf32>
    %72 = vector.shape_cast %69 : vector<128x256xf32> to vector<1x1x128x256xf32>
    tpu.vector_store %arg8[%c0_86, %c9_87, %c0_88, %c0_89], %72 {strides = array<i32>} : memref<1x21x128x256xf32, #tpu.memory_space<vmem>>, vector<1x1x128x256xf32>,
    %c0_90 = arith.constant 0 : index
    %c0_91 = arith.constant 0 : index
    %73 = vector.load %arg7[%c0_90, %c0_91] : memref<128x8xf32, #tpu.memory_space<vmem>>, vector<128x8xf32>
    %c10 = arith.constant 10 : index
    %c0_92 = arith.constant 0 : index
    %c0_93 = arith.constant 0 : index
    %74 = vector.load %arg9[%c10, %c0_92, %c0_93] : memref<21x8x256xf32, #tpu.memory_space<vmem>>, vector<1x8x256xf32>
    %75 = vector.shape_cast %74 : vector<1x8x256xf32> to vector<8x256xf32>
    %cst_94 = arith.constant dense<0.000000e+00> : vector<128x256xf32>
    %76 = tpu.matmul %73, %75, %cst_94 {dimension_numbers = #tpu.dot_dimension_numbers<[1], [0], [0], [1], [0, 0, 1, 1], [], []>} : vector<128x8xf32>, vector<8x256xf32>, vector<128x256xf32> -> vector<128x256xf32>
    %c0_95 = arith.constant 0 : index
    %c10_96 = arith.constant 10 : index
    %c0_97 = arith.constant 0 : index
    %c0_98 = arith.constant 0 : index
    %77 = vector.load %arg8[%c0_95, %c10_96, %c0_97, %c0_98] : memref<1x21x128x256xf32, #tpu.memory_space<vmem>>, vector<1x1x128x256xf32>
    %78 = vector.shape_cast %77 : vector<1x1x128x256xf32> to vector<128x256xf32>
    %79 = vector.shape_cast %76 : vector<128x256xf32> to vector<1x1x128x256xf32>
    tpu.vector_store %arg8[%c0_95, %c10_96, %c0_97, %c0_98], %79 {strides = array<i32>} : memref<1x21x128x256xf32, #tpu.memory_space<vmem>>, vector<1x1x128x256xf32>,
    %c0_99 = arith.constant 0 : index
    %c0_100 = arith.constant 0 : index
    %80 = vector.load %arg7[%c0_99, %c0_100] : memref<128x8xf32, #tpu.memory_space<vmem>>, vector<128x8xf32>
    %c11 = arith.constant 11 : index
    %c0_101 = arith.constant 0 : index
    %c0_102 = arith.constant 0 : index
    %81 = vector.load %arg9[%c11, %c0_101, %c0_102] : memref<21x8x256xf32, #tpu.memory_space<vmem>>, vector<1x8x256xf32>
    %82 = vector.shape_cast %81 : vector<1x8x256xf32> to vector<8x256xf32>
    %cst_103 = arith.constant dense<0.000000e+00> : vector<128x256xf32>
    %83 = tpu.matmul %80, %82, %cst_103 {dimension_numbers = #tpu.dot_dimension_numbers<[1], [0], [0], [1], [0, 0, 1, 1], [], []>} : vector<128x8xf32>, vector<8x256xf32>, vector<128x256xf32> -> vector<128x256xf32>
    %c0_104 = arith.constant 0 : index
    %c11_105 = arith.constant 11 : index
    %c0_106 = arith.constant 0 : index
    %c0_107 = arith.constant 0 : index
    %84 = vector.load %arg8[%c0_104, %c11_105, %c0_106, %c0_107] : memref<1x21x128x256xf32, #tpu.memory_space<vmem>>, vector<1x1x128x256xf32>
    %85 = vector.shape_cast %84 : vector<1x1x128x256xf32> to vector<128x256xf32>
    %86 = vector.shape_cast %83 : vector<128x256xf32> to vector<1x1x128x256xf32>
    tpu.vector_store %arg8[%c0_104, %c11_105, %c0_106, %c0_107], %86 {strides = array<i32>} : memref<1x21x128x256xf32, #tpu.memory_space<vmem>>, vector<1x1x128x256xf32>,
    %c0_108 = arith.constant 0 : index
    %c0_109 = arith.constant 0 : index
    %87 = vector.load %arg7[%c0_108, %c0_109] : memref<128x8xf32, #tpu.memory_space<vmem>>, vector<128x8xf32>
    %c12 = arith.constant 12 : index
    %c0_110 = arith.constant 0 : index
    %c0_111 = arith.constant 0 : index
    %88 = vector.load %arg9[%c12, %c0_110, %c0_111] : memref<21x8x256xf32, #tpu.memory_space<vmem>>, vector<1x8x256xf32>
    %89 = vector.shape_cast %88 : vector<1x8x256xf32> to vector<8x256xf32>
    %cst_112 = arith.constant dense<0.000000e+00> : vector<128x256xf32>
    %90 = tpu.matmul %87, %89, %cst_112 {dimension_numbers = #tpu.dot_dimension_numbers<[1], [0], [0], [1], [0, 0, 1, 1], [], []>} : vector<128x8xf32>, vector<8x256xf32>, vector<128x256xf32> -> vector<128x256xf32>
    %c0_113 = arith.constant 0 : index
    %c12_114 = arith.constant 12 : index
    %c0_115 = arith.constant 0 : index
    %c0_116 = arith.constant 0 : index
    %91 = vector.load %arg8[%c0_113, %c12_114, %c0_115, %c0_116] : memref<1x21x128x256xf32, #tpu.memory_space<vmem>>, vector<1x1x128x256xf32>
    %92 = vector.shape_cast %91 : vector<1x1x128x256xf32> to vector<128x256xf32>
    %93 = vector.shape_cast %90 : vector<128x256xf32> to vector<1x1x128x256xf32>
    tpu.vector_store %arg8[%c0_113, %c12_114, %c0_115, %c0_116], %93 {strides = array<i32>} : memref<1x21x128x256xf32, #tpu.memory_space<vmem>>, vector<1x1x128x256xf32>,
    %c0_117 = arith.constant 0 : index
    %c0_118 = arith.constant 0 : index
    %94 = vector.load %arg7[%c0_117, %c0_118] : memref<128x8xf32, #tpu.memory_space<vmem>>, vector<128x8xf32>
    %c13 = arith.constant 13 : index
    %c0_119 = arith.constant 0 : index
    %c0_120 = arith.constant 0 : index
    %95 = vector.load %arg9[%c13, %c0_119, %c0_120] : memref<21x8x256xf32, #tpu.memory_space<vmem>>, vector<1x8x256xf32>
    %96 = vector.shape_cast %95 : vector<1x8x256xf32> to vector<8x256xf32>
    %cst_121 = arith.constant dense<0.000000e+00> : vector<128x256xf32>
    %97 = tpu.matmul %94, %96, %cst_121 {dimension_numbers = #tpu.dot_dimension_numbers<[1], [0], [0], [1], [0, 0, 1, 1], [], []>} : vector<128x8xf32>, vector<8x256xf32>, vector<128x256xf32> -> vector<128x256xf32>
    %c0_122 = arith.constant 0 : index
    %c13_123 = arith.constant 13 : index
    %c0_124 = arith.constant 0 : index
    %c0_125 = arith.constant 0 : index
    %98 = vector.load %arg8[%c0_122, %c13_123, %c0_124, %c0_125] : memref<1x21x128x256xf32, #tpu.memory_space<vmem>>, vector<1x1x128x256xf32>
    %99 = vector.shape_cast %98 : vector<1x1x128x256xf32> to vector<128x256xf32>
    %100 = vector.shape_cast %97 : vector<128x256xf32> to vector<1x1x128x256xf32>
    tpu.vector_store %arg8[%c0_122, %c13_123, %c0_124, %c0_125], %100 {strides = array<i32>} : memref<1x21x128x256xf32, #tpu.memory_space<vmem>>, vector<1x1x128x256xf32>,
    %c0_126 = arith.constant 0 : index
    %c0_127 = arith.constant 0 : index
    %101 = vector.load %arg7[%c0_126, %c0_127] : memref<128x8xf32, #tpu.memory_space<vmem>>, vector<128x8xf32>
    %c14 = arith.constant 14 : index
    %c0_128 = arith.constant 0 : index
    %c0_129 = arith.constant 0 : index
    %102 = vector.load %arg9[%c14, %c0_128, %c0_129] : memref<21x8x256xf32, #tpu.memory_space<vmem>>, vector<1x8x256xf32>
    %103 = vector.shape_cast %102 : vector<1x8x256xf32> to vector<8x256xf32>
    %cst_130 = arith.constant dense<0.000000e+00> : vector<128x256xf32>
    %104 = tpu.matmul %101, %103, %cst_130 {dimension_numbers = #tpu.dot_dimension_numbers<[1], [0], [0], [1], [0, 0, 1, 1], [], []>} : vector<128x8xf32>, vector<8x256xf32>, vector<128x256xf32> -> vector<128x256xf32>
    %c0_131 = arith.constant 0 : index
    %c14_132 = arith.constant 14 : index
    %c0_133 = arith.constant 0 : index
    %c0_134 = arith.constant 0 : index
    %105 = vector.load %arg8[%c0_131, %c14_132, %c0_133, %c0_134] : memref<1x21x128x256xf32, #tpu.memory_space<vmem>>, vector<1x1x128x256xf32>
    %106 = vector.shape_cast %105 : vector<1x1x128x256xf32> to vector<128x256xf32>
    %107 = vector.shape_cast %104 : vector<128x256xf32> to vector<1x1x128x256xf32>
    tpu.vector_store %arg8[%c0_131, %c14_132, %c0_133, %c0_134], %107 {strides = array<i32>} : memref<1x21x128x256xf32, #tpu.memory_space<vmem>>, vector<1x1x128x256xf32>,
    %c0_135 = arith.constant 0 : index
    %c0_136 = arith.constant 0 : index
    %108 = vector.load %arg7[%c0_135, %c0_136] : memref<128x8xf32, #tpu.memory_space<vmem>>, vector<128x8xf32>
    %c15 = arith.constant 15 : index
    %c0_137 = arith.constant 0 : index
    %c0_138 = arith.constant 0 : index
    %109 = vector.load %arg9[%c15, %c0_137, %c0_138] : memref<21x8x256xf32, #tpu.memory_space<vmem>>, vector<1x8x256xf32>
    %110 = vector.shape_cast %109 : vector<1x8x256xf32> to vector<8x256xf32>
    %cst_139 = arith.constant dense<0.000000e+00> : vector<128x256xf32>
    %111 = tpu.matmul %108, %110, %cst_139 {dimension_numbers = #tpu.dot_dimension_numbers<[1], [0], [0], [1], [0, 0, 1, 1], [], []>} : vector<128x8xf32>, vector<8x256xf32>, vector<128x256xf32> -> vector<128x256xf32>
    %c0_140 = arith.constant 0 : index
    %c15_141 = arith.constant 15 : index
    %c0_142 = arith.constant 0 : index
    %c0_143 = arith.constant 0 : index
    %112 = vector.load %arg8[%c0_140, %c15_141, %c0_142, %c0_143] : memref<1x21x128x256xf32, #tpu.memory_space<vmem>>, vector<1x1x128x256xf32>
    %113 = vector.shape_cast %112 : vector<1x1x128x256xf32> to vector<128x256xf32>
    %114 = vector.shape_cast %111 : vector<128x256xf32> to vector<1x1x128x256xf32>
    tpu.vector_store %arg8[%c0_140, %c15_141, %c0_142, %c0_143], %114 {strides = array<i32>} : memref<1x21x128x256xf32, #tpu.memory_space<vmem>>, vector<1x1x128x256xf32>,
    %c0_144 = arith.constant 0 : index
    %c0_145 = arith.constant 0 : index
    %115 = vector.load %arg7[%c0_144, %c0_145] : memref<128x8xf32, #tpu.memory_space<vmem>>, vector<128x8xf32>
    %c16 = arith.constant 16 : index
    %c0_146 = arith.constant 0 : index
    %c0_147 = arith.constant 0 : index
    %116 = vector.load %arg9[%c16, %c0_146, %c0_147] : memref<21x8x256xf32, #tpu.memory_space<vmem>>, vector<1x8x256xf32>
    %117 = vector.shape_cast %116 : vector<1x8x256xf32> to vector<8x256xf32>
    %cst_148 = arith.constant dense<0.000000e+00> : vector<128x256xf32>
    %118 = tpu.matmul %115, %117, %cst_148 {dimension_numbers = #tpu.dot_dimension_numbers<[1], [0], [0], [1], [0, 0, 1, 1], [], []>} : vector<128x8xf32>, vector<8x256xf32>, vector<128x256xf32> -> vector<128x256xf32>
    %c0_149 = arith.constant 0 : index
    %c16_150 = arith.constant 16 : index
    %c0_151 = arith.constant 0 : index
    %c0_152 = arith.constant 0 : index
    %119 = vector.load %arg8[%c0_149, %c16_150, %c0_151, %c0_152] : memref<1x21x128x256xf32, #tpu.memory_space<vmem>>, vector<1x1x128x256xf32>
    %120 = vector.shape_cast %119 : vector<1x1x128x256xf32> to vector<128x256xf32>
    %121 = vector.shape_cast %118 : vector<128x256xf32> to vector<1x1x128x256xf32>
    tpu.vector_store %arg8[%c0_149, %c16_150, %c0_151, %c0_152], %121 {strides = array<i32>} : memref<1x21x128x256xf32, #tpu.memory_space<vmem>>, vector<1x1x128x256xf32>,
    %c0_153 = arith.constant 0 : index
    %c0_154 = arith.constant 0 : index
    %122 = vector.load %arg7[%c0_153, %c0_154] : memref<128x8xf32, #tpu.memory_space<vmem>>, vector<128x8xf32>
    %c17 = arith.constant 17 : index
    %c0_155 = arith.constant 0 : index
    %c0_156 = arith.constant 0 : index
    %123 = vector.load %arg9[%c17, %c0_155, %c0_156] : memref<21x8x256xf32, #tpu.memory_space<vmem>>, vector<1x8x256xf32>
    %124 = vector.shape_cast %123 : vector<1x8x256xf32> to vector<8x256xf32>
    %cst_157 = arith.constant dense<0.000000e+00> : vector<128x256xf32>
    %125 = tpu.matmul %122, %124, %cst_157 {dimension_numbers = #tpu.dot_dimension_numbers<[1], [0], [0], [1], [0, 0, 1, 1], [], []>} : vector<128x8xf32>, vector<8x256xf32>, vector<128x256xf32> -> vector<128x256xf32>
    %c0_158 = arith.constant 0 : index
    %c17_159 = arith.constant 17 : index
    %c0_160 = arith.constant 0 : index
    %c0_161 = arith.constant 0 : index
    %126 = vector.load %arg8[%c0_158, %c17_159, %c0_160, %c0_161] : memref<1x21x128x256xf32, #tpu.memory_space<vmem>>, vector<1x1x128x256xf32>
    %127 = vector.shape_cast %126 : vector<1x1x128x256xf32> to vector<128x256xf32>
    %128 = vector.shape_cast %125 : vector<128x256xf32> to vector<1x1x128x256xf32>
    tpu.vector_store %arg8[%c0_158, %c17_159, %c0_160, %c0_161], %128 {strides = array<i32>} : memref<1x21x128x256xf32, #tpu.memory_space<vmem>>, vector<1x1x128x256xf32>,
    %c0_162 = arith.constant 0 : index
    %c0_163 = arith.constant 0 : index
    %129 = vector.load %arg7[%c0_162, %c0_163] : memref<128x8xf32, #tpu.memory_space<vmem>>, vector<128x8xf32>
    %c18 = arith.constant 18 : index
    %c0_164 = arith.constant 0 : index
    %c0_165 = arith.constant 0 : index
    %130 = vector.load %arg9[%c18, %c0_164, %c0_165] : memref<21x8x256xf32, #tpu.memory_space<vmem>>, vector<1x8x256xf32>
    %131 = vector.shape_cast %130 : vector<1x8x256xf32> to vector<8x256xf32>
    %cst_166 = arith.constant dense<0.000000e+00> : vector<128x256xf32>
    %132 = tpu.matmul %129, %131, %cst_166 {dimension_numbers = #tpu.dot_dimension_numbers<[1], [0], [0], [1], [0, 0, 1, 1], [], []>} : vector<128x8xf32>, vector<8x256xf32>, vector<128x256xf32> -> vector<128x256xf32>
    %c0_167 = arith.constant 0 : index
    %c18_168 = arith.constant 18 : index
    %c0_169 = arith.constant 0 : index
    %c0_170 = arith.constant 0 : index
    %133 = vector.load %arg8[%c0_167, %c18_168, %c0_169, %c0_170] : memref<1x21x128x256xf32, #tpu.memory_space<vmem>>, vector<1x1x128x256xf32>
    %134 = vector.shape_cast %133 : vector<1x1x128x256xf32> to vector<128x256xf32>
    %135 = vector.shape_cast %132 : vector<128x256xf32> to vector<1x1x128x256xf32>
    tpu.vector_store %arg8[%c0_167, %c18_168, %c0_169, %c0_170], %135 {strides = array<i32>} : memref<1x21x128x256xf32, #tpu.memory_space<vmem>>, vector<1x1x128x256xf32>,
    %c0_171 = arith.constant 0 : index
    %c0_172 = arith.constant 0 : index
    %136 = vector.load %arg7[%c0_171, %c0_172] : memref<128x8xf32, #tpu.memory_space<vmem>>, vector<128x8xf32>
    %c19 = arith.constant 19 : index
    %c0_173 = arith.constant 0 : index
    %c0_174 = arith.constant 0 : index
    %137 = vector.load %arg9[%c19, %c0_173, %c0_174] : memref<21x8x256xf32, #tpu.memory_space<vmem>>, vector<1x8x256xf32>
    %138 = vector.shape_cast %137 : vector<1x8x256xf32> to vector<8x256xf32>
    %cst_175 = arith.constant dense<0.000000e+00> : vector<128x256xf32>
    %139 = tpu.matmul %136, %138, %cst_175 {dimension_numbers = #tpu.dot_dimension_numbers<[1], [0], [0], [1], [0, 0, 1, 1], [], []>} : vector<128x8xf32>, vector<8x256xf32>, vector<128x256xf32> -> vector<128x256xf32>
    %c0_176 = arith.constant 0 : index
    %c19_177 = arith.constant 19 : index
    %c0_178 = arith.constant 0 : index
    %c0_179 = arith.constant 0 : index
    %140 = vector.load %arg8[%c0_176, %c19_177, %c0_178, %c0_179] : memref<1x21x128x256xf32, #tpu.memory_space<vmem>>, vector<1x1x128x256xf32>
    %141 = vector.shape_cast %140 : vector<1x1x128x256xf32> to vector<128x256xf32>
    %142 = vector.shape_cast %139 : vector<128x256xf32> to vector<1x1x128x256xf32>
    tpu.vector_store %arg8[%c0_176, %c19_177, %c0_178, %c0_179], %142 {strides = array<i32>} : memref<1x21x128x256xf32, #tpu.memory_space<vmem>>, vector<1x1x128x256xf32>,
    %c0_180 = arith.constant 0 : index
    %c0_181 = arith.constant 0 : index
    %143 = vector.load %arg7[%c0_180, %c0_181] : memref<128x8xf32, #tpu.memory_space<vmem>>, vector<128x8xf32>
    %c20 = arith.constant 20 : index
    %c0_182 = arith.constant 0 : index
    %c0_183 = arith.constant 0 : index
    %144 = vector.load %arg9[%c20, %c0_182, %c0_183] : memref<21x8x256xf32, #tpu.memory_space<vmem>>, vector<1x8x256xf32>
    %145 = vector.shape_cast %144 : vector<1x8x256xf32> to vector<8x256xf32>
    %cst_184 = arith.constant dense<0.000000e+00> : vector<128x256xf32>
    %146 = tpu.matmul %143, %145, %cst_184 {dimension_numbers = #tpu.dot_dimension_numbers<[1], [0], [0], [1], [0, 0, 1, 1], [], []>} : vector<128x8xf32>, vector<8x256xf32>, vector<128x256xf32> -> vector<128x256xf32>
    %c0_185 = arith.constant 0 : index
    %c20_186 = arith.constant 20 : index
    %c0_187 = arith.constant 0 : index
    %c0_188 = arith.constant 0 : index
    %147 = vector.load %arg8[%c0_185, %c20_186, %c0_187, %c0_188] : memref<1x21x128x256xf32, #tpu.memory_space<vmem>>, vector<1x1x128x256xf32>
    %148 = vector.shape_cast %147 : vector<1x1x128x256xf32> to vector<128x256xf32>
    %149 = vector.shape_cast %146 : vector<128x256xf32> to vector<1x1x128x256xf32>
    tpu.vector_store %arg8[%c0_185, %c20_186, %c0_187, %c0_188], %149 {strides = array<i32>} : memref<1x21x128x256xf32, #tpu.memory_space<vmem>>, vector<1x1x128x256xf32>,
    return
  }
  func.func @transform_0(%arg0: i32, %arg1: i32, %arg2: i32) -> (i32, i32, i32) {
    %c0_i32 = arith.constant 0 : i32
    %c0_i32_0 = arith.constant 0 : i32
    %c0_i32_1 = arith.constant 0 : i32
    return %arg0, %c0_i32, %c0_i32_0 : i32, i32, i32
  }
  func.func @transform_1(%arg0: i32, %arg1: i32, %arg2: i32) -> (i32, i32) {
    %c0_i32 = arith.constant 0 : i32
    %c0_i32_0 = arith.constant 0 : i32
    return %arg1, %c0_i32 : i32, i32
  }
  func.func @transform_2(%arg0: i32, %arg1: i32, %arg2: i32) -> (i32, i32) {
    %c0_i32 = arith.constant 0 : i32
    %c0_i32_0 = arith.constant 0 : i32
    return %arg1, %c0_i32 : i32, i32
  }
  func.func @transform_3(%arg0: i32, %arg1: i32, %arg2: i32) -> (i32, i32) {
    %c0_i32 = arith.constant 0 : i32
    %c0_i32_0 = arith.constant 0 : i32
    %c0_i32_1 = arith.constant 0 : i32
    return %c0_i32, %c0_i32_0 : i32, i32
  }
  func.func @transform_4(%arg0: i32, %arg1: i32, %arg2: i32) -> (i32, i32) {
    %c0_i32 = arith.constant 0 : i32
    %c0_i32_0 = arith.constant 0 : i32
    return %arg2, %c0_i32 : i32, i32
  }
  func.func @transform_5(%arg0: i32, %arg1: i32, %arg2: i32) -> (i32, i32, i32, i32) {
    %c0_i32 = arith.constant 0 : i32
    %c0_i32_0 = arith.constant 0 : i32
    return %arg0, %arg1, %arg2, %c0_i32 : i32, i32, i32, i32
  }
}

</mosaic_0001>

<bundles_post_ra>
// kernel: tpu_custom_call.1
= control target key start
LH: loop header
LB: loop body
LE: loop exit
PB: predicated region body
PF: predicated region fallthrough
CT: control target
= control target key end

     0   :  { %10 = vsyncpa [#allocation4], 0  ;;  %s11815_s0 = inlined_call_operand.vmem [shape: f32[2,512,64], index: 0, kind: input, shape index: {}]   ;;  %s11816_s1 = inlined_call_operand.hbm [shape: f32[21,512], index: 1, kind: input, shape index: {}]   ;;  %s11817_s2 = inlined_call_operand.vmem [shape: f32[21,1], index: 2, kind: input, shape index: {}]   ;;  %s11818_s3 = inlined_call_operand.hbm [shape: f32[8,256], index: 3, kind: input, shape index: {}]   ;;  %s11819_s4 = inlined_call_operand.vmem [shape: f32[256,8], index: 4, kind: input, shape index: {}]   ;;  %s11820_s5 = inlined_call_operand.hbm [shape: f32[2,21,256,256], index: 5, kind: output, shape index: {}]  }
   0x1   :  { %11 = vsyncpa [#allocation7], 0 }
   0x2   :  { %12 = vsyncpa [#allocation5], 0 }
   0x3   :  { %14 = vsyncpa [#allocation5 + $0x1], 0  ;;  %s8821_s18 = smov 0   ;;  %s8823_s19 = smov 0  }
   0x4   :  { %s8825_s20 = smov 0   ;;  %s8827_s21 = smov 0  }
   0x5   :  { %s8829_s22 = smov 0   ;;  %s8831_s23 = smov 0  }
   0x6   :  { %s8833_s24 = smov 0   ;;  %s8835_s25 = smov 0  }
   0x7 LB: > { %11824 = sst [smem:[#allocation14_spill]] %s8767_s24  ;;  %s7135_s26 = sadd.s32 4294967295, %s8771_s25   ;;  %s8771_s25 = sphi %s8835_s25, %s20_s25   ;;  %s8767_s24 = sphi %s8833_s24, %s11835_s24   ;;  %s8763_s23 = sphi %s8831_s23, %s11840_s23   ;;  %s8759_s22 = sphi %s8829_s22, %s11833_s22   ;;  %s8755_s21 = sphi %s8827_s21, %s11839_s21   ;;  %s8751_s20 = sphi %s8825_s20, %s11838_s20   ;;  %s8747_s19 = sphi %s8823_s19, %s11837_s19   ;;  %s8743_s18 = sphi %s8821_s18, %s11836_s18  }
   0x8   : > { %s7136_s27 = sadd.s32 4294967294, %s8771_s25   ;;  %s32_s28 = sadd.s32 1, %s8763_s23 }
   0x9   : > { %s39_s29 = sadd.s32 1, %s8767_s24  ;;  %p33_p0 = scmp.ge.s32.totalorder %s32_s28, 2 }
   0xa   : > { %s175_s30 = sadd.s32 1, %s8751_s20  ;;  %p185_p1 = scmp.ne.s32.totalorder %s8751_s20, %s8747_s19 }
   0xb   : > { %p186_p2 = scmp.eq.s32.totalorder %s7135_s26, 3  ;;  %s11842_s28 = smov (%p33_p0, %s32_s28), 0 }
   0xc   : > { %11825 = sst [smem:[#allocation15_spill]] %s11842_s28  ;;  %s11844_s29 = smov (!%p33_p0, %s39_s29), %s8767_s24 }
   0xd   : > { %s171_s6 = ssub.s32 %s8763_s23, %s11842_s28  ;;  %p8873_p3 = por %p186_p2, %p185_p1 }
   0xe   : > { %p41_p4 = scmp.ge.s32.totalorder %s11844_s29, 2  ;;  %p191_p5 = scmp.ne.s32.totalorder %s8747_s19, %s8743_s18 }
   0xf   : > { %p192_p6 = scmp.eq.s32.totalorder %s7136_s27, 3  ;;  %p7137_p7 = scmp.ge.s32.totalorder %s8771_s25, 1 }
  0x10   : > { %s11846_s29 = smov (%p41_p4, %s11844_s29), 0  ;;  %p199_p9 = scmp.lt.s32.totalorder %s8771_s25, 5 }
  0x11   : > { %11827 = sst [smem:[#allocation16_spill]] %s11846_s29  ;;  %p8882_p8 = por %p192_p6, %p191_p5 }
  0x12   : > { %s168_s9 = ssub.s32 %s8767_s24, %s11846_s29  ;;  %p8889_p10 = pnand %p7137_p7, %p199_p9 }
  0x13   : > { %s172_s10 = sor.u32 %s171_s6, %s168_s9  ;;  %p8893_p12 = scmp.eq.s32.totalorder %s7135_s26, 0 }
  0x14   : > { %p173_p11 = scmp.eq.s32.totalorder %s172_s10, 0  ;;  %p8537_p13 = pneg %p8889_p10 }
  0x15   : > { %s214_s15 = sshll.u32 %s11816_s1, 4  ;;  %s8773_s17 = smov [#allocation3]   ;;  %s215_s15 = int_to_ptr.hbm [resolvable:$true] %s214_s15 }
  0x16   : > { %s8903_s16 = scalar_select %p173_p11, %s8751_s20, %s175_s30  }
  0x17   : > { %s216_s27 = sshll.u32 %s8773_s17, 4  ;;  %p8538_p0 = pnand %p8893_p12, %p8537_p13  ;;  %s217_s27 = int_to_ptr.vmem [resolvable:$true] %s216_s27 }
  0x18   : > { %s8774_s6 = smov 512   ;;  %s8775_s26 = smov 32  }
  0x19   : > { %8540 = dma.hbm_to_vmem [thread:$0]  (!%p8538_p0), %s215_s15, 1536, %s217_s27, [#allocation4], %s8774_s6, %s8774_s6, %s8775_s26  }
  0x1a   : > { %s238_s29 = sshll.u32 %s11818_s3, 4  ;;  %s8776_s28 = smov [#allocation6]   ;;  %s239_s29 = int_to_ptr.hbm [resolvable:$true] %s238_s29 }
  0x1b   : > { %s240_s24 = sshll.u32 %s8776_s28, 4  ;;  %270 = sbr.rel (%p8889_p10) target bundleno = 2096 (0x830), region = 40  ;;  %s241_s24 = int_to_ptr.vmem [resolvable:$true] %s240_s24 }
  0x1c   : > { %8543 = dma.hbm_to_vmem [thread:$0]  (!%p8538_p0), %s239_s29, 256, %s241_s24, [#allocation7]  }
  0x20   : > { %8730 = dma.done.wait (%p8893_p12), [#allocation4], 1536  }
  0x21   : > { %8732 = vsyncadd (%p8893_p12), [#allocation4], 4294965760 }
  0x22   : > { %8734 = dma.done.wait (%p8893_p12), [#allocation7], 256  }
  0x23   : > { %8736 = vsyncadd (%p8893_p12), [#allocation7], 4294967040  ;;  %s311_s24 = sand.u32 1, %s8747_s19   ;;  %p314_p1 = scmp.lt.s32.totalorder %s8759_s22, 1 }
  0x24   : > { %s8519_s28 = smul.u32 5376, %s311_s24  ;;  %s7147_s29 = sshll.u32 %s8755_s21, 4 }
  0x25   : > { %s315_s30 = scalar_select %p314_p1, %s8759_s22, 1 }
  0x26   : > { %p327_p2 = scmp.lt.s32.totalorder %s7147_s29, 31  ;;  %s8936_s26 = scalar_lea.vmem [#allocation8], %s8519_s28 }
  0x27   : > { %s8515_s11 = sshll.u32 %s315_s30, 9  ;;  %p7149_p4 = scmp.ne.s32.totalorder %s8755_s21, 0 }
  0x28   : > { %s8929_s15 = scalar_lea.vmem %s11815_s0, %s8515_s11  ;;  %s11848_s29 = smov (!%p327_p2, %s7147_s29), 31 }
  0x29   : > { %s7148_s12 = sshll.u32 %s11848_s29, 3  ;;  %337 = sbr.rel (%p7149_p4) target bundleno = 613 (0x265), region = 52 }
  0x2a   : > { %s8934_s6 = scalar_lea.vmem %s11819_s4, %s7148_s12  ;;  %s8778_s13 = smov (!%p7149_p4), 104  }
  0x2b   : > { %s8779_s14 = smov (!%p7149_p4), 120   ;;  %s8781_s12 = smov (!%p7149_p4), 88  }
  0x2c   : > { %s8782_s17 = smov (!%p7149_p4), 96   ;;  %s8783_s27 = smov (!%p7149_p4), 72  }
  0x2d   : > { %s8784_s9 = smov (!%p7149_p4), 80  }
  0x2e   : > { %v365_v0 = vld [vmem:[%s8929_s15 + $0x78] sm:$0xff]  ;;  %v364_v2 = vld [vmem:[%s8929_s15 + $0x70] sm:$0xff]  ;;  %v363_v6 = vld [vmem:[%s8929_s15 + $0x68] sm:$0xff]  ;;  %vm538_vm0 = vcmask 64512   ;;  %vm609_vm1 = vcmask 1040384   ;;  %vm611_vm2 = vcmask 1041409  }
  0x2f   : > { %v397_v1 = vld [vmem:[%s8929_s15 + $0x178] sm:$0xff]  ;;  %432 = vmatpush.msra.mxu0 %v365_v0  ;;  %v396_v4 = vld [vmem:[%s8929_s15 + $0x170] sm:$0xff]  ;;  %v395_v8 = vld [vmem:[%s8929_s15 + $0x168] sm:$0xff]  ;;  %vm614_vm3 = vcmask 1042434   ;;  %vm617_vm4 = vcmask 1043459   ;;  %vm620_vm5 = vcmask 1044484  }
  0x30   : > { %484 = vmatpush.msra.mxu2 %v397_v1  ;;  %v381_v3 = vld [vmem:[%s8929_s15 + $0xf8] sm:$0xff]  ;;  %v380_v7 = vld [vmem:[%s8929_s15 + $0xf0] sm:$0xff]  ;;  %v379_v10 = vld [vmem:[%s8929_s15 + $0xe8] sm:$0xff]  ;;  %vm623_vm7 = vcmask 1045509   ;;  %vm626_vm8 = vcmask 1046534   ;;  %vm629_vm9 = vcmask 1046528  }
  0x31   : > { %v413_v5 = vld [vmem:[%s8929_s15 + $0x1f8] sm:$0xff]  ;;  %458 = vmatpush.msra.mxu1 %v381_v3  ;;  %433 = vmatpush.msra.mxu0 %v364_v2  ;;  %v412_v9 = vld [vmem:[%s8929_s15 + $0x1f0] sm:$0xff]  ;;  %v362_v11 = vld [vmem:[%s8929_s15 + $0x60] sm:$0xff] }
  0x32   : > { %510 = vmatpush.msra.mxu3 %v413_v5  ;;  %485 = vmatpush.msra.mxu2 %v396_v4  ;;  %v394_v12 = vld [vmem:[%s8929_s15 + $0x160] sm:$0xff]  ;;  %v411_v13 = vld [vmem:[%s8929_s15 + $0x1e8] sm:$0xff]  ;;  %v361_v16 = vld [vmem:[%s8929_s15 + $0x58] sm:$0xff] }
  0x33   : > { %459 = vmatpush.msra.mxu1 %v380_v7  ;;  %434 = vmatpush.msra.mxu0 %v363_v6  ;;  %v378_v14 = vld [vmem:[%s8929_s15 + $0xe0] sm:$0xff]  ;;  %v393_v17 = vld [vmem:[%s8929_s15 + $0x158] sm:$0xff]  ;;  %v360_v20 = vld [vmem:[%s8929_s15 + $0x50] sm:$0xff]  ;;  %v8777_v6 = vmov 0  }
  0x34   : > { %511 = vmatpush.msra.mxu3 %v412_v9  ;;  %486 = vmatpush.msra.mxu2 %v395_v8  ;;  %v410_v15 = vld [vmem:[%s8929_s15 + $0x1e0] sm:$0xff]  ;;  %v377_v18 = vld [vmem:[%s8929_s15 + $0xd8] sm:$0xff]  ;;  %v392_v21 = vld [vmem:[%s8929_s15 + $0x150] sm:$0xff] }
  0x35   : > { %460 = vmatpush.msra.mxu1 %v379_v10  ;;  %435 = vmatpush.msra.mxu0 %v362_v11  ;;  %v409_v19 = vld [vmem:[%s8929_s15 + $0x1d8] sm:$0xff]  ;;  %v376_v22 = vld [vmem:[%s8929_s15 + $0xd0] sm:$0xff]  ;;  %v359_v24 = vld [vmem:[%s8929_s15 + $0x48] sm:$0xff] }
  0x36   : > { %512 = vmatpush.msra.mxu3 %v411_v13  ;;  %487 = vmatpush.msra.mxu2 %v394_v12  ;;  %v408_v23 = vld [vmem:[%s8929_s15 + $0x1d0] sm:$0xff]  ;;  %v391_v25 = vld [vmem:[%s8929_s15 + $0x148] sm:$0xff]  ;;  %v358_v28 = vld [vmem:[%s8929_s15 + $0x40] sm:$0xff] }
  0x37   : > { %461 = vmatpush.msra.mxu1 %v378_v14  ;;  %436 = vmatpush.msra.mxu0 %v361_v16  ;;  %v375_v26 = vld [vmem:[%s8929_s15 + $0xc8] sm:$0xff]  ;;  %v390_v29 = vld [vmem:[%s8929_s15 + $0x140] sm:$0xff]  ;;  %v357_v32 = vld [vmem:[%s8929_s15 + $0x38] sm:$0xff] }
  0x38   : > { %513 = vmatpush.msra.mxu3 %v410_v15  ;;  %488 = vmatpush.msra.mxu2 %v393_v17  ;;  %v407_v27 = vld [vmem:[%s8929_s15 + $0x1c8] sm:$0xff]  ;;  %v374_v30 = vld [vmem:[%s8929_s15 + $0xc0] sm:$0xff]  ;;  %v389_v33 = vld [vmem:[%s8929_s15 + $0x138] sm:$0xff] }
  0x39   : > { %462 = vmatpush.msra.mxu1 %v377_v18  ;;  %437 = vmatpush.msra.mxu0 %v360_v20  ;;  %v406_v31 = vld [vmem:[%s8929_s15 + $0x1c0] sm:$0xff]  ;;  %v373_v34 = vld [vmem:[%s8929_s15 + $0xb8] sm:$0xff]  ;;  %v356_v36 = vld [vmem:[%s8929_s15 + $0x30] sm:$0xff] }
  0x3a   : > { %514 = vmatpush.msra.mxu3 %v409_v19  ;;  %489 = vmatpush.msra.mxu2 %v392_v21  ;;  %v405_v35 = vld [vmem:[%s8929_s15 + $0x1b8] sm:$0xff]  ;;  %v388_v37 = vld [vmem:[%s8929_s15 + $0x130] sm:$0xff]  ;;  %v355_v40 = vld [vmem:[%s8929_s15 + $0x28] sm:$0xff] }
  0x3b   : > { %463 = vmatpush.msra.mxu1 %v376_v22  ;;  %438 = vmatpush.msra.mxu0 %v359_v24  ;;  %v372_v38 = vld [vmem:[%s8929_s15 + $0xb0] sm:$0xff]  ;;  %v387_v41 = vld [vmem:[%s8929_s15 + $0x128] sm:$0xff]  ;;  %v354_v44 = vld [vmem:[%s8929_s15 + $0x20] sm:$0xff] }
  0x3c   : > { %515 = vmatpush.msra.mxu3 %v408_v23  ;;  %490 = vmatpush.msra.mxu2 %v391_v25  ;;  %v404_v39 = vld [vmem:[%s8929_s15 + $0x1b0] sm:$0xff]  ;;  %v371_v42 = vld [vmem:[%s8929_s15 + $0xa8] sm:$0xff]  ;;  %v386_v45 = vld [vmem:[%s8929_s15 + $0x120] sm:$0xff] }
  0x3d   : > { %464 = vmatpush.msra.mxu1 %v375_v26  ;;  %439 = vmatpush.msra.mxu0 %v358_v28  ;;  %v403_v43 = vld [vmem:[%s8929_s15 + $0x1a8] sm:$0xff]  ;;  %v370_v46 = vld [vmem:[%s8929_s15 + $0xa0] sm:$0xff]  ;;  %v353_v48 = vld [vmem:[%s8929_s15 + $0x18] sm:$0xff] }
  0x3e   : > { %516 = vmatpush.msra.mxu3 %v407_v27  ;;  %491 = vmatpush.msra.mxu2 %v390_v29  ;;  %v402_v47 = vld [vmem:[%s8929_s15 + $0x1a0] sm:$0xff]  ;;  %v385_v49 = vld [vmem:[%s8929_s15 + $0x118] sm:$0xff]  ;;  %v352_v52 = vld [vmem:[%s8929_s15 + $0x10] sm:$0xff] }
  0x3f   : > { %465 = vmatpush.msra.mxu1 %v374_v30  ;;  %440 = vmatpush.msra.mxu0 %v357_v32  ;;  %v369_v50 = vld [vmem:[%s8929_s15 + $0x98] sm:$0xff]  ;;  %v384_v53 = vld [vmem:[%s8929_s15 + $0x110] sm:$0xff]  ;;  %v351_v56 = vld [vmem:[%s8929_s15 + $0x8] sm:$0xff] }
  0x40   : > { %517 = vmatpush.msra.mxu3 %v406_v31  ;;  %492 = vmatpush.msra.mxu2 %v389_v33  ;;  %v401_v51 = vld [vmem:[%s8929_s15 + $0x198] sm:$0xff]  ;;  %v368_v54 = vld [vmem:[%s8929_s15 + $0x90] sm:$0xff]  ;;  %v383_v57 = vld [vmem:[%s8929_s15 + $0x108] sm:$0xff] }
  0x41   : > { %466 = vmatpush.msra.mxu1 %v373_v34  ;;  %441 = vmatpush.msra.mxu0 %v356_v36  ;;  %v400_v55 = vld [vmem:[%s8929_s15 + $0x190] sm:$0xff]  ;;  %v367_v58 = vld [vmem:[%s8929_s15 + $0x88] sm:$0xff]  ;;  %v350_v60 = vld [vmem:[%s8929_s15] sm:$0xff] }
  0x42   : > { %518 = vmatpush.msra.mxu3 %v405_v35  ;;  %493 = vmatpush.msra.mxu2 %v388_v37  ;;  %v399_v59 = vld [vmem:[%s8929_s15 + $0x188] sm:$0xff]  ;;  %v382_v61 = vld [vmem:[%s8929_s15 + $0x100] sm:$0xff]  ;;  %v338_v62 = vld [vmem:[#allocation3] sm:$0xff] }
  0x43   : > { %467 = vmatpush.msra.mxu1 %v372_v38  ;;  %442 = vmatpush.msra.mxu0 %v355_v40  ;;  %v340_v63 = vld [vmem:[#allocation3 + $0x10] sm:$0xff]  ;;  %v339_v2 = vld [vmem:[#allocation3 + $0x8] sm:$0xff]  ;;  %v341_v3 = vld [vmem:[#allocation3 + $0x18] sm:$0xff] }
  0x44   : > { %519 = vmatpush.msra.mxu3 %v404_v39  ;;  %494 = vmatpush.msra.mxu2 %v387_v41  ;;  %v366_v0 = vld [vmem:[%s8929_s15 + $0x80] sm:$0xff]  ;;  %v416_v5 = vld [vmem:[%s11817_s2 + $0x10] sm:$0x1f]  ;;  %v343_v9 = vld [vmem:[#allocation3 + $0x28] sm:$0xff] }
  0x45   : > { %468 = vmatpush.msra.mxu1 %v371_v42  ;;  %443 = vmatpush.msra.mxu0 %v354_v44  ;;  %v398_v1 = vld [vmem:[%s8929_s15 + $0x180] sm:$0xff]  ;;  %v342_v7 = vld [vmem:[#allocation3 + $0x20] sm:$0xff]  ;;  %v345_v10 = vld [vmem:[#allocation3 + $0x38] sm:$0xff]  ;;  %s8780_s15 = smov 112  }
  0x46   : > { %520 = vmatpush.msra.mxu3 %v403_v43  ;;  %495 = vmatpush.msra.mxu2 %v386_v45  ;;  %v414_v4 = vld [vmem:[%s11817_s2] sm:$0xff]  ;;  %v415_v11 = vld [vmem:[%s11817_s2 + $0x8] sm:$0xff]  ;;  %v346_v13 = vld [vmem:[#allocation3 + $0x40] sm:$0x1f] }
  0x47   : > { %469 = vmatpush.msra.mxu1 %v370_v46  ;;  %444 = vmatpush.msra.mxu0 %v353_v48  ;;  %v344_v8 = vld [vmem:[#allocation3 + $0x30] sm:$0xff]  ;;  %v349_v14 = vld [vmem:[#allocation3 + $0x58] sm:$0x1f]  ;;  %v347_v15 = vld [vmem:[#allocation3 + $0x48] sm:$0x1f] }
  0x48   : > { %521 = vmatpush.msra.mxu3 %v402_v47  ;;  %496 = vmatpush.msra.mxu2 %v385_v49  ;;  %v348_v12 = vld [vmem:[#allocation3 + $0x50] sm:$0x1f]  ;;  %v9012_v16 = vld [vmem:[#allocation6] sm:$0xff]  ;;  %v9014_v17 = vld [vmem:[#allocation6 + $0x8] sm:$0xff] }
  0x49   : > { %470 = vmatpush.msra.mxu1 %v369_v50  ;;  %445 = vmatpush.msra.mxu0 %v352_v52  ;;  %v677_v50 = vlaneseq }
  0x4a   : > { %522 = vmatpush.msra.mxu3 %v401_v51  ;;  %497 = vmatpush.msra.mxu2 %v384_v53 }
  0x4b   : > { %471 = vmatpush.msra.mxu1 %v368_v54  ;;  %446 = vmatpush.msra.mxu0 %v351_v56  ;;  %vm9047_vm6 = vcmp.lt.s32.totalorder %v677_v50, 256 }
  0x4c   : > { %523 = vmatpush.msra.mxu3 %v400_v55  ;;  %498 = vmatpush.msra.mxu2 %v383_v57 }
  0x4d   : > { %472 = vmatpush.msra.mxu1 %v367_v58  ;;  %447 = vmatpush.msra.mxu0 %v350_v60 }
  0x4e   : > { %524 = vmatpush.msra.mxu3 %v399_v59  ;;  %499 = vmatpush.msra.mxu2 %v382_v61 }
  0x4f   : > { %448 = vmatmul.f32.vlgmr.msra.gmra.mxu0 %v338_v62  ;;  %500 = vmatmul.f32.vlgmr.msra.gmra.mxu2 %v340_v63 }
  0x50   : > { %473 = vmatpush.msra.mxu1 %v366_v0  ;;  %525 = vmatpush.msra.mxu3 %v398_v1 }
  0x51   : > { %474 = vmatmul.f32.vlgmr.msra.gmra.mxu1 %v339_v2  ;;  %526 = vmatmul.f32.vlgmr.msra.gmra.mxu3 %v341_v3 }
  0x52   : > { %8635 = vset.pattern.permute.xlu0 %v8777_v6  ;;  %8636 = vset.pattern.permute.xlu1 %v8777_v6 }
  0x53   : > { %419 = vperm.xlu0 %8635, %v414_v4   ;;  %429 = vperm.xlu1 %8636, %v416_v5  }
  0x54   : > { %563 = vmatpush.msrb.mxu0 %v9012_v16  ;;  %589 = vmatpush.msrb.mxu1 %v9014_v17 }
  0x55   : > { %798 = vmatpush.msrb.mxu3 %v9014_v17  ;;  %772 = vmatpush.msrb.mxu2 %v9012_v16 }
  0x56   : > { %996 = vmatpush.msra.mxu1 %v9014_v17  ;;  %970 = vmatpush.msra.mxu0 %v9012_v16 }
  0x57   : > { %451 = vmatmul.f32.gmra.mxu0 %v342_v7  ;;  %503 = vmatmul.f32.gmra.mxu2 %v344_v8 }
  0x58   : > { %1194 = vmatpush.msra.mxu3 %v9014_v17  ;;  %1168 = vmatpush.msra.mxu2 %v9012_v16 }
  0x59   : > { %477 = vmatmul.f32.gmra.mxu1 %v343_v9  ;;  %529 = vmatmul.f32.gmra.mxu3 %v345_v10 }
  0x5b   : > { %424 = vperm.xlu0 %8635, %v415_v11  }
  0x5f   : > { %506 = vmatmul.f32.gmra.mxu2 %v348_v12  ;;  %454 = vmatmul.f32.gmra.mxu0 %v346_v13 }
  0x61   : > { %532 = vmatmul.f32.gmra.mxu3 %v349_v14  ;;  %480 = vmatmul.f32.gmra.mxu1 %v347_v15 }
  0xc5   : > { %v420_v18 = vpop.permute.xlu0 %419  ;;  %v430_v33 = vpop.permute.xlu1 %429 }
  0xcc   : > { %v449_v19 = vpop.f32.mrf.mxu0 }
  0xcd   : > { %v450_v20 = vadd.f32 %v449_v19, %v420_v18  ;;  %v425_v24 = vpop.permute.xlu0 %424 }
  0xce   : > { %v475_v21 = vpop.f32.mrf.mxu1 }
  0xcf   : > { %v476_v22 = vadd.f32 %v475_v21, %v450_v20 }
  0xd2   : > { %v501_v23 = vpop.f32.mrf.mxu2 }
  0xd3   : > { %v502_v25 = vadd.f32 %v501_v23, %v476_v22 }
  0xd4   : > { %v452_v26 = vpop.f32.mrf.mxu0  ;;  %v527_v27 = vpop.f32.mrf.mxu3 }
  0xd5   : > { %v453_v28 = vadd.f32 %v452_v26, %v425_v24  ;;  %v528_v29 = vadd.f32 %v527_v27, %v502_v25 }
  0xd6   : > { %v478_v30 = vpop.f32.mrf.mxu1 }
  0xd7   : > { %1141 = vrot.lane.b32.xlu0 %v528_v29, %s8778_s13  ;;  %745 = vrot.lane.b32.xlu1 %v528_v29, %s8779_s14  ;;  %v479_v31 = vadd.f32 %v478_v30, %v453_v28 }
  0xd8   : > { %7150 = vmatmul.msk.f32.vlgmr.msrb.gmra.mxu0 %vm538_vm0, %v528_v29  ;;  %7153 = vmatmul.msk.f32.vlgmr.msrb.gmra.mxu1 %vm538_vm0, %v528_v29 }
  0xd9   : > { %1392 = vmatpush.msrb.mxu1 %v9014_v17  ;;  %1366 = vmatpush.msrb.mxu0 %v9012_v16 }
  0xda   : > { %v504_v32 = vpop.f32.mrf.mxu2 }
  0xdb   : > { %v505_v34 = vadd.f32 %v504_v32, %v479_v31 }
  0xdc   : > { %v530_v35 = vpop.f32.mrf.mxu3  ;;  %v455_v36 = vpop.f32.mrf.mxu0 }
  0xdd   : > { %v531_v37 = vadd.f32 %v530_v35, %v505_v34  ;;  %v456_v38 = vadd.f32 %v455_v36, %v430_v33 }
  0xde   : > { %v481_v39 = vpop.f32.mrf.mxu1 }
  0xdf   : > { %747 = vrot.lane.b32.xlu2 %v531_v37, %s8779_s14  ;;  %945 = vrot.lane.b32.xlu0 %v531_v37, %s8780_s15  ;;  %v482_v40 = vadd.f32 %v481_v39, %v456_v38 }
  0xe0   : > { %943 = vrot.lane.b32.xlu1 %v528_v29, %s8780_s15  ;;  %7151 = vmatmul.msk.f32.gmra.mxu0 %vm538_vm0, %v531_v37 }
  0xe1   : > { %7154 = vmatmul.msk.f32.gmra.mxu1 %vm538_vm0, %v531_v37 }
  0xe2   : > { %v507_v41 = vpop.f32.mrf.mxu2 }
  0xe3   : > { %v508_v42 = vadd.f32 %v507_v41, %v482_v40 }
  0xe4   : > { %v533_v43 = vpop.f32.mrf.mxu3 }
  0xe5   : > { %v534_v44 = vadd.f32 %v533_v43, %v508_v42 }
  0xe7   : > { %749 = vrot.lane.b32.xlu2 %v534_v44, %s8779_s14  ;;  %1537 = vrot.lane.b32.xlu0 %v528_v29, %s8781_s12 }
  0xe8   : > { %1145 = vrot.lane.b32.xlu1 %v534_v44, %s8778_s13  ;;  %7152 = vmatmul.msk.f32.gmra.mxu0 %vm538_vm0, %v534_v44 }
  0xe9   : > { %7155 = vmatmul.msk.f32.gmra.mxu1 %vm538_vm0, %v534_v44 }
  0xef   : > { %1143 = vrot.lane.b32.xlu2 %v531_v37, %s8778_s13  ;;  %1341 = vrot.lane.b32.xlu0 %v531_v37, %s8782_s17 }
  0xf0   : > { %1339 = vrot.lane.b32.xlu1 %v528_v29, %s8782_s17 }
  0xf7   : > { %947 = vrot.lane.b32.xlu2 %v534_v44, %s8780_s15  ;;  %1933 = vrot.lane.b32.xlu0 %v528_v29, %s8783_s27 }
  0xf8   : > { %1541 = vrot.lane.b32.xlu1 %v534_v44, %s8781_s12 }
  0xff   : > { %1539 = vrot.lane.b32.xlu2 %v531_v37, %s8781_s12  ;;  %1737 = vrot.lane.b32.xlu0 %v531_v37, %s8784_s9 }
 0x100   : > { %1735 = vrot.lane.b32.xlu1 %v528_v29, %s8784_s9 }
 0x107   : > { %1343 = vrot.lane.b32.xlu2 %v534_v44, %s8782_s17 }
 0x108   : > { %1937 = vrot.lane.b32.xlu1 %v534_v44, %s8783_s27 }
 0x10f   : > { %1935 = vrot.lane.b32.xlu2 %v531_v37, %s8783_s27 }
 0x117   : > { %1739 = vrot.lane.b32.xlu2 %v534_v44, %s8784_s9 }
 0x139   : > { %v748_v45 = vpop.permute.xlu2 %747 }
 0x141   : > { %v750_v47 = vpop.permute.xlu2 %749 }
 0x149   : > { %v746_v46 = vpop.permute.xlu1 %745  ;;  %v9039_v48 = vpop.permute.xlu0 %1141 }
 0x14a   : > { %7156 = vmatmul.msk.f32.vlgmr.msrb.gmra.mxu2 %vm538_vm0, %v746_v46  ;;  %7159 = vmatmul.msk.f32.vlgmr.msrb.gmra.mxu3 %vm538_vm0, %v746_v46  ;;  %v9055_v59 = vpop.permute.xlu2 %1143 }
 0x14b   : > { %1590 = vmatpush.msrb.mxu3 %v9014_v17  ;;  %1564 = vmatpush.msrb.mxu2 %v9012_v16 }
 0x151   : > { %v946_v4 = vpop.permute.xlu0 %945 }
 0x152   : > { %v944_v49 = vpop.permute.xlu1 %943  ;;  %7157 = vmatmul.msk.f32.gmra.mxu2 %vm538_vm0, %v748_v45  ;;  %7160 = vmatmul.msk.f32.gmra.mxu3 %vm538_vm0, %v748_v45  ;;  %v948_v22 = vpop.permute.xlu2 %947 }
 0x153   : > { %7162 = vmatmul.msk.f32.vlgmr.msra.gmra.mxu0 %vm538_vm0, %v944_v49  ;;  %7165 = vmatmul.msk.f32.vlgmr.msra.gmra.mxu1 %vm538_vm0, %v944_v49 }
 0x154   : > { %1788 = vmatpush.msra.mxu1 %v9014_v17  ;;  %1762 = vmatpush.msra.mxu0 %v9012_v16 }
 0x155   : > { %v565_v51 = vpop.f32.mrf.mxu0  ;;  %v591_v52 = vpop.f32.mrf.mxu1 }
 0x156   : > { %v606_v53 = vrot.slane %v591_v52, 7 }
 0x158   : > { %v610_v55 = vsel %vm609_vm1, %v565_v51, %v606_v53  ;;  %v612_v56 = vsel %vm611_vm2, %v565_v51, %v606_v53  ;;  %v615_v57 = vsel %vm614_vm3, %v565_v51, %v606_v53  ;;  %v618_v58 = vsel %vm617_vm4, %v565_v51, %v606_v53 }
 0x159   : > { %v613_v60 = vrot.slane %v612_v56, 1  ;;  %v616_v61 = vrot.slane %v615_v57, 2  ;;  %v619_v62 = vrot.slane %v618_v58, 3  ;;  %v621_v63 = vsel %vm620_vm5, %v565_v51, %v606_v53  ;;  %681 = vst.msk [vmem:[#allocation2] ss:$8 sm:$0x3] %vm9047_vm6, %v610_v55  ;;  %v1538_v33 = vpop.permute.xlu0 %1537 }
 0x15a   : > { %v622_v0 = vrot.slane %v621_v63, 4  ;;  %v624_v1 = vsel %vm623_vm7, %v565_v51, %v606_v53  ;;  %v627_v2 = vsel %vm626_vm8, %v565_v51, %v606_v53  ;;  %v630_v3 = vsel %vm629_vm9, %v606_v53, %v565_v51  ;;  %7158 = vmatmul.msk.f32.gmra.mxu2 %vm538_vm0, %v750_v47  ;;  %7161 = vmatmul.msk.f32.gmra.mxu3 %vm538_vm0, %v750_v47  ;;  %v1146_v11 = vpop.permute.xlu1 %1145  ;;  %v1540_v42 = vpop.permute.xlu2 %1539 }
 0x15b   : > { %v625_v5 = vrot.slane %v624_v1, 5  ;;  %684 = vst.msk [vmem:[#allocation2 + $0x10] ss:$8 sm:$0x3] %vm9047_vm6, %v613_v60  ;;  %v628_v6 = vrot.slane %v627_v2, 6  ;;  %7163 = vmatmul.msk.f32.gmra.mxu0 %vm538_vm0, %v946_v4  ;;  %7166 = vmatmul.msk.f32.gmra.mxu1 %vm538_vm0, %v946_v4  ;;  %v631_v7 = vrot.slane %v630_v3, 7 }
 0x15c   : > { %687 = vst.msk [vmem:[#allocation2 + $0x20] ss:$8 sm:$0x3] %vm9047_vm6, %v616_v61 }
 0x15d   : > { %690 = vst.msk [vmem:[#allocation2 + $0x30] ss:$8 sm:$0x3] %vm9047_vm6, %v619_v62  ;;  %v568_v8 = vpop.f32.mrf.mxu0 }
 0x15e   : > { %693 = vst.msk [vmem:[#allocation2 + $0x40] ss:$8 sm:$0x3] %vm9047_vm6, %v622_v0  ;;  %v594_v9 = vpop.f32.mrf.mxu1 }
 0x15f   : > { %696 = vst.msk [vmem:[#allocation2 + $0x50] ss:$8 sm:$0x3] %vm9047_vm6, %v625_v5  ;;  %v607_v10 = vrot.slane %v594_v9, 7 }
 0x160   : > { %699 = vst.msk [vmem:[#allocation2 + $0x60] ss:$8 sm:$0x3] %vm9047_vm6, %v628_v6 }
 0x161   : > { %702 = vst.msk [vmem:[#allocation2 + $0x70] ss:$8 sm:$0x3] %vm9047_vm6, %v631_v7  ;;  %v632_v12 = vsel %vm609_vm1, %v568_v8, %v607_v10  ;;  %v633_v13 = vsel %vm611_vm2, %v568_v8, %v607_v10  ;;  %v635_v14 = vsel %vm614_vm3, %v568_v8, %v607_v10  ;;  %v637_v15 = vsel %vm617_vm4, %v568_v8, %v607_v10  ;;  %v1342_v43 = vpop.permute.xlu0 %1341 }
 0x162   : > { %v634_v18 = vrot.slane %v633_v13, 1  ;;  %v636_v19 = vrot.slane %v635_v14, 2  ;;  %v638_v20 = vrot.slane %v637_v15, 3  ;;  %v639_v21 = vsel %vm620_vm5, %v568_v8, %v607_v10  ;;  %705 = vst.msk [vmem:[#allocation2 + $0x80] ss:$8 sm:$0x3] %vm9047_vm6, %v632_v12  ;;  %7168 = vmatmul.msk.f32.vlgmr.msra.gmra.mxu2 %vm538_vm0, %v9039_v48  ;;  %7171 = vmatmul.msk.f32.vlgmr.msra.gmra.mxu3 %vm538_vm0, %v9039_v48  ;;  %v1340_v40 = vpop.permute.xlu1 %1339  ;;  %v1344_v45 = vpop.permute.xlu2 %1343 }
 0x163   : > { %v640_v23 = vrot.slane %v639_v21, 4  ;;  %v641_v24 = vsel %vm623_vm7, %v568_v8, %v607_v10  ;;  %v643_v25 = vsel %vm626_vm8, %v568_v8, %v607_v10  ;;  %v645_v26 = vsel %vm629_vm9, %v607_v10, %v568_v8  ;;  %7164 = vmatmul.msk.f32.gmra.mxu0 %vm538_vm0, %v948_v22  ;;  %7167 = vmatmul.msk.f32.gmra.mxu1 %vm538_vm0, %v948_v22 }
 0x164   : > { %v642_v27 = vrot.slane %v641_v24, 5  ;;  %708 = vst.msk [vmem:[#allocation2 + $0x90] ss:$8 sm:$0x3] %vm9047_vm6, %v634_v18  ;;  %v644_v28 = vrot.slane %v643_v25, 6  ;;  %1986 = vmatpush.msra.mxu3 %v9014_v17  ;;  %1960 = vmatpush.msra.mxu2 %v9012_v16  ;;  %v646_v29 = vrot.slane %v645_v26, 7 }
 0x165   : > { %711 = vst.msk [vmem:[#allocation2 + $0xa0] ss:$8 sm:$0x3] %vm9047_vm6, %v636_v19  ;;  %v571_v31 = vpop.f32.mrf.mxu0 }
 0x166   : > { %714 = vst.msk [vmem:[#allocation2 + $0xb0] ss:$8 sm:$0x3] %vm9047_vm6, %v638_v20  ;;  %v597_v30 = vpop.f32.mrf.mxu1 }
 0x167   : > { %717 = vst.msk [vmem:[#allocation2 + $0xc0] ss:$8 sm:$0x3] %vm9047_vm6, %v640_v23  ;;  %v608_v32 = vrot.slane %v597_v30, 7 }
 0x168   : > { %720 = vst.msk [vmem:[#allocation2 + $0xd0] ss:$8 sm:$0x3] %vm9047_vm6, %v642_v27 }
 0x169   : > { %723 = vst.msk [vmem:[#allocation2 + $0xe0] ss:$8 sm:$0x3] %vm9047_vm6, %v644_v28  ;;  %v647_v17 = vsel %vm609_vm1, %v571_v31, %v608_v32  ;;  %v648_v16 = vsel %vm611_vm2, %v571_v31, %v608_v32  ;;  %v650_v34 = vsel %vm614_vm3, %v571_v31, %v608_v32  ;;  %v652_v35 = vsel %vm617_vm4, %v571_v31, %v608_v32  ;;  %v1934_v46 = vpop.permute.xlu0 %1933 }
 0x16a   : > { %726 = vst.msk [vmem:[#allocation2 + $0xf0] ss:$8 sm:$0x3] %vm9047_vm6, %v646_v29  ;;  %v649_v36 = vrot.slane %v648_v16, 1  ;;  %v651_v37 = vrot.slane %v650_v34, 2  ;;  %v653_v38 = vrot.slane %v652_v35, 3  ;;  %v654_v39 = vsel %vm620_vm5, %v571_v31, %v608_v32  ;;  %7169 = vmatmul.msk.f32.gmra.mxu2 %vm538_vm0, %v9055_v59  ;;  %7172 = vmatmul.msk.f32.gmra.mxu3 %vm538_vm0, %v9055_v59  ;;  %v1542_v44 = vpop.permute.xlu1 %1541  ;;  %v1936_v48 = vpop.permute.xlu2 %1935 }
 0x16b   : > { %v655_v41 = vrot.slane %v654_v39, 4  ;;  %729 = vst.msk [vmem:[#allocation2 + $0x100] ss:$8 sm:$0x3] %vm9047_vm6, %v647_v17  ;;  %7174 = vmatmul.msk.f32.vlgmr.msrb.gmra.mxu0 %vm538_vm0, %v1340_v40  ;;  %7177 = vmatmul.msk.f32.vlgmr.msrb.gmra.mxu1 %vm538_vm0, %v1340_v40 }
 0x16c   : > { %732 = vst.msk [vmem:[#allocation2 + $0x110] ss:$8 sm:$0x3] %vm9047_vm6, %v649_v36 }
 0x16d   : > { %735 = vst.msk [vmem:[#allocation2 + $0x120] ss:$8 sm:$0x3] %vm9047_vm6, %v651_v37 }
 0x16e   : > { %738 = vst.msk [vmem:[#allocation2 + $0x130] ss:$8 sm:$0x3] %vm9047_vm6, %v653_v38 }
 0x16f   : > { %741 = vst.msk [vmem:[#allocation2 + $0x140] ss:$8 sm:$0x3] %vm9047_vm6, %v655_v41 }
 0x171   : > { %v1738_v49 = vpop.permute.xlu0 %1737 }
 0x172   : > { %7170 = vmatmul.msk.f32.gmra.mxu2 %vm538_vm0, %v1146_v11  ;;  %7173 = vmatmul.msk.f32.gmra.mxu3 %vm538_vm0, %v1146_v11  ;;  %v1736_v47 = vpop.permute.xlu1 %1735  ;;  %v1740_v50 = vpop.permute.xlu2 %1739 }
 0x173   : > { %7175 = vmatmul.msk.f32.gmra.mxu0 %vm538_vm0, %v1342_v43  ;;  %7178 = vmatmul.msk.f32.gmra.mxu1 %vm538_vm0, %v1342_v43 }
 0x17a   : > { %7180 = vmatmul.msk.f32.vlgmr.msrb.gmra.mxu2 %vm538_vm0, %v1538_v33  ;;  %7183 = vmatmul.msk.f32.vlgmr.msrb.gmra.mxu3 %vm538_vm0, %v1538_v33  ;;  %v1938_v51 = vpop.permute.xlu1 %1937 }
 0x17b   : > { %7176 = vmatmul.msk.f32.gmra.mxu0 %vm538_vm0, %v1344_v45  ;;  %7179 = vmatmul.msk.f32.gmra.mxu1 %vm538_vm0, %v1344_v45 }
 0x182   : > { %7181 = vmatmul.msk.f32.gmra.mxu2 %vm538_vm0, %v1540_v42  ;;  %7184 = vmatmul.msk.f32.gmra.mxu3 %vm538_vm0, %v1540_v42 }
 0x183   : > { %7186 = vmatmul.msk.f32.vlgmr.msra.gmra.mxu0 %vm538_vm0, %v1736_v47  ;;  %7189 = vmatmul.msk.f32.vlgmr.msra.gmra.mxu1 %vm538_vm0, %v1736_v47 }
 0x18a   : > { %7182 = vmatmul.msk.f32.gmra.mxu2 %vm538_vm0, %v1542_v44  ;;  %7185 = vmatmul.msk.f32.gmra.mxu3 %vm538_vm0, %v1542_v44 }
 0x18b   : > { %7187 = vmatmul.msk.f32.gmra.mxu0 %vm538_vm0, %v1738_v49  ;;  %7190 = vmatmul.msk.f32.gmra.mxu1 %vm538_vm0, %v1738_v49 }
 0x192   : > { %7192 = vmatmul.msk.f32.vlgmr.msra.gmra.mxu2 %vm538_vm0, %v1934_v46  ;;  %7195 = vmatmul.msk.f32.vlgmr.msra.gmra.mxu3 %vm538_vm0, %v1934_v46 }
 0x193   : > { %7188 = vmatmul.msk.f32.gmra.mxu0 %vm538_vm0, %v1740_v50  ;;  %7191 = vmatmul.msk.f32.gmra.mxu1 %vm538_vm0, %v1740_v50 }
 0x19a   : > { %7193 = vmatmul.msk.f32.gmra.mxu2 %vm538_vm0, %v1936_v48  ;;  %7196 = vmatmul.msk.f32.gmra.mxu3 %vm538_vm0, %v1936_v48 }
 0x1a2   : > { %7194 = vmatmul.msk.f32.gmra.mxu2 %vm538_vm0, %v1938_v51  ;;  %7197 = vmatmul.msk.f32.gmra.mxu3 %vm538_vm0, %v1938_v51 }
 0x1cd   : > { %v800_v52 = vpop.f32.mrf.mxu3  ;;  %v774_v55 = vpop.f32.mrf.mxu2 }
 0x1ce   : > { %v815_v53 = vrot.slane %v800_v52, 7 }
 0x1d0   : > { %v818_v56 = vsel %vm609_vm1, %v774_v55, %v815_v53  ;;  %v819_v57 = vsel %vm611_vm2, %v774_v55, %v815_v53  ;;  %v821_v58 = vsel %vm614_vm3, %v774_v55, %v815_v53  ;;  %v823_v59 = vsel %vm617_vm4, %v774_v55, %v815_v53  ;;  %v998_v0 = vpop.f32.mrf.mxu1  ;;  %v972_v9 = vpop.f32.mrf.mxu0 }
 0x1d1   : > { %v820_v60 = vrot.slane %v819_v57, 1  ;;  %v822_v61 = vrot.slane %v821_v58, 2  ;;  %v824_v62 = vrot.slane %v823_v59, 3  ;;  %v825_v63 = vsel %vm620_vm5, %v774_v55, %v815_v53  ;;  %879 = vst.msk [vmem:[#allocation2 + $0x1] ss:$8 sm:$0x3] %vm9047_vm6, %v818_v56 }
 0x1d2   : > { %v826_v1 = vrot.slane %v825_v63, 4  ;;  %v827_v2 = vsel %vm623_vm7, %v774_v55, %v815_v53  ;;  %v829_v3 = vsel %vm626_vm8, %v774_v55, %v815_v53  ;;  %v831_v4 = vsel %vm629_vm9, %v815_v53, %v774_v55 }
 0x1d3   : > { %v828_v5 = vrot.slane %v827_v2, 5  ;;  %882 = vst.msk [vmem:[#allocation2 + $0x11] ss:$8 sm:$0x3] %vm9047_vm6, %v820_v60  ;;  %v830_v6 = vrot.slane %v829_v3, 6  ;;  %v1013_v7 = vrot.slane %v998_v0, 7 }
 0x1d4   : > { %885 = vst.msk [vmem:[#allocation2 + $0x21] ss:$8 sm:$0x3] %vm9047_vm6, %v822_v61  ;;  %v832_v8 = vrot.slane %v831_v4, 7 }
 0x1d5   : > { %888 = vst.msk [vmem:[#allocation2 + $0x31] ss:$8 sm:$0x3] %vm9047_vm6, %v824_v62  ;;  %v1017_v10 = vsel %vm611_vm2, %v972_v9, %v1013_v7  ;;  %v1019_v11 = vsel %vm614_vm3, %v972_v9, %v1013_v7  ;;  %v1021_v12 = vsel %vm617_vm4, %v972_v9, %v1013_v7  ;;  %v1016_v13 = vsel %vm609_vm1, %v972_v9, %v1013_v7  ;;  %v803_v18 = vpop.f32.mrf.mxu3  ;;  %v777_v27 = vpop.f32.mrf.mxu2 }
 0x1d6   : > { %891 = vst.msk [vmem:[#allocation2 + $0x41] ss:$8 sm:$0x3] %vm9047_vm6, %v826_v1  ;;  %v1018_v14 = vrot.slane %v1017_v10, 1  ;;  %v1023_v15 = vsel %vm620_vm5, %v972_v9, %v1013_v7  ;;  %v1020_v19 = vrot.slane %v1019_v11, 2  ;;  %v1025_v20 = vsel %vm623_vm7, %v972_v9, %v1013_v7 }
 0x1d7   : > { %894 = vst.msk [vmem:[#allocation2 + $0x51] ss:$8 sm:$0x3] %vm9047_vm6, %v828_v5  ;;  %v1022_v21 = vrot.slane %v1021_v12, 3  ;;  %v1027_v22 = vsel %vm626_vm8, %v972_v9, %v1013_v7  ;;  %v1024_v23 = vrot.slane %v1023_v15, 4  ;;  %v1029_v24 = vsel %vm629_vm9, %v1013_v7, %v972_v9 }
 0x1d8   : > { %897 = vst.msk [vmem:[#allocation2 + $0x61] ss:$8 sm:$0x3] %vm9047_vm6, %v830_v6  ;;  %v816_v25 = vrot.slane %v803_v18, 7  ;;  %v1026_v26 = vrot.slane %v1025_v20, 5  ;;  %v1028_v28 = vrot.slane %v1027_v22, 6  ;;  %v1001_v32 = vpop.f32.mrf.mxu1  ;;  %v975_v43 = vpop.f32.mrf.mxu0 }
 0x1d9   : > { %900 = vst.msk [vmem:[#allocation2 + $0x71] ss:$8 sm:$0x3] %vm9047_vm6, %v832_v8  ;;  %v1030_v30 = vrot.slane %v1029_v24, 7  ;;  %v1014_v37 = vrot.slane %v1001_v32, 7 }
 0x1da   : > { %1077 = vst.msk [vmem:[#allocation2 + $0x2] ss:$8 sm:$0x3] %vm9047_vm6, %v1016_v13  ;;  %v834_v29 = vsel %vm611_vm2, %v777_v27, %v816_v25  ;;  %v836_v31 = vsel %vm614_vm3, %v777_v27, %v816_v25  ;;  %v838_v33 = vsel %vm617_vm4, %v777_v27, %v816_v25  ;;  %v833_v17 = vsel %vm609_vm1, %v777_v27, %v816_v25 }
 0x1db   : > { %1080 = vst.msk [vmem:[#allocation2 + $0x12] ss:$8 sm:$0x3] %vm9047_vm6, %v1018_v14  ;;  %v835_v16 = vrot.slane %v834_v29, 1  ;;  %v840_v34 = vsel %vm620_vm5, %v777_v27, %v816_v25  ;;  %v837_v35 = vrot.slane %v836_v31, 2  ;;  %v842_v36 = vsel %vm623_vm7, %v777_v27, %v816_v25 }
 0x1dc   : > { %1083 = vst.msk [vmem:[#allocation2 + $0x22] ss:$8 sm:$0x3] %vm9047_vm6, %v1020_v19  ;;  %v839_v38 = vrot.slane %v838_v33, 3  ;;  %v844_v39 = vsel %vm626_vm8, %v777_v27, %v816_v25  ;;  %v841_v40 = vrot.slane %v840_v34, 4  ;;  %v846_v41 = vsel %vm629_vm9, %v816_v25, %v777_v27 }
 0x1dd   : > { %1086 = vst.msk [vmem:[#allocation2 + $0x32] ss:$8 sm:$0x3] %vm9047_vm6, %v1022_v21  ;;  %v843_v42 = vrot.slane %v842_v36, 5  ;;  %v845_v44 = vrot.slane %v844_v39, 6  ;;  %v1032_v45 = vsel %vm611_vm2, %v975_v43, %v1014_v37  ;;  %v847_v46 = vrot.slane %v846_v41, 7  ;;  %v806_v48 = vpop.f32.mrf.mxu3  ;;  %v780_v63 = vpop.f32.mrf.mxu2 }
 0x1de   : > { %1089 = vst.msk [vmem:[#allocation2 + $0x42] ss:$8 sm:$0x3] %vm9047_vm6, %v1024_v23  ;;  %v1034_v47 = vsel %vm614_vm3, %v975_v43, %v1014_v37  ;;  %v1036_v49 = vsel %vm617_vm4, %v975_v43, %v1014_v37  ;;  %v1031_v50 = vsel %vm609_vm1, %v975_v43, %v1014_v37  ;;  %v1033_v51 = vrot.slane %v1032_v45, 1 }
 0x1df   : > { %1092 = vst.msk [vmem:[#allocation2 + $0x52] ss:$8 sm:$0x3] %vm9047_vm6, %v1026_v26  ;;  %v1038_v52 = vsel %vm620_vm5, %v975_v43, %v1014_v37  ;;  %v1035_v53 = vrot.slane %v1034_v47, 2  ;;  %v1040_v55 = vsel %vm623_vm7, %v975_v43, %v1014_v37  ;;  %v817_v56 = vrot.slane %v806_v48, 7 }
 0x1e0   : > { %1095 = vst.msk [vmem:[#allocation2 + $0x62] ss:$8 sm:$0x3] %vm9047_vm6, %v1028_v28  ;;  %v1037_v57 = vrot.slane %v1036_v49, 3  ;;  %v1042_v58 = vsel %vm626_vm8, %v975_v43, %v1014_v37  ;;  %v1039_v59 = vrot.slane %v1038_v52, 4  ;;  %v1044_v60 = vsel %vm629_vm9, %v1014_v37, %v975_v43  ;;  %v1004_v61 = vpop.f32.mrf.mxu1  ;;  %v978_v11 = vpop.f32.mrf.mxu0 }
 0x1e1   : > { %1098 = vst.msk [vmem:[#allocation2 + $0x72] ss:$8 sm:$0x3] %vm9047_vm6, %v1030_v30  ;;  %v1041_v62 = vrot.slane %v1040_v55, 5  ;;  %v1043_v0 = vrot.slane %v1042_v58, 6  ;;  %v849_v1 = vsel %vm611_vm2, %v780_v63, %v817_v56  ;;  %v1045_v2 = vrot.slane %v1044_v60, 7 }
 0x1e2   : > { %903 = vst.msk [vmem:[#allocation2 + $0x81] ss:$8 sm:$0x3] %vm9047_vm6, %v833_v17  ;;  %v851_v3 = vsel %vm614_vm3, %v780_v63, %v817_v56  ;;  %v1015_v4 = vrot.slane %v1004_v61, 7  ;;  %v853_v5 = vsel %vm617_vm4, %v780_v63, %v817_v56  ;;  %v848_v6 = vsel %vm609_vm1, %v780_v63, %v817_v56 }
 0x1e3   : > { %906 = vst.msk [vmem:[#allocation2 + $0x91] ss:$8 sm:$0x3] %vm9047_vm6, %v835_v16  ;;  %v850_v7 = vrot.slane %v849_v1, 1  ;;  %v855_v8 = vsel %vm620_vm5, %v780_v63, %v817_v56  ;;  %v852_v10 = vrot.slane %v851_v3, 2  ;;  %v854_v12 = vrot.slane %v853_v5, 3 }
 0x1e4   : > { %909 = vst.msk [vmem:[#allocation2 + $0xa1] ss:$8 sm:$0x3] %vm9047_vm6, %v837_v35  ;;  %v1047_v13 = vsel %vm611_vm2, %v978_v11, %v1015_v4  ;;  %v856_v14 = vrot.slane %v855_v8, 4  ;;  %v1049_v15 = vsel %vm614_vm3, %v978_v11, %v1015_v4  ;;  %v1051_v19 = vsel %vm617_vm4, %v978_v11, %v1015_v4 }
 0x1e5   : > { %912 = vst.msk [vmem:[#allocation2 + $0xb1] ss:$8 sm:$0x3] %vm9047_vm6, %v839_v38  ;;  %v1196_v9 = vpop.f32.mrf.mxu3  ;;  %v1046_v20 = vsel %vm609_vm1, %v978_v11, %v1015_v4  ;;  %v1048_v21 = vrot.slane %v1047_v13, 1  ;;  %v1053_v22 = vsel %vm620_vm5, %v978_v11, %v1015_v4  ;;  %v1050_v23 = vrot.slane %v1049_v15, 2  ;;  %v1170_v24 = vpop.f32.mrf.mxu2 }
 0x1e6   : > { %915 = vst.msk [vmem:[#allocation2 + $0xc1] ss:$8 sm:$0x3] %vm9047_vm6, %v841_v40  ;;  %v1211_v18 = vrot.slane %v1196_v9, 7  ;;  %v1052_v25 = vrot.slane %v1051_v19, 3  ;;  %v1054_v27 = vrot.slane %v1053_v22, 4 }
 0x1e7   : > { %918 = vst.msk [vmem:[#allocation2 + $0xd1] ss:$8 sm:$0x3] %vm9047_vm6, %v843_v42 }
 0x1e8   : > { %921 = vst.msk [vmem:[#allocation2 + $0xe1] ss:$8 sm:$0x3] %vm9047_vm6, %v845_v44  ;;  %v1215_v26 = vsel %vm611_vm2, %v1170_v24, %v1211_v18  ;;  %v1217_v28 = vsel %vm614_vm3, %v1170_v24, %v1211_v18  ;;  %v1394_v29 = vpop.f32.mrf.mxu1  ;;  %v1219_v30 = vsel %vm617_vm4, %v1170_v24, %v1211_v18  ;;  %v1214_v31 = vsel %vm609_vm1, %v1170_v24, %v1211_v18  ;;  %v1368_v40 = vpop.f32.mrf.mxu0 }
 0x1e9   : > { %924 = vst.msk [vmem:[#allocation2 + $0xf1] ss:$8 sm:$0x3] %vm9047_vm6, %v847_v46  ;;  %v1216_v32 = vrot.slane %v1215_v26, 1  ;;  %v1221_v33 = vsel %vm620_vm5, %v1170_v24, %v1211_v18  ;;  %v1218_v17 = vrot.slane %v1217_v28, 2  ;;  %v1223_v16 = vsel %vm623_vm7, %v1170_v24, %v1211_v18 }
 0x1ea   : > { %1101 = vst.msk [vmem:[#allocation2 + $0x82] ss:$8 sm:$0x3] %vm9047_vm6, %v1031_v50  ;;  %v1409_v34 = vrot.slane %v1394_v29, 7  ;;  %v1220_v35 = vrot.slane %v1219_v30, 3  ;;  %v1225_v36 = vsel %vm626_vm8, %v1170_v24, %v1211_v18  ;;  %v1222_v37 = vrot.slane %v1221_v33, 4 }
 0x1eb   : > { %1104 = vst.msk [vmem:[#allocation2 + $0x92] ss:$8 sm:$0x3] %vm9047_vm6, %v1033_v51  ;;  %v1227_v38 = vsel %vm629_vm9, %v1211_v18, %v1170_v24  ;;  %v1224_v39 = vrot.slane %v1223_v16, 5  ;;  %v1226_v41 = vrot.slane %v1225_v36, 6 }
 0x1ec   : > { %1107 = vst.msk [vmem:[#allocation2 + $0xa2] ss:$8 sm:$0x3] %vm9047_vm6, %v1035_v53  ;;  %v1413_v42 = vsel %vm611_vm2, %v1368_v40, %v1409_v34  ;;  %v1228_v43 = vrot.slane %v1227_v38, 7  ;;  %v1415_v44 = vsel %vm614_vm3, %v1368_v40, %v1409_v34  ;;  %v1417_v46 = vsel %vm617_vm4, %v1368_v40, %v1409_v34 }
 0x1ed   : > { %1110 = vst.msk [vmem:[#allocation2 + $0xb2] ss:$8 sm:$0x3] %vm9047_vm6, %v1037_v57  ;;  %v1199_v45 = vpop.f32.mrf.mxu3  ;;  %v1412_v47 = vsel %vm609_vm1, %v1368_v40, %v1409_v34  ;;  %v1414_v48 = vrot.slane %v1413_v42, 1  ;;  %v1419_v49 = vsel %vm620_vm5, %v1368_v40, %v1409_v34  ;;  %v1416_v50 = vrot.slane %v1415_v44, 2 }
 0x1ee   : > { %1113 = vst.msk [vmem:[#allocation2 + $0xc2] ss:$8 sm:$0x3] %vm9047_vm6, %v1039_v59  ;;  %v1421_v51 = vsel %vm623_vm7, %v1368_v40, %v1409_v34  ;;  %v1212_v52 = vrot.slane %v1199_v45, 7  ;;  %v1418_v53 = vrot.slane %v1417_v46, 3  ;;  %v1423_v55 = vsel %vm626_vm8, %v1368_v40, %v1409_v34  ;;  %v1173_v59 = vpop.f32.mrf.mxu2 }
 0x1ef   : > { %1116 = vst.msk [vmem:[#allocation2 + $0xd2] ss:$8 sm:$0x3] %vm9047_vm6, %v1041_v62  ;;  %v1420_v56 = vrot.slane %v1419_v49, 4  ;;  %v1425_v57 = vsel %vm629_vm9, %v1409_v34, %v1368_v40  ;;  %v1422_v58 = vrot.slane %v1421_v51, 5  ;;  %v1424_v60 = vrot.slane %v1423_v55, 6 }
 0x1f0   : > { %1119 = vst.msk [vmem:[#allocation2 + $0xe2] ss:$8 sm:$0x3] %vm9047_vm6, %v1043_v0  ;;  %v1230_v61 = vsel %vm611_vm2, %v1173_v59, %v1212_v52  ;;  %v1426_v62 = vrot.slane %v1425_v57, 7  ;;  %v1232_v63 = vsel %vm614_vm3, %v1173_v59, %v1212_v52  ;;  %v1397_v0 = vpop.f32.mrf.mxu1  ;;  %v1234_v1 = vsel %vm617_vm4, %v1173_v59, %v1212_v52  ;;  %v1371_v13 = vpop.f32.mrf.mxu0 }
 0x1f1   : > { %1122 = vst.msk [vmem:[#allocation2 + $0xf2] ss:$8 sm:$0x3] %vm9047_vm6, %v1045_v2  ;;  %v1229_v2 = vsel %vm609_vm1, %v1173_v59, %v1212_v52  ;;  %v1231_v3 = vrot.slane %v1230_v61, 1  ;;  %v1236_v4 = vsel %vm620_vm5, %v1173_v59, %v1212_v52  ;;  %v1233_v5 = vrot.slane %v1232_v63, 2 }
 0x1f2   : > { %927 = vst.msk [vmem:[#allocation2 + $0x101] ss:$8 sm:$0x3] %vm9047_vm6, %v848_v6  ;;  %v1238_v6 = vsel %vm623_vm7, %v1173_v59, %v1212_v52  ;;  %v1235_v8 = vrot.slane %v1234_v1, 3  ;;  %v1240_v9 = vsel %vm626_vm8, %v1173_v59, %v1212_v52  ;;  %v1242_v11 = vsel %vm629_vm9, %v1212_v52, %v1173_v59 }
 0x1f3   : > { %930 = vst.msk [vmem:[#allocation2 + $0x111] ss:$8 sm:$0x3] %vm9047_vm6, %v850_v7  ;;  %v1410_v7 = vrot.slane %v1397_v0, 7  ;;  %v1243_v18 = vrot.slane %v1242_v11, 7 }
 0x1f4   : > { %933 = vst.msk [vmem:[#allocation2 + $0x121] ss:$8 sm:$0x3] %vm9047_vm6, %v852_v10  ;;  %v1237_v10 = vrot.slane %v1236_v4, 4 }
 0x1f5   : > { %936 = vst.msk [vmem:[#allocation2 + $0x131] ss:$8 sm:$0x3] %vm9047_vm6, %v854_v12  ;;  %v1239_v12 = vrot.slane %v1238_v6, 5  ;;  %v1428_v15 = vsel %vm611_vm2, %v1371_v13, %v1410_v7  ;;  %v1430_v19 = vsel %vm614_vm3, %v1371_v13, %v1410_v7  ;;  %v1427_v22 = vsel %vm609_vm1, %v1371_v13, %v1410_v7 }
 0x1f6   : > { %939 = vst.msk [vmem:[#allocation2 + $0x141] ss:$8 sm:$0x3] %vm9047_vm6, %v856_v14  ;;  %v1241_v14 = vrot.slane %v1240_v9, 6  ;;  %v1434_v24 = vsel %vm620_vm5, %v1371_v13, %v1410_v7  ;;  %v1436_v26 = vsel %vm623_vm7, %v1371_v13, %v1410_v7  ;;  %v1438_v29 = vsel %vm626_vm8, %v1371_v13, %v1410_v7 }
 0x1f7   : > { %1125 = vst.msk [vmem:[#allocation2 + $0x102] ss:$8 sm:$0x3] %vm9047_vm6, %v1046_v20  ;;  %v1202_v20 = vpop.f32.mrf.mxu3  ;;  %v1435_v30 = vrot.slane %v1434_v24, 4  ;;  %v1437_v33 = vrot.slane %v1436_v26, 5  ;;  %v1439_v16 = vrot.slane %v1438_v29, 6 }
 0x1f8   : > { %1128 = vst.msk [vmem:[#allocation2 + $0x112] ss:$8 sm:$0x3] %vm9047_vm6, %v1048_v21  ;;  %v1432_v21 = vsel %vm617_vm4, %v1371_v13, %v1410_v7  ;;  %v1374_v44 = vpop.f32.mrf.mxu0 }
 0x1f9   : > { %1131 = vst.msk [vmem:[#allocation2 + $0x122] ss:$8 sm:$0x3] %vm9047_vm6, %v1050_v23  ;;  %v1429_v23 = vrot.slane %v1428_v15, 1  ;;  %v1433_v28 = vrot.slane %v1432_v21, 3 }
 0x1fa   : > { %1134 = vst.msk [vmem:[#allocation2 + $0x132] ss:$8 sm:$0x3] %vm9047_vm6, %v1052_v25  ;;  %v1431_v25 = vrot.slane %v1430_v19, 2 }
 0x1fb   : > { %1137 = vst.msk [vmem:[#allocation2 + $0x142] ss:$8 sm:$0x3] %vm9047_vm6, %v1054_v27  ;;  %v1213_v27 = vrot.slane %v1202_v20, 7 }
 0x1fc   : > { %1275 = vst.msk [vmem:[#allocation2 + $0x3] ss:$8 sm:$0x3] %vm9047_vm6, %v1214_v31  ;;  %v1440_v31 = vsel %vm629_vm9, %v1410_v7, %v1371_v13 }
 0x1fd   : > { %1278 = vst.msk [vmem:[#allocation2 + $0x13] ss:$8 sm:$0x3] %vm9047_vm6, %v1216_v32  ;;  %v1400_v32 = vpop.f32.mrf.mxu1 }
 0x1fe   : > { %1281 = vst.msk [vmem:[#allocation2 + $0x23] ss:$8 sm:$0x3] %vm9047_vm6, %v1218_v17  ;;  %v1176_v17 = vpop.f32.mrf.mxu2 }
 0x1ff   : > { %1284 = vst.msk [vmem:[#allocation2 + $0x33] ss:$8 sm:$0x3] %vm9047_vm6, %v1220_v35  ;;  %v1245_v34 = vsel %vm611_vm2, %v1176_v17, %v1213_v27  ;;  %v1441_v35 = vrot.slane %v1440_v31, 7  ;;  %v1247_v36 = vsel %vm614_vm3, %v1176_v17, %v1213_v27  ;;  %v1249_v38 = vsel %vm617_vm4, %v1176_v17, %v1213_v27  ;;  %v1592_v42 = vpop.f32.mrf.mxu3 }
 0x200   : > { %1287 = vst.msk [vmem:[#allocation2 + $0x43] ss:$8 sm:$0x3] %vm9047_vm6, %v1222_v37  ;;  %v1411_v37 = vrot.slane %v1400_v32, 7  ;;  %v1246_v40 = vrot.slane %v1245_v34, 1  ;;  %v1250_v45 = vrot.slane %v1249_v38, 3 }
 0x201   : > { %1290 = vst.msk [vmem:[#allocation2 + $0x53] ss:$8 sm:$0x3] %vm9047_vm6, %v1224_v39  ;;  %v1244_v39 = vsel %vm609_vm1, %v1176_v17, %v1213_v27  ;;  %v1607_v49 = vrot.slane %v1592_v42, 7 }
 0x202   : > { %1293 = vst.msk [vmem:[#allocation2 + $0x63] ss:$8 sm:$0x3] %vm9047_vm6, %v1226_v41  ;;  %v1251_v41 = vsel %vm620_vm5, %v1176_v17, %v1213_v27  ;;  %v1443_v46 = vsel %vm611_vm2, %v1374_v44, %v1411_v37  ;;  %v1442_v51 = vsel %vm609_vm1, %v1374_v44, %v1411_v37 }
 0x203   : > { %1296 = vst.msk [vmem:[#allocation2 + $0x73] ss:$8 sm:$0x3] %vm9047_vm6, %v1228_v43  ;;  %v1248_v43 = vrot.slane %v1247_v36, 2  ;;  %v1444_v52 = vrot.slane %v1443_v46, 1 }
 0x204   : > { %1473 = vst.msk [vmem:[#allocation2 + $0x4] ss:$8 sm:$0x3] %vm9047_vm6, %v1412_v47  ;;  %v1252_v47 = vrot.slane %v1251_v41, 4 }
 0x205   : > { %1476 = vst.msk [vmem:[#allocation2 + $0x14] ss:$8 sm:$0x3] %vm9047_vm6, %v1414_v48  ;;  %v1445_v48 = vsel %vm614_vm3, %v1374_v44, %v1411_v37  ;;  %v1790_v61 = vpop.f32.mrf.mxu1 }
 0x206   : > { %1479 = vst.msk [vmem:[#allocation2 + $0x24] ss:$8 sm:$0x3] %vm9047_vm6, %v1416_v50  ;;  %v1447_v50 = vsel %vm617_vm4, %v1374_v44, %v1411_v37  ;;  %v1446_v55 = vrot.slane %v1445_v48, 2  ;;  %v1805_v4 = vrot.slane %v1790_v61, 7 }
 0x207   : > { %1482 = vst.msk [vmem:[#allocation2 + $0x34] ss:$8 sm:$0x3] %vm9047_vm6, %v1418_v53  ;;  %v1449_v53 = vsel %vm620_vm5, %v1374_v44, %v1411_v37  ;;  %v1448_v57 = vrot.slane %v1447_v50, 3  ;;  %v1595_v15 = vpop.f32.mrf.mxu3 }
 0x208   : > { %1485 = vst.msk [vmem:[#allocation2 + $0x44] ss:$8 sm:$0x3] %vm9047_vm6, %v1420_v56  ;;  %v1566_v56 = vpop.f32.mrf.mxu2  ;;  %v1450_v59 = vrot.slane %v1449_v53, 4  ;;  %v1608_v24 = vrot.slane %v1595_v15, 7 }
 0x209   : > { %1488 = vst.msk [vmem:[#allocation2 + $0x54] ss:$8 sm:$0x3] %vm9047_vm6, %v1422_v58  ;;  %v1611_v58 = vsel %vm611_vm2, %v1566_v56, %v1607_v49  ;;  %v1610_v63 = vsel %vm609_vm1, %v1566_v56, %v1607_v49  ;;  %v1617_v1 = vsel %vm620_vm5, %v1566_v56, %v1607_v49  ;;  %v1621_v6 = vsel %vm626_vm8, %v1566_v56, %v1607_v49 }
 0x20a   : > { %1491 = vst.msk [vmem:[#allocation2 + $0x64] ss:$8 sm:$0x3] %vm9047_vm6, %v1424_v60  ;;  %v1613_v60 = vsel %vm614_vm3, %v1566_v56, %v1607_v49  ;;  %v1612_v0 = vrot.slane %v1611_v58, 1  ;;  %v1618_v7 = vrot.slane %v1617_v1, 4  ;;  %v1622_v11 = vrot.slane %v1621_v6, 6 }
 0x20b   : > { %1494 = vst.msk [vmem:[#allocation2 + $0x74] ss:$8 sm:$0x3] %vm9047_vm6, %v1426_v62  ;;  %v1615_v62 = vsel %vm617_vm4, %v1566_v56, %v1607_v49 }
 0x20c   : > { %1299 = vst.msk [vmem:[#allocation2 + $0x83] ss:$8 sm:$0x3] %vm9047_vm6, %v1229_v2  ;;  %v1614_v2 = vrot.slane %v1613_v60, 2 }
 0x20d   : > { %1302 = vst.msk [vmem:[#allocation2 + $0x93] ss:$8 sm:$0x3] %vm9047_vm6, %v1231_v3  ;;  %v1619_v3 = vsel %vm623_vm7, %v1566_v56, %v1607_v49 }
 0x20e   : > { %1305 = vst.msk [vmem:[#allocation2 + $0xa3] ss:$8 sm:$0x3] %vm9047_vm6, %v1233_v5  ;;  %v1616_v5 = vrot.slane %v1615_v62, 3  ;;  %v1620_v9 = vrot.slane %v1619_v3, 5 }
 0x20f   : > { %1308 = vst.msk [vmem:[#allocation2 + $0xb3] ss:$8 sm:$0x3] %vm9047_vm6, %v1235_v8  ;;  %v1623_v8 = vsel %vm629_vm9, %v1607_v49, %v1566_v56 }
 0x210   : > { %1311 = vst.msk [vmem:[#allocation2 + $0xc3] ss:$8 sm:$0x3] %vm9047_vm6, %v1237_v10  ;;  %v1764_v10 = vpop.f32.mrf.mxu0  ;;  %v1624_v13 = vrot.slane %v1623_v8, 7 }
 0x211   : > { %1314 = vst.msk [vmem:[#allocation2 + $0xd3] ss:$8 sm:$0x3] %vm9047_vm6, %v1239_v12  ;;  %v1809_v12 = vsel %vm611_vm2, %v1764_v10, %v1805_v4  ;;  %v1808_v19 = vsel %vm609_vm1, %v1764_v10, %v1805_v4  ;;  %v1815_v21 = vsel %vm620_vm5, %v1764_v10, %v1805_v4  ;;  %v1819_v26 = vsel %vm626_vm8, %v1764_v10, %v1805_v4 }
 0x212   : > { %1317 = vst.msk [vmem:[#allocation2 + $0xe3] ss:$8 sm:$0x3] %vm9047_vm6, %v1241_v14  ;;  %v1811_v14 = vsel %vm614_vm3, %v1764_v10, %v1805_v4  ;;  %v1810_v20 = vrot.slane %v1809_v12, 1  ;;  %v1816_v27 = vrot.slane %v1815_v21, 4  ;;  %v1820_v31 = vrot.slane %v1819_v26, 6 }
 0x213   : > { %1320 = vst.msk [vmem:[#allocation2 + $0xf3] ss:$8 sm:$0x3] %vm9047_vm6, %v1243_v18  ;;  %v1813_v18 = vsel %vm617_vm4, %v1764_v10, %v1805_v4 }
 0x214   : > { %1497 = vst.msk [vmem:[#allocation2 + $0x84] ss:$8 sm:$0x3] %vm9047_vm6, %v1427_v22  ;;  %v1812_v22 = vrot.slane %v1811_v14, 2 }
 0x215   : > { %1500 = vst.msk [vmem:[#allocation2 + $0x94] ss:$8 sm:$0x3] %vm9047_vm6, %v1429_v23  ;;  %v1817_v23 = vsel %vm623_vm7, %v1764_v10, %v1805_v4 }
 0x216   : > { %1503 = vst.msk [vmem:[#allocation2 + $0xa4] ss:$8 sm:$0x3] %vm9047_vm6, %v1431_v25  ;;  %v1814_v25 = vrot.slane %v1813_v18, 3  ;;  %v1818_v29 = vrot.slane %v1817_v23, 5 }
 0x217   : > { %1506 = vst.msk [vmem:[#allocation2 + $0xb4] ss:$8 sm:$0x3] %vm9047_vm6, %v1433_v28  ;;  %v1821_v28 = vsel %vm629_vm9, %v1805_v4, %v1764_v10 }
 0x218   : > { %1509 = vst.msk [vmem:[#allocation2 + $0xc4] ss:$8 sm:$0x3] %vm9047_vm6, %v1435_v30  ;;  %v1569_v30 = vpop.f32.mrf.mxu2 }
 0x219   : > { %1512 = vst.msk [vmem:[#allocation2 + $0xd4] ss:$8 sm:$0x3] %vm9047_vm6, %v1437_v33  ;;  %v1626_v32 = vsel %vm611_vm2, %v1569_v30, %v1608_v24  ;;  %v1822_v33 = vrot.slane %v1821_v28, 7  ;;  %v1628_v17 = vsel %vm614_vm3, %v1569_v30, %v1608_v24  ;;  %v1630_v34 = vsel %vm617_vm4, %v1569_v30, %v1608_v24 }
 0x21a   : > { %1515 = vst.msk [vmem:[#allocation2 + $0xe4] ss:$8 sm:$0x3] %vm9047_vm6, %v1439_v16  ;;  %v1793_v16 = vpop.f32.mrf.mxu1  ;;  %v1627_v36 = vrot.slane %v1626_v32, 1  ;;  %v1632_v37 = vsel %vm620_vm5, %v1569_v30, %v1608_v24  ;;  %v1629_v38 = vrot.slane %v1628_v17, 2  ;;  %v1631_v41 = vrot.slane %v1630_v34, 3 }
 0x21b   : > { %1518 = vst.msk [vmem:[#allocation2 + $0xf4] ss:$8 sm:$0x3] %vm9047_vm6, %v1441_v35  ;;  %v1625_v35 = vsel %vm609_vm1, %v1569_v30, %v1608_v24  ;;  %v1636_v42 = vsel %vm626_vm8, %v1569_v30, %v1608_v24  ;;  %v1633_v44 = vrot.slane %v1632_v37, 4 }
 0x21c   : > { %1323 = vst.msk [vmem:[#allocation2 + $0x103] ss:$8 sm:$0x3] %vm9047_vm6, %v1244_v39  ;;  %v1634_v39 = vsel %vm623_vm7, %v1569_v30, %v1608_v24  ;;  %v1637_v48 = vrot.slane %v1636_v42, 6 }
 0x21d   : > { %1326 = vst.msk [vmem:[#allocation2 + $0x113] ss:$8 sm:$0x3] %vm9047_vm6, %v1246_v40  ;;  %v1806_v40 = vrot.slane %v1793_v16, 7  ;;  %v1635_v46 = vrot.slane %v1634_v39, 5 }
 0x21e   : > { %1329 = vst.msk [vmem:[#allocation2 + $0x123] ss:$8 sm:$0x3] %vm9047_vm6, %v1248_v43  ;;  %v1598_v43 = vpop.f32.mrf.mxu3 }
 0x21f   : > { %1332 = vst.msk [vmem:[#allocation2 + $0x133] ss:$8 sm:$0x3] %vm9047_vm6, %v1250_v45  ;;  %v1638_v45 = vsel %vm629_vm9, %v1608_v24, %v1569_v30  ;;  %v1609_v60 = vrot.slane %v1598_v43, 7 }
 0x220   : > { %1335 = vst.msk [vmem:[#allocation2 + $0x143] ss:$8 sm:$0x3] %vm9047_vm6, %v1252_v47  ;;  %v1767_v47 = vpop.f32.mrf.mxu0  ;;  %v1639_v50 = vrot.slane %v1638_v45, 7 }
 0x221   : > { %1521 = vst.msk [vmem:[#allocation2 + $0x104] ss:$8 sm:$0x3] %vm9047_vm6, %v1442_v51  ;;  %v1824_v49 = vsel %vm611_vm2, %v1767_v47, %v1806_v40  ;;  %v1826_v51 = vsel %vm614_vm3, %v1767_v47, %v1806_v40  ;;  %v1823_v53 = vsel %vm609_vm1, %v1767_v47, %v1806_v40  ;;  %v1830_v56 = vsel %vm620_vm5, %v1767_v47, %v1806_v40 }
 0x222   : > { %1524 = vst.msk [vmem:[#allocation2 + $0x114] ss:$8 sm:$0x3] %vm9047_vm6, %v1444_v52  ;;  %v1828_v52 = vsel %vm617_vm4, %v1767_v47, %v1806_v40  ;;  %v1827_v58 = vrot.slane %v1826_v51, 2  ;;  %v1834_v62 = vsel %vm626_vm8, %v1767_v47, %v1806_v40  ;;  %v1796_v1 = vpop.f32.mrf.mxu1 }
 0x223   : > { %1527 = vst.msk [vmem:[#allocation2 + $0x124] ss:$8 sm:$0x3] %vm9047_vm6, %v1446_v55  ;;  %v1825_v55 = vrot.slane %v1824_v49, 1  ;;  %v1829_v61 = vrot.slane %v1828_v52, 3  ;;  %v1835_v4 = vrot.slane %v1834_v62, 6 }
 0x224   : > { %1530 = vst.msk [vmem:[#allocation2 + $0x134] ss:$8 sm:$0x3] %vm9047_vm6, %v1448_v57  ;;  %v1572_v57 = vpop.f32.mrf.mxu2  ;;  %v1807_v8 = vrot.slane %v1796_v1, 7 }
 0x225   : > { %1533 = vst.msk [vmem:[#allocation2 + $0x144] ss:$8 sm:$0x3] %vm9047_vm6, %v1450_v59  ;;  %v1832_v59 = vsel %vm623_vm7, %v1767_v47, %v1806_v40  ;;  %v1640_v10 = vsel %vm609_vm1, %v1572_v57, %v1609_v60  ;;  %v1647_v12 = vsel %vm620_vm5, %v1572_v57, %v1609_v60 }
 0x226   : > { %1671 = vst.msk [vmem:[#allocation2 + $0x5] ss:$8 sm:$0x3] %vm9047_vm6, %v1610_v63  ;;  %v1831_v63 = vrot.slane %v1830_v56, 4  ;;  %v1988_v3 = vpop.f32.mrf.mxu3 }
 0x227   : > { %1674 = vst.msk [vmem:[#allocation2 + $0x15] ss:$8 sm:$0x3] %vm9047_vm6, %v1612_v0  ;;  %v1836_v0 = vsel %vm629_vm9, %v1806_v40, %v1767_v47 }
 0x228   : > { %1677 = vst.msk [vmem:[#allocation2 + $0x25] ss:$8 sm:$0x3] %vm9047_vm6, %v1614_v2  ;;  %v1833_v2 = vrot.slane %v1832_v59, 5  ;;  %v1837_v6 = vrot.slane %v1836_v0, 7  ;;  %v1770_v14 = vpop.f32.mrf.mxu0 }
 0x229   : > { %1680 = vst.msk [vmem:[#allocation2 + $0x35] ss:$8 sm:$0x3] %vm9047_vm6, %v1616_v5  ;;  %v1641_v5 = vsel %vm611_vm2, %v1572_v57, %v1609_v60  ;;  %v1839_v18 = vsel %vm611_vm2, %v1770_v14, %v1807_v8  ;;  %v1841_v21 = vsel %vm614_vm3, %v1770_v14, %v1807_v8  ;;  %v1843_v23 = vsel %vm617_vm4, %v1770_v14, %v1807_v8 }
 0x22a   : > { %1683 = vst.msk [vmem:[#allocation2 + $0x45] ss:$8 sm:$0x3] %vm9047_vm6, %v1618_v7  ;;  %v1643_v7 = vsel %vm614_vm3, %v1572_v57, %v1609_v60  ;;  %v1838_v24 = vsel %vm609_vm1, %v1770_v14, %v1807_v8  ;;  %v1845_v26 = vsel %vm620_vm5, %v1770_v14, %v1807_v8 }
 0x22b   : > { %1686 = vst.msk [vmem:[#allocation2 + $0x55] ss:$8 sm:$0x3] %vm9047_vm6, %v1620_v9  ;;  %v1645_v9 = vsel %vm617_vm4, %v1572_v57, %v1609_v60 }
 0x22c   : > { %1689 = vst.msk [vmem:[#allocation2 + $0x65] ss:$8 sm:$0x3] %vm9047_vm6, %v1622_v11  ;;  %v1642_v11 = vrot.slane %v1641_v5, 1  ;;  %v1646_v15 = vrot.slane %v1645_v9, 3 }
 0x22d   : > { %1692 = vst.msk [vmem:[#allocation2 + $0x75] ss:$8 sm:$0x3] %vm9047_vm6, %v1624_v13  ;;  %v1644_v13 = vrot.slane %v1643_v7, 2 }
 0x22e   : > { %1869 = vst.msk [vmem:[#allocation2 + $0x6] ss:$8 sm:$0x3] %vm9047_vm6, %v1808_v19  ;;  %v1962_v19 = vpop.f32.mrf.mxu2  ;;  %v1991_v28 = vpop.f32.mrf.mxu3 }
 0x22f   : > { %1872 = vst.msk [vmem:[#allocation2 + $0x16] ss:$8 sm:$0x3] %vm9047_vm6, %v1810_v20  ;;  %v1648_v20 = vrot.slane %v1647_v12, 4  ;;  %v2004_v37 = vrot.slane %v1991_v28, 7 }
 0x230   : > { %1875 = vst.msk [vmem:[#allocation2 + $0x26] ss:$8 sm:$0x3] %vm9047_vm6, %v1812_v22  ;;  %v2003_v22 = vrot.slane %v1988_v3, 7 }
 0x231   : > { %1878 = vst.msk [vmem:[#allocation2 + $0x36] ss:$8 sm:$0x3] %vm9047_vm6, %v1814_v25  ;;  %v1840_v25 = vrot.slane %v1839_v18, 1 }
 0x232   : > { %1881 = vst.msk [vmem:[#allocation2 + $0x46] ss:$8 sm:$0x3] %vm9047_vm6, %v1816_v27  ;;  %v1842_v27 = vrot.slane %v1841_v21, 2  ;;  %v2007_v30 = vsel %vm611_vm2, %v1962_v19, %v2003_v22  ;;  %v2009_v32 = vsel %vm614_vm3, %v1962_v19, %v2003_v22  ;;  %v2006_v17 = vsel %vm609_vm1, %v1962_v19, %v2003_v22 }
 0x233   : > { %1884 = vst.msk [vmem:[#allocation2 + $0x56] ss:$8 sm:$0x3] %vm9047_vm6, %v1818_v29  ;;  %v1844_v29 = vrot.slane %v1843_v23, 3  ;;  %v2008_v16 = vrot.slane %v2007_v30, 1  ;;  %v2013_v34 = vsel %vm620_vm5, %v1962_v19, %v2003_v22  ;;  %v2017_v39 = vsel %vm626_vm8, %v1962_v19, %v2003_v22 }
 0x234   : > { %1887 = vst.msk [vmem:[#allocation2 + $0x66] ss:$8 sm:$0x3] %vm9047_vm6, %v1820_v31  ;;  %v1846_v31 = vrot.slane %v1845_v26, 4  ;;  %v2019_v42 = vsel %vm629_vm9, %v2003_v22, %v1962_v19 }
 0x235   : > { %1890 = vst.msk [vmem:[#allocation2 + $0x76] ss:$8 sm:$0x3] %vm9047_vm6, %v1822_v33  ;;  %v2011_v33 = vsel %vm617_vm4, %v1962_v19, %v2003_v22 }
 0x236   : > { %1695 = vst.msk [vmem:[#allocation2 + $0x85] ss:$8 sm:$0x3] %vm9047_vm6, %v1625_v35  ;;  %v2010_v35 = vrot.slane %v2009_v32, 2  ;;  %v1965_v40 = vpop.f32.mrf.mxu2 }
 0x237   : > { %1698 = vst.msk [vmem:[#allocation2 + $0x95] ss:$8 sm:$0x3] %vm9047_vm6, %v1627_v36  ;;  %v2015_v36 = vsel %vm623_vm7, %v1962_v19, %v2003_v22  ;;  %v2022_v45 = vsel %vm611_vm2, %v1965_v40, %v2004_v37  ;;  %v2024_v47 = vsel %vm614_vm3, %v1965_v40, %v2004_v37  ;;  %v2026_v49 = vsel %vm617_vm4, %v1965_v40, %v2004_v37 }
 0x238   : > { %1701 = vst.msk [vmem:[#allocation2 + $0xa5] ss:$8 sm:$0x3] %vm9047_vm6, %v1629_v38  ;;  %v2012_v38 = vrot.slane %v2011_v33, 3  ;;  %v2016_v43 = vrot.slane %v2015_v36, 5  ;;  %v2023_v51 = vrot.slane %v2022_v45, 1  ;;  %v2028_v52 = vsel %vm620_vm5, %v1965_v40, %v2004_v37 }
 0x239   : > { %1704 = vst.msk [vmem:[#allocation2 + $0xb5] ss:$8 sm:$0x3] %vm9047_vm6, %v1631_v41  ;;  %v2014_v41 = vrot.slane %v2013_v34, 4  ;;  %v2027_v57 = vrot.slane %v2026_v49, 3  ;;  %v2029_v59 = vrot.slane %v2028_v52, 4  ;;  %v2034_v60 = vsel %vm629_vm9, %v2004_v37, %v1965_v40 }
 0x23a   : > { %1707 = vst.msk [vmem:[#allocation2 + $0xc5] ss:$8 sm:$0x3] %vm9047_vm6, %v1633_v44  ;;  %v2018_v44 = vrot.slane %v2017_v39, 6  ;;  %v2035_v1 = vrot.slane %v2034_v60, 7 }
 0x23b   : > { %1710 = vst.msk [vmem:[#allocation2 + $0xd5] ss:$8 sm:$0x3] %vm9047_vm6, %v1635_v46  ;;  %v2020_v46 = vrot.slane %v2019_v42, 7 }
 0x23c   : > { %1713 = vst.msk [vmem:[#allocation2 + $0xe5] ss:$8 sm:$0x3] %vm9047_vm6, %v1637_v48  ;;  %v1994_v48 = vpop.f32.mrf.mxu3 }
 0x23d   : > { %1716 = vst.msk [vmem:[#allocation2 + $0xf5] ss:$8 sm:$0x3] %vm9047_vm6, %v1639_v50  ;;  %v2021_v50 = vsel %vm609_vm1, %v1965_v40, %v2004_v37  ;;  %v2005_v56 = vrot.slane %v1994_v48, 7 }
 0x23e   : > { %1893 = vst.msk [vmem:[#allocation2 + $0x86] ss:$8 sm:$0x3] %vm9047_vm6, %v1823_v53  ;;  %v2025_v53 = vrot.slane %v2024_v47, 2  ;;  %v1968_v62 = vpop.f32.mrf.mxu2 }
 0x23f   : > { %1896 = vst.msk [vmem:[#allocation2 + $0x96] ss:$8 sm:$0x3] %vm9047_vm6, %v1825_v55  ;;  %v2030_v55 = vsel %vm623_vm7, %v1965_v40, %v2004_v37  ;;  %v2037_v0 = vsel %vm611_vm2, %v1968_v62, %v2005_v56  ;;  %v2041_v3 = vsel %vm617_vm4, %v1968_v62, %v2005_v56 }
 0x240   : > { %1899 = vst.msk [vmem:[#allocation2 + $0xa6] ss:$8 sm:$0x3] %vm9047_vm6, %v1827_v58  ;;  %v2032_v58 = vsel %vm626_vm8, %v1965_v40, %v2004_v37  ;;  %v2038_v5 = vrot.slane %v2037_v0, 1  ;;  %v2042_v8 = vrot.slane %v2041_v3, 3 }
 0x241   : > { %1902 = vst.msk [vmem:[#allocation2 + $0xb6] ss:$8 sm:$0x3] %vm9047_vm6, %v1829_v61  ;;  %v2031_v61 = vrot.slane %v2030_v55, 5 }
 0x242   : > { %1905 = vst.msk [vmem:[#allocation2 + $0xc6] ss:$8 sm:$0x3] %vm9047_vm6, %v1831_v63  ;;  %v2033_v63 = vrot.slane %v2032_v58, 6 }
 0x243   : > { %1908 = vst.msk [vmem:[#allocation2 + $0xd6] ss:$8 sm:$0x3] %vm9047_vm6, %v1833_v2  ;;  %v2039_v2 = vsel %vm614_vm3, %v1968_v62, %v2005_v56 }
 0x244   : > { %1911 = vst.msk [vmem:[#allocation2 + $0xe6] ss:$8 sm:$0x3] %vm9047_vm6, %v1835_v4  ;;  %v2036_v4 = vsel %vm609_vm1, %v1968_v62, %v2005_v56  ;;  %v2040_v7 = vrot.slane %v2039_v2, 2 }
 0x245   : > { %1914 = vst.msk [vmem:[#allocation2 + $0xf6] ss:$8 sm:$0x3] %vm9047_vm6, %v1837_v6  ;;  %v2043_v6 = vsel %vm620_vm5, %v1968_v62, %v2005_v56 }
 0x246   : > { %1719 = vst.msk [vmem:[#allocation2 + $0x105] ss:$8 sm:$0x3] %vm9047_vm6, %v1640_v10  ;;  %v2044_v9 = vrot.slane %v2043_v6, 4 }
 0x247   : > { %1722 = vst.msk [vmem:[#allocation2 + $0x115] ss:$8 sm:$0x3] %vm9047_vm6, %v1642_v11 }
 0x248   : > { %1725 = vst.msk [vmem:[#allocation2 + $0x125] ss:$8 sm:$0x3] %vm9047_vm6, %v1644_v13 }
 0x249   : > { %1728 = vst.msk [vmem:[#allocation2 + $0x135] ss:$8 sm:$0x3] %vm9047_vm6, %v1646_v15 }
 0x24a   : > { %1731 = vst.msk [vmem:[#allocation2 + $0x145] ss:$8 sm:$0x3] %vm9047_vm6, %v1648_v20 }
 0x24b   : > { %1917 = vst.msk [vmem:[#allocation2 + $0x106] ss:$8 sm:$0x3] %vm9047_vm6, %v1838_v24 }
 0x24c   : > { %1920 = vst.msk [vmem:[#allocation2 + $0x116] ss:$8 sm:$0x3] %vm9047_vm6, %v1840_v25 }
 0x24d   : > { %1923 = vst.msk [vmem:[#allocation2 + $0x126] ss:$8 sm:$0x3] %vm9047_vm6, %v1842_v27 }
 0x24e   : > { %1926 = vst.msk [vmem:[#allocation2 + $0x136] ss:$8 sm:$0x3] %vm9047_vm6, %v1844_v29 }
 0x24f   : > { %1929 = vst.msk [vmem:[#allocation2 + $0x146] ss:$8 sm:$0x3] %vm9047_vm6, %v1846_v31 }
 0x250   : > { %2067 = vst.msk [vmem:[#allocation2 + $0x7] ss:$8 sm:$0x3] %vm9047_vm6, %v2006_v17 }
 0x251   : > { %2070 = vst.msk [vmem:[#allocation2 + $0x17] ss:$8 sm:$0x3] %vm9047_vm6, %v2008_v16 }
 0x252   : > { %2073 = vst.msk [vmem:[#allocation2 + $0x27] ss:$8 sm:$0x3] %vm9047_vm6, %v2010_v35 }
 0x253   : > { %2076 = vst.msk [vmem:[#allocation2 + $0x37] ss:$8 sm:$0x3] %vm9047_vm6, %v2012_v38 }
 0x254   : > { %2079 = vst.msk [vmem:[#allocation2 + $0x47] ss:$8 sm:$0x3] %vm9047_vm6, %v2014_v41 }
 0x255   : > { %2082 = vst.msk [vmem:[#allocation2 + $0x57] ss:$8 sm:$0x3] %vm9047_vm6, %v2016_v43 }
 0x256   : > { %2085 = vst.msk [vmem:[#allocation2 + $0x67] ss:$8 sm:$0x3] %vm9047_vm6, %v2018_v44 }
 0x257   : > { %2088 = vst.msk [vmem:[#allocation2 + $0x77] ss:$8 sm:$0x3] %vm9047_vm6, %v2020_v46 }
 0x258   : > { %2091 = vst.msk [vmem:[#allocation2 + $0x87] ss:$8 sm:$0x3] %vm9047_vm6, %v2021_v50 }
 0x259   : > { %2094 = vst.msk [vmem:[#allocation2 + $0x97] ss:$8 sm:$0x3] %vm9047_vm6, %v2023_v51 }
 0x25a   : > { %2097 = vst.msk [vmem:[#allocation2 + $0xa7] ss:$8 sm:$0x3] %vm9047_vm6, %v2025_v53 }
 0x25b   : > { %2100 = vst.msk [vmem:[#allocation2 + $0xb7] ss:$8 sm:$0x3] %vm9047_vm6, %v2027_v57 }
 0x25c   : > { %2103 = vst.msk [vmem:[#allocation2 + $0xc7] ss:$8 sm:$0x3] %vm9047_vm6, %v2029_v59 }
 0x25d   : > { %2106 = vst.msk [vmem:[#allocation2 + $0xd7] ss:$8 sm:$0x3] %vm9047_vm6, %v2031_v61 }
 0x25e   : > { %2109 = vst.msk [vmem:[#allocation2 + $0xe7] ss:$8 sm:$0x3] %vm9047_vm6, %v2033_v63 }
 0x25f   : > { %2112 = vst.msk [vmem:[#allocation2 + $0xf7] ss:$8 sm:$0x3] %vm9047_vm6, %v2035_v1 }
 0x260   : > { %2115 = vst.msk [vmem:[#allocation2 + $0x107] ss:$8 sm:$0x3] %vm9047_vm6, %v2036_v4 }
 0x261   : > { %2118 = vst.msk [vmem:[#allocation2 + $0x117] ss:$8 sm:$0x3] %vm9047_vm6, %v2038_v5 }
 0x262   : > { %2121 = vst.msk [vmem:[#allocation2 + $0x127] ss:$8 sm:$0x3] %vm9047_vm6, %v2040_v7 }
 0x263   : > { %2124 = vst.msk [vmem:[#allocation2 + $0x137] ss:$8 sm:$0x3] %vm9047_vm6, %v2042_v8 }
 0x264   : > { %2127 = vst.msk [vmem:[#allocation2 + $0x147] ss:$8 sm:$0x3] %vm9047_vm6, %v2044_v9 }
 0x265 PF: > { %v2145_v10 = vld [vmem:[#allocation2] sm:$0xff]  ;;  %v2146_v11 = vld [vmem:[#allocation2 + $0x8] sm:$0xff]  ;;  %vm2147_vm10 = vcmask 64512   ;;  %v2375_v13 = vld [vmem:[#allocation2 + $0x10] sm:$0xff] }
 0x266   : > { %v9600_v12 = vld [vmem:[%s8934_s6 + $0x40] sm:$0xff]  ;;  %8517 = vmatpush.msra.mxu2 %v2145_v10  ;;  %8518 = vmatpush.msra.mxu3 %v2146_v11  ;;  %v2376_v14 = vld [vmem:[#allocation2 + $0x18] sm:$0xff]  ;;  %v2606_v18 = vld [vmem:[#allocation2 + $0x28] sm:$0xff] }
 0x267   : > { %7206 = vmatmul.msk.f32.vlgmr.msra.gmra.mxu2 %vm2147_vm10, %v9600_v12  ;;  %7222 = vmatmul.msk.f32.vlgmr.msra.gmra.mxu3 %vm2147_vm10, %v9600_v12  ;;  %v9607_v54 = vld [vmem:[%s8934_s6] sm:$0xff]  ;;  %v9614_v19 = vld [vmem:[%s8934_s6 + $0x48] sm:$0xff]  ;;  %v9628_v21 = vld [vmem:[%s8934_s6 + $0x50] sm:$0xff] }
 0x268   : > { %2440 = vmatpush.msrb.mxu2 %v2375_v13  ;;  %2505 = vmatpush.msrb.mxu3 %v2376_v14  ;;  %v2605_v15 = vld [vmem:[#allocation2 + $0x20] sm:$0xff]  ;;  %v9621_v20 = vld [vmem:[%s8934_s6 + $0x8] sm:$0xff]  ;;  %v9635_v22 = vld [vmem:[%s8934_s6 + $0x10] sm:$0xff] }
 0x269   : > { %2211 = vmatpush.msra.mxu0 %v2145_v10  ;;  %2276 = vmatpush.msra.mxu1 %v2146_v11  ;;  %v9642_v23 = vld [vmem:[%s8934_s6 + $0x58] sm:$0xff]  ;;  %v9656_v25 = vld [vmem:[%s8934_s6 + $0x60] sm:$0xff]  ;;  %v2835_v27 = vld [vmem:[#allocation2 + $0x30] sm:$0xff] }
 0x26a   : > { %7198 = vmatmul.msk.f32.vlgmr.msra.gmra.mxu0 %vm2147_vm10, %v9607_v54  ;;  %7214 = vmatmul.msk.f32.vlgmr.msra.gmra.mxu1 %vm2147_vm10, %v9607_v54  ;;  %v9649_v24 = vld [vmem:[%s8934_s6 + $0x18] sm:$0xff]  ;;  %v9663_v26 = vld [vmem:[%s8934_s6 + $0x20] sm:$0xff]  ;;  %v3066_v30 = vld [vmem:[#allocation2 + $0x48] sm:$0xff] }
 0x26b   : > { %2670 = vmatpush.msrb.mxu0 %v2605_v15  ;;  %2735 = vmatpush.msrb.mxu1 %v2606_v18  ;;  %v2836_v28 = vld [vmem:[#allocation2 + $0x38] sm:$0xff]  ;;  %v3065_v29 = vld [vmem:[#allocation2 + $0x40] sm:$0xff]  ;;  %v9670_v31 = vld [vmem:[%s8934_s6 + $0x68] sm:$0xff] }
 0x26c   : > { %2900 = vmatpush.msra.mxu2 %v2835_v27  ;;  %2965 = vmatpush.msra.mxu3 %v2836_v28  ;;  %v9677_v32 = vld [vmem:[%s8934_s6 + $0x28] sm:$0xff]  ;;  %v9684_v33 = vld [vmem:[%s8934_s6 + $0x70] sm:$0xff]  ;;  %v9698_v16 = vld [vmem:[%s8934_s6 + $0x78] sm:$0xff] }
 0x26d   : > { %3130 = vmatpush.msra.mxu0 %v3065_v29  ;;  %3195 = vmatpush.msra.mxu1 %v3066_v30  ;;  %v9691_v17 = vld [vmem:[%s8934_s6 + $0x30] sm:$0xff]  ;;  %v9705_v34 = vld [vmem:[%s8934_s6 + $0x38] sm:$0xff]  ;;  %v3525_v58 = vld [vmem:[#allocation2 + $0x60] sm:$0xff] }
 0x26e   : > { %v3295_v53 = vld [vmem:[#allocation2 + $0x50] sm:$0xff]  ;;  %v3296_v55 = vld [vmem:[#allocation2 + $0x58] sm:$0xff]  ;;  %v3526_v59 = vld [vmem:[#allocation2 + $0x68] sm:$0xff] }
 0x26f   : > { %7207 = vmatmul.msk.f32.gmra.mxu2 %vm2147_vm10, %v9614_v19  ;;  %7223 = vmatmul.msk.f32.gmra.mxu3 %vm2147_vm10, %v9614_v19 }
 0x272   : > { %7199 = vmatmul.msk.f32.gmra.mxu0 %vm2147_vm10, %v9621_v20  ;;  %7215 = vmatmul.msk.f32.gmra.mxu1 %vm2147_vm10, %v9621_v20 }
 0x277   : > { %7208 = vmatmul.msk.f32.gmra.mxu2 %vm2147_vm10, %v9628_v21  ;;  %7224 = vmatmul.msk.f32.gmra.mxu3 %vm2147_vm10, %v9628_v21 }
 0x27a   : > { %7200 = vmatmul.msk.f32.gmra.mxu0 %vm2147_vm10, %v9635_v22  ;;  %7216 = vmatmul.msk.f32.gmra.mxu1 %vm2147_vm10, %v9635_v22 }
 0x27f   : > { %7209 = vmatmul.msk.f32.gmra.mxu2 %vm2147_vm10, %v9642_v23  ;;  %7225 = vmatmul.msk.f32.gmra.mxu3 %vm2147_vm10, %v9642_v23 }
 0x282   : > { %7201 = vmatmul.msk.f32.gmra.mxu0 %vm2147_vm10, %v9649_v24  ;;  %7217 = vmatmul.msk.f32.gmra.mxu1 %vm2147_vm10, %v9649_v24 }
 0x287   : > { %7210 = vmatmul.msk.f32.gmra.mxu2 %vm2147_vm10, %v9656_v25  ;;  %7226 = vmatmul.msk.f32.gmra.mxu3 %vm2147_vm10, %v9656_v25 }
 0x28a   : > { %7202 = vmatmul.msk.f32.gmra.mxu0 %vm2147_vm10, %v9663_v26  ;;  %7218 = vmatmul.msk.f32.gmra.mxu1 %vm2147_vm10, %v9663_v26 }
 0x28f   : > { %7211 = vmatmul.msk.f32.gmra.mxu2 %vm2147_vm10, %v9670_v31  ;;  %7227 = vmatmul.msk.f32.gmra.mxu3 %vm2147_vm10, %v9670_v31 }
 0x292   : > { %7203 = vmatmul.msk.f32.gmra.mxu0 %vm2147_vm10, %v9677_v32  ;;  %7219 = vmatmul.msk.f32.gmra.mxu1 %vm2147_vm10, %v9677_v32 }
 0x297   : > { %7212 = vmatmul.msk.f32.gmra.mxu2 %vm2147_vm10, %v9684_v33  ;;  %7228 = vmatmul.msk.f32.gmra.mxu3 %vm2147_vm10, %v9684_v33 }
 0x29a   : > { %7204 = vmatmul.msk.f32.gmra.mxu0 %vm2147_vm10, %v9691_v17  ;;  %7220 = vmatmul.msk.f32.gmra.mxu1 %vm2147_vm10, %v9691_v17 }
 0x29f   : > { %7213 = vmatmul.msk.f32.gmra.mxu2 %vm2147_vm10, %v9698_v16  ;;  %7229 = vmatmul.msk.f32.gmra.mxu3 %vm2147_vm10, %v9698_v16 }
 0x2a2   : > { %7205 = vmatmul.msk.f32.gmra.mxu0 %vm2147_vm10, %v9705_v34  ;;  %7221 = vmatmul.msk.f32.gmra.mxu1 %vm2147_vm10, %v9705_v34 }
 0x2a7   : > { %7230 = vmatmul.msk.f32.vlgmr.msrb.gmra.mxu2 %vm2147_vm10, %v9607_v54  ;;  %7246 = vmatmul.msk.f32.vlgmr.msrb.gmra.mxu3 %vm2147_vm10, %v9607_v54 }
 0x2a8   : > { %3360 = vmatpush.msrb.mxu2 %v3295_v53  ;;  %3425 = vmatpush.msrb.mxu3 %v3296_v55 }
 0x2aa   : > { %7294 = vmatmul.msk.f32.vlgmr.msrb.gmra.mxu0 %vm2147_vm10, %v9607_v54  ;;  %7310 = vmatmul.msk.f32.vlgmr.msrb.gmra.mxu1 %vm2147_vm10, %v9607_v54 }
 0x2ab   : > { %3590 = vmatpush.msrb.mxu0 %v3525_v58  ;;  %3655 = vmatpush.msrb.mxu1 %v3526_v59 }
 0x2af   : > { %7231 = vmatmul.msk.f32.gmra.mxu2 %vm2147_vm10, %v9621_v20  ;;  %7247 = vmatmul.msk.f32.gmra.mxu3 %vm2147_vm10, %v9621_v20 }
 0x2b2   : > { %7295 = vmatmul.msk.f32.gmra.mxu0 %vm2147_vm10, %v9621_v20  ;;  %7311 = vmatmul.msk.f32.gmra.mxu1 %vm2147_vm10, %v9621_v20 }
 0x2b7   : > { %7232 = vmatmul.msk.f32.gmra.mxu2 %vm2147_vm10, %v9635_v22  ;;  %7248 = vmatmul.msk.f32.gmra.mxu3 %vm2147_vm10, %v9635_v22 }
 0x2ba   : > { %7296 = vmatmul.msk.f32.gmra.mxu0 %vm2147_vm10, %v9635_v22  ;;  %7312 = vmatmul.msk.f32.gmra.mxu1 %vm2147_vm10, %v9635_v22 }
 0x2bf   : > { %7233 = vmatmul.msk.f32.gmra.mxu2 %vm2147_vm10, %v9649_v24  ;;  %7249 = vmatmul.msk.f32.gmra.mxu3 %vm2147_vm10, %v9649_v24 }
 0x2c2   : > { %7297 = vmatmul.msk.f32.gmra.mxu0 %vm2147_vm10, %v9649_v24  ;;  %7313 = vmatmul.msk.f32.gmra.mxu1 %vm2147_vm10, %v9649_v24 }
 0x2c7   : > { %7234 = vmatmul.msk.f32.gmra.mxu2 %vm2147_vm10, %v9663_v26  ;;  %7250 = vmatmul.msk.f32.gmra.mxu3 %vm2147_vm10, %v9663_v26 }
 0x2ca   : > { %7298 = vmatmul.msk.f32.gmra.mxu0 %vm2147_vm10, %v9663_v26  ;;  %7314 = vmatmul.msk.f32.gmra.mxu1 %vm2147_vm10, %v9663_v26 }
 0x2cf   : > { %7235 = vmatmul.msk.f32.gmra.mxu2 %vm2147_vm10, %v9677_v32  ;;  %7251 = vmatmul.msk.f32.gmra.mxu3 %vm2147_vm10, %v9677_v32 }
 0x2d2   : > { %7299 = vmatmul.msk.f32.gmra.mxu0 %vm2147_vm10, %v9677_v32  ;;  %7315 = vmatmul.msk.f32.gmra.mxu1 %vm2147_vm10, %v9677_v32 }
 0x2d7   : > { %7236 = vmatmul.msk.f32.gmra.mxu2 %vm2147_vm10, %v9691_v17  ;;  %7252 = vmatmul.msk.f32.gmra.mxu3 %vm2147_vm10, %v9691_v17 }
 0x2da   : > { %7300 = vmatmul.msk.f32.gmra.mxu0 %vm2147_vm10, %v9691_v17  ;;  %7316 = vmatmul.msk.f32.gmra.mxu1 %vm2147_vm10, %v9691_v17 }
 0x2df   : > { %7237 = vmatmul.msk.f32.gmra.mxu2 %vm2147_vm10, %v9705_v34  ;;  %7253 = vmatmul.msk.f32.gmra.mxu3 %vm2147_vm10, %v9705_v34 }
 0x2e2   : > { %7301 = vmatmul.msk.f32.gmra.mxu0 %vm2147_vm10, %v9705_v34  ;;  %7317 = vmatmul.msk.f32.gmra.mxu1 %vm2147_vm10, %v9705_v34 }
 0x2e7   : > { %7238 = vmatmul.msk.f32.gmra.mxu2 %vm2147_vm10, %v9600_v12  ;;  %7254 = vmatmul.msk.f32.gmra.mxu3 %vm2147_vm10, %v9600_v12  ;;  %v2213_v35 = vpop.f32.mrf.mxu0  ;;  %v2278_v36 = vpop.f32.mrf.mxu1 }
 0x2e8   : > { %2326 = vst [vmem:[%s8936_s26] sm:$0xff] %v2213_v35 }
 0x2e9   : > { %2327 = vst [vmem:[%s8936_s26 + $0x8] sm:$0xff] %v2278_v36 }
 0x2ea   : > { %v2237_v37 = vpop.f32.mrf.mxu2  ;;  %v2302_v38 = vpop.f32.mrf.mxu3  ;;  %7302 = vmatmul.msk.f32.gmra.mxu0 %vm2147_vm10, %v9600_v12  ;;  %7318 = vmatmul.msk.f32.gmra.mxu1 %vm2147_vm10, %v9600_v12 }
 0x2eb   : > { %2342 = vst [vmem:[%s8936_s26 + $0x80] sm:$0xff] %v2237_v37 }
 0x2ec   : > { %2343 = vst [vmem:[%s8936_s26 + $0x88] sm:$0xff] %v2302_v38 }
 0x2ef   : > { %7239 = vmatmul.msk.f32.gmra.mxu2 %vm2147_vm10, %v9614_v19  ;;  %7255 = vmatmul.msk.f32.gmra.mxu3 %vm2147_vm10, %v9614_v19  ;;  %v2216_v39 = vpop.f32.mrf.mxu0  ;;  %v2281_v40 = vpop.f32.mrf.mxu1 }
 0x2f0   : > { %2328 = vst [vmem:[%s8936_s26 + $0x10] sm:$0xff] %v2216_v39 }
 0x2f1   : > { %2329 = vst [vmem:[%s8936_s26 + $0x18] sm:$0xff] %v2281_v40 }
 0x2f2   : > { %v2240_v41 = vpop.f32.mrf.mxu2  ;;  %v2305_v42 = vpop.f32.mrf.mxu3  ;;  %7303 = vmatmul.msk.f32.gmra.mxu0 %vm2147_vm10, %v9614_v19  ;;  %7319 = vmatmul.msk.f32.gmra.mxu1 %vm2147_vm10, %v9614_v19 }
 0x2f3   : > { %2344 = vst [vmem:[%s8936_s26 + $0x90] sm:$0xff] %v2240_v41 }
 0x2f4   : > { %2345 = vst [vmem:[%s8936_s26 + $0x98] sm:$0xff] %v2305_v42 }
 0x2f7   : > { %7240 = vmatmul.msk.f32.gmra.mxu2 %vm2147_vm10, %v9628_v21  ;;  %7256 = vmatmul.msk.f32.gmra.mxu3 %vm2147_vm10, %v9628_v21  ;;  %v2219_v43 = vpop.f32.mrf.mxu0  ;;  %v2284_v44 = vpop.f32.mrf.mxu1 }
 0x2f8   : > { %2330 = vst [vmem:[%s8936_s26 + $0x20] sm:$0xff] %v2219_v43 }
 0x2f9   : > { %2331 = vst [vmem:[%s8936_s26 + $0x28] sm:$0xff] %v2284_v44 }
 0x2fa   : > { %v2243_v45 = vpop.f32.mrf.mxu2  ;;  %v2308_v46 = vpop.f32.mrf.mxu3  ;;  %7304 = vmatmul.msk.f32.gmra.mxu0 %vm2147_vm10, %v9628_v21  ;;  %7320 = vmatmul.msk.f32.gmra.mxu1 %vm2147_vm10, %v9628_v21 }
 0x2fb   : > { %2346 = vst [vmem:[%s8936_s26 + $0xa0] sm:$0xff] %v2243_v45 }
 0x2fc   : > { %2347 = vst [vmem:[%s8936_s26 + $0xa8] sm:$0xff] %v2308_v46 }
 0x2ff   : > { %7241 = vmatmul.msk.f32.gmra.mxu2 %vm2147_vm10, %v9642_v23  ;;  %7257 = vmatmul.msk.f32.gmra.mxu3 %vm2147_vm10, %v9642_v23  ;;  %v2222_v47 = vpop.f32.mrf.mxu0  ;;  %v2287_v48 = vpop.f32.mrf.mxu1 }
 0x300   : > { %2332 = vst [vmem:[%s8936_s26 + $0x30] sm:$0xff] %v2222_v47 }
 0x301   : > { %2333 = vst [vmem:[%s8936_s26 + $0x38] sm:$0xff] %v2287_v48 }
 0x302   : > { %v2246_v49 = vpop.f32.mrf.mxu2  ;;  %v2311_v50 = vpop.f32.mrf.mxu3  ;;  %7305 = vmatmul.msk.f32.gmra.mxu0 %vm2147_vm10, %v9642_v23  ;;  %7321 = vmatmul.msk.f32.gmra.mxu1 %vm2147_vm10, %v9642_v23 }
 0x303   : > { %2348 = vst [vmem:[%s8936_s26 + $0xb0] sm:$0xff] %v2246_v49 }
 0x304   : > { %2349 = vst [vmem:[%s8936_s26 + $0xb8] sm:$0xff] %v2311_v50 }
 0x307   : > { %7242 = vmatmul.msk.f32.gmra.mxu2 %vm2147_vm10, %v9656_v25  ;;  %7258 = vmatmul.msk.f32.gmra.mxu3 %vm2147_vm10, %v9656_v25  ;;  %v2225_v51 = vpop.f32.mrf.mxu0  ;;  %v2290_v52 = vpop.f32.mrf.mxu1 }
 0x308   : > { %2334 = vst [vmem:[%s8936_s26 + $0x40] sm:$0xff] %v2225_v51 }
 0x309   : > { %2335 = vst [vmem:[%s8936_s26 + $0x48] sm:$0xff] %v2290_v52 }
 0x30a   : > { %v2249_v56 = vpop.f32.mrf.mxu2  ;;  %v2314_v57 = vpop.f32.mrf.mxu3  ;;  %7306 = vmatmul.msk.f32.gmra.mxu0 %vm2147_vm10, %v9656_v25  ;;  %7322 = vmatmul.msk.f32.gmra.mxu1 %vm2147_vm10, %v9656_v25 }
 0x30b   : > { %2350 = vst [vmem:[%s8936_s26 + $0xc0] sm:$0xff] %v2249_v56 }
 0x30c   : > { %2351 = vst [vmem:[%s8936_s26 + $0xc8] sm:$0xff] %v2314_v57 }
 0x30f   : > { %7243 = vmatmul.msk.f32.gmra.mxu2 %vm2147_vm10, %v9670_v31  ;;  %7259 = vmatmul.msk.f32.gmra.mxu3 %vm2147_vm10, %v9670_v31  ;;  %v2228_v60 = vpop.f32.mrf.mxu0  ;;  %v2293_v61 = vpop.f32.mrf.mxu1 }
 0x310   : > { %2336 = vst [vmem:[%s8936_s26 + $0x50] sm:$0xff] %v2228_v60 }
 0x311   : > { %2337 = vst [vmem:[%s8936_s26 + $0x58] sm:$0xff] %v2293_v61 }
 0x312   : > { %v2252_v62 = vpop.f32.mrf.mxu2  ;;  %v2317_v63 = vpop.f32.mrf.mxu3  ;;  %7307 = vmatmul.msk.f32.gmra.mxu0 %vm2147_vm10, %v9670_v31  ;;  %7323 = vmatmul.msk.f32.gmra.mxu1 %vm2147_vm10, %v9670_v31 }
 0x313   : > { %2352 = vst [vmem:[%s8936_s26 + $0xd0] sm:$0xff] %v2252_v62 }
 0x314   : > { %2353 = vst [vmem:[%s8936_s26 + $0xd8] sm:$0xff] %v2317_v63 }
 0x317   : > { %7244 = vmatmul.msk.f32.gmra.mxu2 %vm2147_vm10, %v9684_v33  ;;  %7260 = vmatmul.msk.f32.gmra.mxu3 %vm2147_vm10, %v9684_v33  ;;  %v2231_v0 = vpop.f32.mrf.mxu0  ;;  %v2296_v1 = vpop.f32.mrf.mxu1 }
 0x318   : > { %2338 = vst [vmem:[%s8936_s26 + $0x60] sm:$0xff] %v2231_v0 }
 0x319   : > { %2339 = vst [vmem:[%s8936_s26 + $0x68] sm:$0xff] %v2296_v1 }
 0x31a   : > { %v2255_v2 = vpop.f32.mrf.mxu2  ;;  %v2320_v3 = vpop.f32.mrf.mxu3  ;;  %7308 = vmatmul.msk.f32.gmra.mxu0 %vm2147_vm10, %v9684_v33  ;;  %7324 = vmatmul.msk.f32.gmra.mxu1 %vm2147_vm10, %v9684_v33 }
 0x31b   : > { %2354 = vst [vmem:[%s8936_s26 + $0xe0] sm:$0xff] %v2255_v2 }
 0x31c   : > { %2355 = vst [vmem:[%s8936_s26 + $0xe8] sm:$0xff] %v2320_v3 }
 0x31f   : > { %7245 = vmatmul.msk.f32.gmra.mxu2 %vm2147_vm10, %v9698_v16  ;;  %7261 = vmatmul.msk.f32.gmra.mxu3 %vm2147_vm10, %v9698_v16  ;;  %v2234_v4 = vpop.f32.mrf.mxu0  ;;  %v2299_v5 = vpop.f32.mrf.mxu1 }
 0x320   : > { %2340 = vst [vmem:[%s8936_s26 + $0x70] sm:$0xff] %v2234_v4 }
 0x321   : > { %2341 = vst [vmem:[%s8936_s26 + $0x78] sm:$0xff] %v2299_v5 }
 0x322   : > { %v2258_v6 = vpop.f32.mrf.mxu2  ;;  %v2323_v7 = vpop.f32.mrf.mxu3  ;;  %7309 = vmatmul.msk.f32.gmra.mxu0 %vm2147_vm10, %v9698_v16  ;;  %7325 = vmatmul.msk.f32.gmra.mxu1 %vm2147_vm10, %v9698_v16 }
 0x323   : > { %2356 = vst [vmem:[%s8936_s26 + $0xf0] sm:$0xff] %v2258_v6 }
 0x324   : > { %2357 = vst [vmem:[%s8936_s26 + $0xf8] sm:$0xff] %v2323_v7  ;;  %v3755_v7 = vld [vmem:[#allocation2 + $0x70] sm:$0xff] }
 0x327   : > { %7358 = vmatmul.msk.f32.vlgmr.msra.gmra.mxu2 %vm2147_vm10, %v9607_v54  ;;  %7374 = vmatmul.msk.f32.vlgmr.msra.gmra.mxu3 %vm2147_vm10, %v9607_v54  ;;  %v2672_v8 = vpop.f32.mrf.mxu0  ;;  %v2737_v9 = vpop.f32.mrf.mxu1 }
 0x328   : > { %7326 = vst [vmem:[%s8936_s26 + $0x200] sm:$0xff] %v2672_v8  ;;  %v3756_v8 = vld [vmem:[#allocation2 + $0x78] sm:$0xff]  ;;  %3820 = vmatpush.msra.mxu2 %v3755_v7 }
 0x329   : > { %7327 = vst [vmem:[%s8936_s26 + $0x208] sm:$0xff] %v2737_v9  ;;  %3885 = vmatpush.msra.mxu3 %v3756_v8 }
 0x32a   : > { %v2442_v10 = vpop.f32.mrf.mxu2  ;;  %v2507_v11 = vpop.f32.mrf.mxu3  ;;  %7422 = vmatmul.msk.f32.vlgmr.msra.gmra.mxu0 %vm2147_vm10, %v9607_v54  ;;  %7438 = vmatmul.msk.f32.vlgmr.msra.gmra.mxu1 %vm2147_vm10, %v9607_v54 }
 0x32b   : > { %7262 = vst [vmem:[%s8936_s26 + $0x100] sm:$0xff] %v2442_v10  ;;  %v3985_v10 = vld [vmem:[#allocation2 + $0x80] sm:$0xff] }
 0x32c   : > { %7263 = vst [vmem:[%s8936_s26 + $0x108] sm:$0xff] %v2507_v11  ;;  %v3986_v11 = vld [vmem:[#allocation2 + $0x88] sm:$0xff]  ;;  %4050 = vmatpush.msra.mxu0 %v3985_v10 }
 0x32d   : > { %4115 = vmatpush.msra.mxu1 %v3986_v11 }
 0x32f   : > { %7359 = vmatmul.msk.f32.gmra.mxu2 %vm2147_vm10, %v9621_v20  ;;  %7375 = vmatmul.msk.f32.gmra.mxu3 %vm2147_vm10, %v9621_v20  ;;  %v2675_v13 = vpop.f32.mrf.mxu0  ;;  %v2740_v14 = vpop.f32.mrf.mxu1 }
 0x330   : > { %7328 = vst [vmem:[%s8936_s26 + $0x210] sm:$0xff] %v2675_v13 }
 0x331   : > { %7329 = vst [vmem:[%s8936_s26 + $0x218] sm:$0xff] %v2740_v14 }
 0x332   : > { %v2445_v15 = vpop.f32.mrf.mxu2  ;;  %v2510_v18 = vpop.f32.mrf.mxu3  ;;  %7423 = vmatmul.msk.f32.gmra.mxu0 %vm2147_vm10, %v9621_v20  ;;  %7439 = vmatmul.msk.f32.gmra.mxu1 %vm2147_vm10, %v9621_v20 }
 0x333   : > { %7264 = vst [vmem:[%s8936_s26 + $0x110] sm:$0xff] %v2445_v15 }
 0x334   : > { %7265 = vst [vmem:[%s8936_s26 + $0x118] sm:$0xff] %v2510_v18 }
 0x337   : > { %7360 = vmatmul.msk.f32.gmra.mxu2 %vm2147_vm10, %v9635_v22  ;;  %7376 = vmatmul.msk.f32.gmra.mxu3 %vm2147_vm10, %v9635_v22  ;;  %v2678_v27 = vpop.f32.mrf.mxu0  ;;  %v2743_v28 = vpop.f32.mrf.mxu1 }
 0x338   : > { %7330 = vst [vmem:[%s8936_s26 + $0x220] sm:$0xff] %v2678_v27 }
 0x339   : > { %7331 = vst [vmem:[%s8936_s26 + $0x228] sm:$0xff] %v2743_v28 }
 0x33a   : > { %v2448_v29 = vpop.f32.mrf.mxu2  ;;  %v2513_v30 = vpop.f32.mrf.mxu3  ;;  %7424 = vmatmul.msk.f32.gmra.mxu0 %vm2147_vm10, %v9635_v22  ;;  %7440 = vmatmul.msk.f32.gmra.mxu1 %vm2147_vm10, %v9635_v22 }
 0x33b   : > { %7266 = vst [vmem:[%s8936_s26 + $0x120] sm:$0xff] %v2448_v29 }
 0x33c   : > { %7267 = vst [vmem:[%s8936_s26 + $0x128] sm:$0xff] %v2513_v30 }
 0x33f   : > { %7361 = vmatmul.msk.f32.gmra.mxu2 %vm2147_vm10, %v9649_v24  ;;  %7377 = vmatmul.msk.f32.gmra.mxu3 %vm2147_vm10, %v9649_v24  ;;  %v2681_v35 = vpop.f32.mrf.mxu0  ;;  %v2746_v36 = vpop.f32.mrf.mxu1 }
 0x340   : > { %7332 = vst [vmem:[%s8936_s26 + $0x230] sm:$0xff] %v2681_v35 }
 0x341   : > { %7333 = vst [vmem:[%s8936_s26 + $0x238] sm:$0xff] %v2746_v36 }
 0x342   : > { %v2451_v37 = vpop.f32.mrf.mxu2  ;;  %v2516_v38 = vpop.f32.mrf.mxu3  ;;  %7425 = vmatmul.msk.f32.gmra.mxu0 %vm2147_vm10, %v9649_v24  ;;  %7441 = vmatmul.msk.f32.gmra.mxu1 %vm2147_vm10, %v9649_v24 }
 0x343   : > { %7268 = vst [vmem:[%s8936_s26 + $0x130] sm:$0xff] %v2451_v37 }
 0x344   : > { %7269 = vst [vmem:[%s8936_s26 + $0x138] sm:$0xff] %v2516_v38 }
 0x347   : > { %7362 = vmatmul.msk.f32.gmra.mxu2 %vm2147_vm10, %v9663_v26  ;;  %7378 = vmatmul.msk.f32.gmra.mxu3 %vm2147_vm10, %v9663_v26  ;;  %v2684_v39 = vpop.f32.mrf.mxu0  ;;  %v2749_v40 = vpop.f32.mrf.mxu1 }
 0x348   : > { %7334 = vst [vmem:[%s8936_s26 + $0x240] sm:$0xff] %v2684_v39 }
 0x349   : > { %7335 = vst [vmem:[%s8936_s26 + $0x248] sm:$0xff] %v2749_v40 }
 0x34a   : > { %v2454_v41 = vpop.f32.mrf.mxu2  ;;  %v2519_v42 = vpop.f32.mrf.mxu3  ;;  %7426 = vmatmul.msk.f32.gmra.mxu0 %vm2147_vm10, %v9663_v26  ;;  %7442 = vmatmul.msk.f32.gmra.mxu1 %vm2147_vm10, %v9663_v26 }
 0x34b   : > { %7270 = vst [vmem:[%s8936_s26 + $0x140] sm:$0xff] %v2454_v41 }
 0x34c   : > { %7271 = vst [vmem:[%s8936_s26 + $0x148] sm:$0xff] %v2519_v42 }
 0x34f   : > { %7363 = vmatmul.msk.f32.gmra.mxu2 %vm2147_vm10, %v9677_v32  ;;  %7379 = vmatmul.msk.f32.gmra.mxu3 %vm2147_vm10, %v9677_v32  ;;  %v2687_v43 = vpop.f32.mrf.mxu0  ;;  %v2752_v44 = vpop.f32.mrf.mxu1 }
 0x350   : > { %7336 = vst [vmem:[%s8936_s26 + $0x250] sm:$0xff] %v2687_v43 }
 0x351   : > { %7337 = vst [vmem:[%s8936_s26 + $0x258] sm:$0xff] %v2752_v44 }
 0x352   : > { %v2457_v45 = vpop.f32.mrf.mxu2  ;;  %v2522_v46 = vpop.f32.mrf.mxu3  ;;  %7427 = vmatmul.msk.f32.gmra.mxu0 %vm2147_vm10, %v9677_v32  ;;  %7443 = vmatmul.msk.f32.gmra.mxu1 %vm2147_vm10, %v9677_v32 }
 0x353   : > { %7272 = vst [vmem:[%s8936_s26 + $0x150] sm:$0xff] %v2457_v45 }
 0x354   : > { %7273 = vst [vmem:[%s8936_s26 + $0x158] sm:$0xff] %v2522_v46 }
 0x357   : > { %7364 = vmatmul.msk.f32.gmra.mxu2 %vm2147_vm10, %v9691_v17  ;;  %7380 = vmatmul.msk.f32.gmra.mxu3 %vm2147_vm10, %v9691_v17  ;;  %v2690_v47 = vpop.f32.mrf.mxu0  ;;  %v2755_v48 = vpop.f32.mrf.mxu1 }
 0x358   : > { %7338 = vst [vmem:[%s8936_s26 + $0x260] sm:$0xff] %v2690_v47 }
 0x359   : > { %7339 = vst [vmem:[%s8936_s26 + $0x268] sm:$0xff] %v2755_v48 }
 0x35a   : > { %v2460_v49 = vpop.f32.mrf.mxu2  ;;  %v2525_v50 = vpop.f32.mrf.mxu3  ;;  %7428 = vmatmul.msk.f32.gmra.mxu0 %vm2147_vm10, %v9691_v17  ;;  %7444 = vmatmul.msk.f32.gmra.mxu1 %vm2147_vm10, %v9691_v17 }
 0x35b   : > { %7274 = vst [vmem:[%s8936_s26 + $0x160] sm:$0xff] %v2460_v49 }
 0x35c   : > { %7275 = vst [vmem:[%s8936_s26 + $0x168] sm:$0xff] %v2525_v50 }
 0x35f   : > { %7365 = vmatmul.msk.f32.gmra.mxu2 %vm2147_vm10, %v9705_v34  ;;  %7381 = vmatmul.msk.f32.gmra.mxu3 %vm2147_vm10, %v9705_v34  ;;  %v2693_v51 = vpop.f32.mrf.mxu0  ;;  %v2758_v52 = vpop.f32.mrf.mxu1 }
 0x360   : > { %7340 = vst [vmem:[%s8936_s26 + $0x270] sm:$0xff] %v2693_v51 }
 0x361   : > { %7341 = vst [vmem:[%s8936_s26 + $0x278] sm:$0xff] %v2758_v52 }
 0x362   : > { %v2463_v53 = vpop.f32.mrf.mxu2  ;;  %v2528_v55 = vpop.f32.mrf.mxu3  ;;  %7429 = vmatmul.msk.f32.gmra.mxu0 %vm2147_vm10, %v9705_v34  ;;  %7445 = vmatmul.msk.f32.gmra.mxu1 %vm2147_vm10, %v9705_v34 }
 0x363   : > { %7276 = vst [vmem:[%s8936_s26 + $0x170] sm:$0xff] %v2463_v53 }
 0x364   : > { %7277 = vst [vmem:[%s8936_s26 + $0x178] sm:$0xff] %v2528_v55 }
 0x367   : > { %7366 = vmatmul.msk.f32.gmra.mxu2 %vm2147_vm10, %v9600_v12  ;;  %7382 = vmatmul.msk.f32.gmra.mxu3 %vm2147_vm10, %v9600_v12  ;;  %v2696_v56 = vpop.f32.mrf.mxu0  ;;  %v2761_v57 = vpop.f32.mrf.mxu1 }
 0x368   : > { %7342 = vst [vmem:[%s8936_s26 + $0x280] sm:$0xff] %v2696_v56 }
 0x369   : > { %7343 = vst [vmem:[%s8936_s26 + $0x288] sm:$0xff] %v2761_v57 }
 0x36a   : > { %v2466_v58 = vpop.f32.mrf.mxu2  ;;  %v2531_v59 = vpop.f32.mrf.mxu3  ;;  %7430 = vmatmul.msk.f32.gmra.mxu0 %vm2147_vm10, %v9600_v12  ;;  %7446 = vmatmul.msk.f32.gmra.mxu1 %vm2147_vm10, %v9600_v12 }
 0x36b   : > { %7278 = vst [vmem:[%s8936_s26 + $0x180] sm:$0xff] %v2466_v58 }
 0x36c   : > { %7279 = vst [vmem:[%s8936_s26 + $0x188] sm:$0xff] %v2531_v59 }
 0x36f   : > { %7367 = vmatmul.msk.f32.gmra.mxu2 %vm2147_vm10, %v9614_v19  ;;  %7383 = vmatmul.msk.f32.gmra.mxu3 %vm2147_vm10, %v9614_v19  ;;  %v2699_v60 = vpop.f32.mrf.mxu0  ;;  %v2764_v61 = vpop.f32.mrf.mxu1 }
 0x370   : > { %7344 = vst [vmem:[%s8936_s26 + $0x290] sm:$0xff] %v2699_v60  ;;  %v10152_v60 = vld [vmem:[%s8934_s6 + $0x38] sm:$0xff] }
 0x371   : > { %7345 = vst [vmem:[%s8936_s26 + $0x298] sm:$0xff] %v2764_v61 }
 0x372   : > { %v2469_v62 = vpop.f32.mrf.mxu2  ;;  %v2534_v63 = vpop.f32.mrf.mxu3  ;;  %7431 = vmatmul.msk.f32.gmra.mxu0 %vm2147_vm10, %v9614_v19  ;;  %7447 = vmatmul.msk.f32.gmra.mxu1 %vm2147_vm10, %v9614_v19 }
 0x373   : > { %7280 = vst [vmem:[%s8936_s26 + $0x190] sm:$0xff] %v2469_v62 }
 0x374   : > { %7281 = vst [vmem:[%s8936_s26 + $0x198] sm:$0xff] %v2534_v63 }
 0x377   : > { %7368 = vmatmul.msk.f32.gmra.mxu2 %vm2147_vm10, %v9628_v21  ;;  %7384 = vmatmul.msk.f32.gmra.mxu3 %vm2147_vm10, %v9628_v21  ;;  %v2702_v12 = vpop.f32.mrf.mxu0  ;;  %v2767_v0 = vpop.f32.mrf.mxu1 }
 0x378   : > { %7346 = vst [vmem:[%s8936_s26 + $0x2a0] sm:$0xff] %v2702_v12 }
 0x379   : > { %7347 = vst [vmem:[%s8936_s26 + $0x2a8] sm:$0xff] %v2767_v0 }
 0x37a   : > { %v2472_v1 = vpop.f32.mrf.mxu2  ;;  %v2537_v2 = vpop.f32.mrf.mxu3  ;;  %7432 = vmatmul.msk.f32.gmra.mxu0 %vm2147_vm10, %v9628_v21  ;;  %7448 = vmatmul.msk.f32.gmra.mxu1 %vm2147_vm10, %v9628_v21 }
 0x37b   : > { %7282 = vst [vmem:[%s8936_s26 + $0x1a0] sm:$0xff] %v2472_v1  ;;  %v10178_v1 = vld [vmem:[%s8934_s6 + $0x48] sm:$0xff] }
 0x37c   : > { %7283 = vst [vmem:[%s8936_s26 + $0x1a8] sm:$0xff] %v2537_v2 }
 0x37f   : > { %7369 = vmatmul.msk.f32.gmra.mxu2 %vm2147_vm10, %v9642_v23  ;;  %7385 = vmatmul.msk.f32.gmra.mxu3 %vm2147_vm10, %v9642_v23  ;;  %v2705_v19 = vpop.f32.mrf.mxu0  ;;  %v2770_v3 = vpop.f32.mrf.mxu1 }
 0x380   : > { %7348 = vst [vmem:[%s8936_s26 + $0x2b0] sm:$0xff] %v2705_v19 }
 0x381   : > { %7349 = vst [vmem:[%s8936_s26 + $0x2b8] sm:$0xff] %v2770_v3 }
 0x382   : > { %v2475_v4 = vpop.f32.mrf.mxu2  ;;  %v2540_v5 = vpop.f32.mrf.mxu3  ;;  %7433 = vmatmul.msk.f32.gmra.mxu0 %vm2147_vm10, %v9642_v23  ;;  %7449 = vmatmul.msk.f32.gmra.mxu1 %vm2147_vm10, %v9642_v23 }
 0x383   : > { %7284 = vst [vmem:[%s8936_s26 + $0x1b0] sm:$0xff] %v2475_v4 }
 0x384   : > { %7285 = vst [vmem:[%s8936_s26 + $0x1b8] sm:$0xff] %v2540_v5  ;;  %v10193_v5 = vld [vmem:[%s8934_s6 + $0x50] sm:$0xff] }
 0x387   : > { %7370 = vmatmul.msk.f32.gmra.mxu2 %vm2147_vm10, %v9656_v25  ;;  %7386 = vmatmul.msk.f32.gmra.mxu3 %vm2147_vm10, %v9656_v25  ;;  %v2708_v21 = vpop.f32.mrf.mxu0  ;;  %v2773_v6 = vpop.f32.mrf.mxu1 }
 0x388   : > { %7350 = vst [vmem:[%s8936_s26 + $0x2c0] sm:$0xff] %v2708_v21 }
 0x389   : > { %7351 = vst [vmem:[%s8936_s26 + $0x2c8] sm:$0xff] %v2773_v6 }
 0x38a   : > { %v2478_v23 = vpop.f32.mrf.mxu2  ;;  %v2543_v9 = vpop.f32.mrf.mxu3  ;;  %7434 = vmatmul.msk.f32.gmra.mxu0 %vm2147_vm10, %v9656_v25  ;;  %7450 = vmatmul.msk.f32.gmra.mxu1 %vm2147_vm10, %v9656_v25 }
 0x38b   : > { %7286 = vst [vmem:[%s8936_s26 + $0x1c0] sm:$0xff] %v2478_v23  ;;  %v10208_v23 = vld [vmem:[%s8934_s6 + $0x58] sm:$0xff] }
 0x38c   : > { %7287 = vst [vmem:[%s8936_s26 + $0x1c8] sm:$0xff] %v2543_v9 }
 0x38f   : > { %7371 = vmatmul.msk.f32.gmra.mxu2 %vm2147_vm10, %v9670_v31  ;;  %7387 = vmatmul.msk.f32.gmra.mxu3 %vm2147_vm10, %v9670_v31  ;;  %v2711_v13 = vpop.f32.mrf.mxu0  ;;  %v2776_v14 = vpop.f32.mrf.mxu1 }
 0x390   : > { %7352 = vst [vmem:[%s8936_s26 + $0x2d0] sm:$0xff] %v2711_v13 }
 0x391   : > { %7353 = vst [vmem:[%s8936_s26 + $0x2d8] sm:$0xff] %v2776_v14  ;;  %v10223_v14 = vld [vmem:[%s8934_s6 + $0x60] sm:$0xff] }
 0x392   : > { %v2481_v25 = vpop.f32.mrf.mxu2  ;;  %v2546_v15 = vpop.f32.mrf.mxu3  ;;  %7435 = vmatmul.msk.f32.gmra.mxu0 %vm2147_vm10, %v9670_v31  ;;  %7451 = vmatmul.msk.f32.gmra.mxu1 %vm2147_vm10, %v9670_v31 }
 0x393   : > { %7288 = vst [vmem:[%s8936_s26 + $0x1d0] sm:$0xff] %v2481_v25 }
 0x394   : > { %7289 = vst [vmem:[%s8936_s26 + $0x1d8] sm:$0xff] %v2546_v15 }
 0x397   : > { %7372 = vmatmul.msk.f32.gmra.mxu2 %vm2147_vm10, %v9684_v33  ;;  %7388 = vmatmul.msk.f32.gmra.mxu3 %vm2147_vm10, %v9684_v33  ;;  %v2714_v18 = vpop.f32.mrf.mxu0  ;;  %v2779_v27 = vpop.f32.mrf.mxu1 }
 0x398   : > { %7354 = vst [vmem:[%s8936_s26 + $0x2e0] sm:$0xff] %v2714_v18  ;;  %v4215_v18 = vld [vmem:[#allocation2 + $0x90] sm:$0xff] }
 0x399   : > { %7355 = vst [vmem:[%s8936_s26 + $0x2e8] sm:$0xff] %v2779_v27  ;;  %v4216_v27 = vld [vmem:[#allocation2 + $0x98] sm:$0xff] }
 0x39a   : > { %v2484_v28 = vpop.f32.mrf.mxu2  ;;  %v2549_v29 = vpop.f32.mrf.mxu3  ;;  %7436 = vmatmul.msk.f32.gmra.mxu0 %vm2147_vm10, %v9684_v33  ;;  %7452 = vmatmul.msk.f32.gmra.mxu1 %vm2147_vm10, %v9684_v33 }
 0x39b   : > { %7290 = vst [vmem:[%s8936_s26 + $0x1e0] sm:$0xff] %v2484_v28 }
 0x39c   : > { %7291 = vst [vmem:[%s8936_s26 + $0x1e8] sm:$0xff] %v2549_v29 }
 0x39f   : > { %7373 = vmatmul.msk.f32.gmra.mxu2 %vm2147_vm10, %v9698_v16  ;;  %7389 = vmatmul.msk.f32.gmra.mxu3 %vm2147_vm10, %v9698_v16  ;;  %v2717_v31 = vpop.f32.mrf.mxu0  ;;  %v2782_v30 = vpop.f32.mrf.mxu1 }
 0x3a0   : > { %7356 = vst [vmem:[%s8936_s26 + $0x2f0] sm:$0xff] %v2717_v31  ;;  %v10238_v31 = vld [vmem:[%s8934_s6 + $0x68] sm:$0xff] }
 0x3a1   : > { %7357 = vst [vmem:[%s8936_s26 + $0x2f8] sm:$0xff] %v2782_v30  ;;  %v4445_v30 = vld [vmem:[#allocation2 + $0xa0] sm:$0xff] }
 0x3a2   : > { %v2487_v35 = vpop.f32.mrf.mxu2  ;;  %v2552_v36 = vpop.f32.mrf.mxu3  ;;  %7437 = vmatmul.msk.f32.gmra.mxu0 %vm2147_vm10, %v9698_v16  ;;  %7453 = vmatmul.msk.f32.gmra.mxu1 %vm2147_vm10, %v9698_v16 }
 0x3a3   : > { %7292 = vst [vmem:[%s8936_s26 + $0x1f0] sm:$0xff] %v2487_v35  ;;  %v4446_v35 = vld [vmem:[#allocation2 + $0xa8] sm:$0xff] }
 0x3a4   : > { %7293 = vst [vmem:[%s8936_s26 + $0x1f8] sm:$0xff] %v2552_v36 }
 0x3a7   : > { %7486 = vmatmul.msk.f32.vlgmr.msrb.gmra.mxu2 %vm2147_vm10, %v9607_v54  ;;  %7502 = vmatmul.msk.f32.vlgmr.msrb.gmra.mxu3 %vm2147_vm10, %v9607_v54  ;;  %v3132_v33 = vpop.f32.mrf.mxu0  ;;  %v3197_v37 = vpop.f32.mrf.mxu1 }
 0x3a8   : > { %7454 = vst [vmem:[%s8936_s26 + $0x400] sm:$0xff] %v3132_v33  ;;  %4280 = vmatpush.msrb.mxu2 %v4215_v18  ;;  %4345 = vmatpush.msrb.mxu3 %v4216_v27 }
 0x3a9   : > { %7455 = vst [vmem:[%s8936_s26 + $0x408] sm:$0xff] %v3197_v37 }
 0x3aa   : > { %v2902_v38 = vpop.f32.mrf.mxu2  ;;  %v2967_v39 = vpop.f32.mrf.mxu3  ;;  %7550 = vmatmul.msk.f32.vlgmr.msrb.gmra.mxu0 %vm2147_vm10, %v9607_v54  ;;  %7566 = vmatmul.msk.f32.vlgmr.msrb.gmra.mxu1 %vm2147_vm10, %v9607_v54 }
 0x3ab   : > { %7390 = vst [vmem:[%s8936_s26 + $0x300] sm:$0xff] %v2902_v38  ;;  %4510 = vmatpush.msrb.mxu0 %v4445_v30  ;;  %4575 = vmatpush.msrb.mxu1 %v4446_v35 }
 0x3ac   : > { %7391 = vst [vmem:[%s8936_s26 + $0x308] sm:$0xff] %v2967_v39  ;;  %v10253_v39 = vld [vmem:[%s8934_s6 + $0x70] sm:$0xff] }
 0x3af   : > { %7487 = vmatmul.msk.f32.gmra.mxu2 %vm2147_vm10, %v9621_v20  ;;  %7503 = vmatmul.msk.f32.gmra.mxu3 %vm2147_vm10, %v9621_v20  ;;  %v3135_v16 = vpop.f32.mrf.mxu0  ;;  %v3200_v40 = vpop.f32.mrf.mxu1 }
 0x3b0   : > { %7456 = vst [vmem:[%s8936_s26 + $0x410] sm:$0xff] %v3135_v16 }
 0x3b1   : > { %7457 = vst [vmem:[%s8936_s26 + $0x418] sm:$0xff] %v3200_v40 }
 0x3b2   : > { %v2905_v41 = vpop.f32.mrf.mxu2  ;;  %v2970_v42 = vpop.f32.mrf.mxu3  ;;  %7551 = vmatmul.msk.f32.gmra.mxu0 %vm2147_vm10, %v9621_v20  ;;  %7567 = vmatmul.msk.f32.gmra.mxu1 %vm2147_vm10, %v9621_v20 }
 0x3b3   : > { %7392 = vst [vmem:[%s8936_s26 + $0x310] sm:$0xff] %v2905_v41 }
 0x3b4   : > { %7393 = vst [vmem:[%s8936_s26 + $0x318] sm:$0xff] %v2970_v42 }
 0x3b7   : > { %7488 = vmatmul.msk.f32.gmra.mxu2 %vm2147_vm10, %v9635_v22  ;;  %7504 = vmatmul.msk.f32.gmra.mxu3 %vm2147_vm10, %v9635_v22  ;;  %v3138_v54 = vpop.f32.mrf.mxu0  ;;  %v3203_v43 = vpop.f32.mrf.mxu1 }
 0x3b8   : > { %7458 = vst [vmem:[%s8936_s26 + $0x420] sm:$0xff] %v3138_v54  ;;  %v10268_v54 = vld [vmem:[%s8934_s6 + $0x78] sm:$0xff] }
 0x3b9   : > { %7459 = vst [vmem:[%s8936_s26 + $0x428] sm:$0xff] %v3203_v43 }
 0x3ba   : > { %v2908_v44 = vpop.f32.mrf.mxu2  ;;  %v2973_v45 = vpop.f32.mrf.mxu3  ;;  %7552 = vmatmul.msk.f32.gmra.mxu0 %vm2147_vm10, %v9635_v22  ;;  %7568 = vmatmul.msk.f32.gmra.mxu1 %vm2147_vm10, %v9635_v22 }
 0x3bb   : > { %7394 = vst [vmem:[%s8936_s26 + $0x320] sm:$0xff] %v2908_v44 }
 0x3bc   : > { %7395 = vst [vmem:[%s8936_s26 + $0x328] sm:$0xff] %v2973_v45 }
 0x3bf   : > { %7489 = vmatmul.msk.f32.gmra.mxu2 %vm2147_vm10, %v9649_v24  ;;  %7505 = vmatmul.msk.f32.gmra.mxu3 %vm2147_vm10, %v9649_v24  ;;  %v3141_v20 = vpop.f32.mrf.mxu0  ;;  %v3206_v46 = vpop.f32.mrf.mxu1 }
 0x3c0   : > { %7460 = vst [vmem:[%s8936_s26 + $0x430] sm:$0xff] %v3141_v20 }
 0x3c1   : > { %7461 = vst [vmem:[%s8936_s26 + $0x438] sm:$0xff] %v3206_v46  ;;  %v10283_v46 = vld [vmem:[%s8934_s6] sm:$0xff] }
 0x3c2   : > { %v2911_v47 = vpop.f32.mrf.mxu2  ;;  %v2976_v48 = vpop.f32.mrf.mxu3  ;;  %7553 = vmatmul.msk.f32.gmra.mxu0 %vm2147_vm10, %v9649_v24  ;;  %7569 = vmatmul.msk.f32.gmra.mxu1 %vm2147_vm10, %v9649_v24 }
 0x3c3   : > { %7396 = vst [vmem:[%s8936_s26 + $0x330] sm:$0xff] %v2911_v47 }
 0x3c4   : > { %7397 = vst [vmem:[%s8936_s26 + $0x338] sm:$0xff] %v2976_v48 }
 0x3c7   : > { %7490 = vmatmul.msk.f32.gmra.mxu2 %vm2147_vm10, %v9663_v26  ;;  %7506 = vmatmul.msk.f32.gmra.mxu3 %vm2147_vm10, %v9663_v26  ;;  %v3144_v22 = vpop.f32.mrf.mxu0  ;;  %v3209_v49 = vpop.f32.mrf.mxu1 }
 0x3c8   : > { %7462 = vst [vmem:[%s8936_s26 + $0x440] sm:$0xff] %v3144_v22 }
 0x3c9   : > { %7463 = vst [vmem:[%s8936_s26 + $0x448] sm:$0xff] %v3209_v49 }
 0x3ca   : > { %v2914_v50 = vpop.f32.mrf.mxu2  ;;  %v2979_v51 = vpop.f32.mrf.mxu3  ;;  %7554 = vmatmul.msk.f32.gmra.mxu0 %vm2147_vm10, %v9663_v26  ;;  %7570 = vmatmul.msk.f32.gmra.mxu1 %vm2147_vm10, %v9663_v26 }
 0x3cb   : > { %7398 = vst [vmem:[%s8936_s26 + $0x340] sm:$0xff] %v2914_v50  ;;  %v10298_v50 = vld [vmem:[%s8934_s6 + $0x8] sm:$0xff] }
 0x3cc   : > { %7399 = vst [vmem:[%s8936_s26 + $0x348] sm:$0xff] %v2979_v51 }
 0x3cf   : > { %7491 = vmatmul.msk.f32.gmra.mxu2 %vm2147_vm10, %v9677_v32  ;;  %7507 = vmatmul.msk.f32.gmra.mxu3 %vm2147_vm10, %v9677_v32  ;;  %v3147_v24 = vpop.f32.mrf.mxu0  ;;  %v3212_v52 = vpop.f32.mrf.mxu1 }
 0x3d0   : > { %7464 = vst [vmem:[%s8936_s26 + $0x450] sm:$0xff] %v3147_v24 }
 0x3d1   : > { %7465 = vst [vmem:[%s8936_s26 + $0x458] sm:$0xff] %v3212_v52 }
 0x3d2   : > { %v2917_v53 = vpop.f32.mrf.mxu2  ;;  %v2982_v55 = vpop.f32.mrf.mxu3  ;;  %7555 = vmatmul.msk.f32.gmra.mxu0 %vm2147_vm10, %v9677_v32  ;;  %7571 = vmatmul.msk.f32.gmra.mxu1 %vm2147_vm10, %v9677_v32 }
 0x3d3   : > { %7400 = vst [vmem:[%s8936_s26 + $0x350] sm:$0xff] %v2917_v53 }
 0x3d4   : > { %7401 = vst [vmem:[%s8936_s26 + $0x358] sm:$0xff] %v2982_v55  ;;  %v10313_v55 = vld [vmem:[%s8934_s6 + $0x10] sm:$0xff] }
 0x3d7   : > { %7492 = vmatmul.msk.f32.gmra.mxu2 %vm2147_vm10, %v9691_v17  ;;  %7508 = vmatmul.msk.f32.gmra.mxu3 %vm2147_vm10, %v9691_v17  ;;  %v3150_v26 = vpop.f32.mrf.mxu0  ;;  %v3215_v56 = vpop.f32.mrf.mxu1 }
 0x3d8   : > { %7466 = vst [vmem:[%s8936_s26 + $0x460] sm:$0xff] %v3150_v26 }
 0x3d9   : > { %7467 = vst [vmem:[%s8936_s26 + $0x468] sm:$0xff] %v3215_v56 }
 0x3da   : > { %v2920_v57 = vpop.f32.mrf.mxu2  ;;  %v2985_v58 = vpop.f32.mrf.mxu3  ;;  %7556 = vmatmul.msk.f32.gmra.mxu0 %vm2147_vm10, %v9691_v17  ;;  %7572 = vmatmul.msk.f32.gmra.mxu1 %vm2147_vm10, %v9691_v17  ;;  %v10163_v17 = vld [vmem:[%s8934_s6 + $0x40] sm:$0xff] }
 0x3db   : > { %7402 = vst [vmem:[%s8936_s26 + $0x360] sm:$0xff] %v2920_v57 }
 0x3dc   : > { %7403 = vst [vmem:[%s8936_s26 + $0x368] sm:$0xff] %v2985_v58 }
 0x3df   : > { %7493 = vmatmul.msk.f32.gmra.mxu2 %vm2147_vm10, %v9705_v34  ;;  %7509 = vmatmul.msk.f32.gmra.mxu3 %vm2147_vm10, %v9705_v34  ;;  %v3153_v32 = vpop.f32.mrf.mxu0  ;;  %v3218_v59 = vpop.f32.mrf.mxu1 }
 0x3e0   : > { %7468 = vst [vmem:[%s8936_s26 + $0x470] sm:$0xff] %v3153_v32  ;;  %v10328_v32 = vld [vmem:[%s8934_s6 + $0x18] sm:$0xff] }
 0x3e1   : > { %7469 = vst [vmem:[%s8936_s26 + $0x478] sm:$0xff] %v3218_v59 }
 0x3e2   : > { %v2923_v61 = vpop.f32.mrf.mxu2  ;;  %v2988_v62 = vpop.f32.mrf.mxu3  ;;  %7557 = vmatmul.msk.f32.gmra.mxu0 %vm2147_vm10, %v10152_v60  ;;  %7573 = vmatmul.msk.f32.gmra.mxu1 %vm2147_vm10, %v10152_v60 }
 0x3e3   : > { %7404 = vst [vmem:[%s8936_s26 + $0x370] sm:$0xff] %v2923_v61 }
 0x3e4   : > { %7405 = vst [vmem:[%s8936_s26 + $0x378] sm:$0xff] %v2988_v62 }
 0x3e7   : > { %7494 = vmatmul.msk.f32.gmra.mxu2 %vm2147_vm10, %v10163_v17  ;;  %7510 = vmatmul.msk.f32.gmra.mxu3 %vm2147_vm10, %v10163_v17  ;;  %v3156_v34 = vpop.f32.mrf.mxu0  ;;  %v3221_v63 = vpop.f32.mrf.mxu1 }
 0x3e8   : > { %7470 = vst [vmem:[%s8936_s26 + $0x480] sm:$0xff] %v3156_v34 }
 0x3e9   : > { %7471 = vst [vmem:[%s8936_s26 + $0x488] sm:$0xff] %v3221_v63  ;;  %v10343_v63 = vld [vmem:[%s8934_s6 + $0x20] sm:$0xff] }
 0x3ea   : > { %v2926_v12 = vpop.f32.mrf.mxu2  ;;  %v2991_v0 = vpop.f32.mrf.mxu3  ;;  %7558 = vmatmul.msk.f32.gmra.mxu0 %vm2147_vm10, %v10163_v17  ;;  %7574 = vmatmul.msk.f32.gmra.mxu1 %vm2147_vm10, %v10163_v17 }
 0x3eb   : > { %7406 = vst [vmem:[%s8936_s26 + $0x380] sm:$0xff] %v2926_v12 }
 0x3ec   : > { %7407 = vst [vmem:[%s8936_s26 + $0x388] sm:$0xff] %v2991_v0 }
 0x3ef   : > { %7495 = vmatmul.msk.f32.gmra.mxu2 %vm2147_vm10, %v10178_v1  ;;  %7511 = vmatmul.msk.f32.gmra.mxu3 %vm2147_vm10, %v10178_v1  ;;  %v3159_v2 = vpop.f32.mrf.mxu0  ;;  %v3224_v19 = vpop.f32.mrf.mxu1 }
 0x3f0   : > { %7472 = vst [vmem:[%s8936_s26 + $0x490] sm:$0xff] %v3159_v2 }
 0x3f1   : > { %7473 = vst [vmem:[%s8936_s26 + $0x498] sm:$0xff] %v3224_v19 }
 0x3f2   : > { %v2929_v3 = vpop.f32.mrf.mxu2  ;;  %v2994_v4 = vpop.f32.mrf.mxu3  ;;  %7559 = vmatmul.msk.f32.gmra.mxu0 %vm2147_vm10, %v10178_v1  ;;  %7575 = vmatmul.msk.f32.gmra.mxu1 %vm2147_vm10, %v10178_v1 }
 0x3f3   : > { %7408 = vst [vmem:[%s8936_s26 + $0x390] sm:$0xff] %v2929_v3  ;;  %v10358_v3 = vld [vmem:[%s8934_s6 + $0x28] sm:$0xff] }
 0x3f4   : > { %7409 = vst [vmem:[%s8936_s26 + $0x398] sm:$0xff] %v2994_v4 }
 0x3f7   : > { %7496 = vmatmul.msk.f32.gmra.mxu2 %vm2147_vm10, %v10193_v5  ;;  %7512 = vmatmul.msk.f32.gmra.mxu3 %vm2147_vm10, %v10193_v5  ;;  %v3162_v21 = vpop.f32.mrf.mxu0  ;;  %v3227_v6 = vpop.f32.mrf.mxu1 }
 0x3f8   : > { %7474 = vst [vmem:[%s8936_s26 + $0x4a0] sm:$0xff] %v3162_v21 }
 0x3f9   : > { %7475 = vst [vmem:[%s8936_s26 + $0x4a8] sm:$0xff] %v3227_v6 }
 0x3fa   : > { %v2932_v7 = vpop.f32.mrf.mxu2  ;;  %v2997_v8 = vpop.f32.mrf.mxu3  ;;  %7560 = vmatmul.msk.f32.gmra.mxu0 %vm2147_vm10, %v10193_v5  ;;  %7576 = vmatmul.msk.f32.gmra.mxu1 %vm2147_vm10, %v10193_v5 }
 0x3fb   : > { %7410 = vst [vmem:[%s8936_s26 + $0x3a0] sm:$0xff] %v2932_v7 }
 0x3fc   : > { %7411 = vst [vmem:[%s8936_s26 + $0x3a8] sm:$0xff] %v2997_v8  ;;  %v10373_v8 = vld [vmem:[%s8934_s6 + $0x30] sm:$0xff] }
 0x3ff   : > { %7497 = vmatmul.msk.f32.gmra.mxu2 %vm2147_vm10, %v10208_v23  ;;  %7513 = vmatmul.msk.f32.gmra.mxu3 %vm2147_vm10, %v10208_v23  ;;  %v3165_v9 = vpop.f32.mrf.mxu0  ;;  %v3230_v10 = vpop.f32.mrf.mxu1 }
 0x400   : > { %7476 = vst [vmem:[%s8936_s26 + $0x4b0] sm:$0xff] %v3165_v9 }
 0x401   : > { %7477 = vst [vmem:[%s8936_s26 + $0x4b8] sm:$0xff] %v3230_v10 }
 0x402   : > { %v2935_v11 = vpop.f32.mrf.mxu2  ;;  %v3000_v13 = vpop.f32.mrf.mxu3  ;;  %7561 = vmatmul.msk.f32.gmra.mxu0 %vm2147_vm10, %v10208_v23  ;;  %7577 = vmatmul.msk.f32.gmra.mxu1 %vm2147_vm10, %v10208_v23 }
 0x403   : > { %7412 = vst [vmem:[%s8936_s26 + $0x3b0] sm:$0xff] %v2935_v11 }
 0x404   : > { %7413 = vst [vmem:[%s8936_s26 + $0x3b8] sm:$0xff] %v3000_v13 }
 0x407   : > { %7498 = vmatmul.msk.f32.gmra.mxu2 %vm2147_vm10, %v10223_v14  ;;  %7514 = vmatmul.msk.f32.gmra.mxu3 %vm2147_vm10, %v10223_v14  ;;  %v3168_v25 = vpop.f32.mrf.mxu0  ;;  %v3233_v15 = vpop.f32.mrf.mxu1 }
 0x408   : > { %7478 = vst [vmem:[%s8936_s26 + $0x4c0] sm:$0xff] %v3168_v25 }
 0x409   : > { %7479 = vst [vmem:[%s8936_s26 + $0x4c8] sm:$0xff] %v3233_v15 }
 0x40a   : > { %v2938_v28 = vpop.f32.mrf.mxu2  ;;  %v3003_v29 = vpop.f32.mrf.mxu3  ;;  %7562 = vmatmul.msk.f32.gmra.mxu0 %vm2147_vm10, %v10223_v14  ;;  %7578 = vmatmul.msk.f32.gmra.mxu1 %vm2147_vm10, %v10223_v14 }
 0x40b   : > { %7414 = vst [vmem:[%s8936_s26 + $0x3c0] sm:$0xff] %v2938_v28 }
 0x40c   : > { %7415 = vst [vmem:[%s8936_s26 + $0x3c8] sm:$0xff] %v3003_v29 }
 0x40f   : > { %7499 = vmatmul.msk.f32.gmra.mxu2 %vm2147_vm10, %v10238_v31  ;;  %7515 = vmatmul.msk.f32.gmra.mxu3 %vm2147_vm10, %v10238_v31  ;;  %v3171_v36 = vpop.f32.mrf.mxu0  ;;  %v3236_v33 = vpop.f32.mrf.mxu1 }
 0x410   : > { %7480 = vst [vmem:[%s8936_s26 + $0x4d0] sm:$0xff] %v3171_v36 }
 0x411   : > { %7481 = vst [vmem:[%s8936_s26 + $0x4d8] sm:$0xff] %v3236_v33 }
 0x412   : > { %v2941_v37 = vpop.f32.mrf.mxu2  ;;  %v3006_v38 = vpop.f32.mrf.mxu3  ;;  %7563 = vmatmul.msk.f32.gmra.mxu0 %vm2147_vm10, %v10238_v31  ;;  %7579 = vmatmul.msk.f32.gmra.mxu1 %vm2147_vm10, %v10238_v31 }
 0x413   : > { %7416 = vst [vmem:[%s8936_s26 + $0x3d0] sm:$0xff] %v2941_v37 }
 0x414   : > { %7417 = vst [vmem:[%s8936_s26 + $0x3d8] sm:$0xff] %v3006_v38 }
 0x417   : > { %7500 = vmatmul.msk.f32.gmra.mxu2 %vm2147_vm10, %v10253_v39  ;;  %7516 = vmatmul.msk.f32.gmra.mxu3 %vm2147_vm10, %v10253_v39  ;;  %v3174_v16 = vpop.f32.mrf.mxu0  ;;  %v3239_v40 = vpop.f32.mrf.mxu1 }
 0x418   : > { %7482 = vst [vmem:[%s8936_s26 + $0x4e0] sm:$0xff] %v3174_v16 }
 0x419   : > { %7483 = vst [vmem:[%s8936_s26 + $0x4e8] sm:$0xff] %v3239_v40 }
 0x41a   : > { %v2944_v41 = vpop.f32.mrf.mxu2  ;;  %v3009_v42 = vpop.f32.mrf.mxu3  ;;  %7564 = vmatmul.msk.f32.gmra.mxu0 %vm2147_vm10, %v10253_v39  ;;  %7580 = vmatmul.msk.f32.gmra.mxu1 %vm2147_vm10, %v10253_v39 }
 0x41b   : > { %7418 = vst [vmem:[%s8936_s26 + $0x3e0] sm:$0xff] %v2944_v41 }
 0x41c   : > { %7419 = vst [vmem:[%s8936_s26 + $0x3e8] sm:$0xff] %v3009_v42 }
 0x41f   : > { %7501 = vmatmul.msk.f32.gmra.mxu2 %vm2147_vm10, %v10268_v54  ;;  %7517 = vmatmul.msk.f32.gmra.mxu3 %vm2147_vm10, %v10268_v54  ;;  %v3177_v43 = vpop.f32.mrf.mxu0  ;;  %v3242_v44 = vpop.f32.mrf.mxu1 }
 0x420   : > { %7484 = vst [vmem:[%s8936_s26 + $0x4f0] sm:$0xff] %v3177_v43 }
 0x421   : > { %7485 = vst [vmem:[%s8936_s26 + $0x4f8] sm:$0xff] %v3242_v44 }
 0x422   : > { %v2947_v45 = vpop.f32.mrf.mxu2  ;;  %v3012_v20 = vpop.f32.mrf.mxu3  ;;  %7565 = vmatmul.msk.f32.gmra.mxu0 %vm2147_vm10, %v10268_v54  ;;  %7581 = vmatmul.msk.f32.gmra.mxu1 %vm2147_vm10, %v10268_v54 }
 0x423   : > { %7420 = vst [vmem:[%s8936_s26 + $0x3f0] sm:$0xff] %v2947_v45 }
 0x424   : > { %7421 = vst [vmem:[%s8936_s26 + $0x3f8] sm:$0xff] %v3012_v20 }
 0x427   : > { %7614 = vmatmul.msk.f32.vlgmr.msra.gmra.mxu2 %vm2147_vm10, %v10283_v46  ;;  %7630 = vmatmul.msk.f32.vlgmr.msra.gmra.mxu3 %vm2147_vm10, %v10283_v46  ;;  %v3592_v47 = vpop.f32.mrf.mxu0  ;;  %v3657_v48 = vpop.f32.mrf.mxu1 }
 0x428   : > { %7582 = vst [vmem:[%s8936_s26 + $0x600] sm:$0xff] %v3592_v47 }
 0x429   : > { %7583 = vst [vmem:[%s8936_s26 + $0x608] sm:$0xff] %v3657_v48 }
 0x42a   : > { %v3362_v22 = vpop.f32.mrf.mxu2  ;;  %v3427_v49 = vpop.f32.mrf.mxu3  ;;  %7678 = vmatmul.msk.f32.vlgmr.msra.gmra.mxu0 %vm2147_vm10, %v10283_v46  ;;  %7694 = vmatmul.msk.f32.vlgmr.msra.gmra.mxu1 %vm2147_vm10, %v10283_v46 }
 0x42b   : > { %7518 = vst [vmem:[%s8936_s26 + $0x500] sm:$0xff] %v3362_v22  ;;  %v4675_v22 = vld [vmem:[#allocation2 + $0xb0] sm:$0xff] }
 0x42c   : > { %7519 = vst [vmem:[%s8936_s26 + $0x508] sm:$0xff] %v3427_v49  ;;  %v4676_v49 = vld [vmem:[#allocation2 + $0xb8] sm:$0xff]  ;;  %4740 = vmatpush.msra.mxu2 %v4675_v22 }
 0x42d   : > { %4805 = vmatpush.msra.mxu3 %v4676_v49 }
 0x42f   : > { %7615 = vmatmul.msk.f32.gmra.mxu2 %vm2147_vm10, %v10298_v50  ;;  %7631 = vmatmul.msk.f32.gmra.mxu3 %vm2147_vm10, %v10298_v50  ;;  %v3595_v51 = vpop.f32.mrf.mxu0  ;;  %v3660_v24 = vpop.f32.mrf.mxu1 }
 0x430   : > { %7584 = vst [vmem:[%s8936_s26 + $0x610] sm:$0xff] %v3595_v51 }
 0x431   : > { %7585 = vst [vmem:[%s8936_s26 + $0x618] sm:$0xff] %v3660_v24 }
 0x432   : > { %v3365_v52 = vpop.f32.mrf.mxu2  ;;  %v3430_v53 = vpop.f32.mrf.mxu3  ;;  %7679 = vmatmul.msk.f32.gmra.mxu0 %vm2147_vm10, %v10298_v50  ;;  %7695 = vmatmul.msk.f32.gmra.mxu1 %vm2147_vm10, %v10298_v50 }
 0x433   : > { %7520 = vst [vmem:[%s8936_s26 + $0x510] sm:$0xff] %v3365_v52  ;;  %v4905_v52 = vld [vmem:[#allocation2 + $0xc0] sm:$0xff] }
 0x434   : > { %7521 = vst [vmem:[%s8936_s26 + $0x518] sm:$0xff] %v3430_v53  ;;  %v4906_v53 = vld [vmem:[#allocation2 + $0xc8] sm:$0xff]  ;;  %4970 = vmatpush.msra.mxu0 %v4905_v52 }
 0x435   : > { %5035 = vmatpush.msra.mxu1 %v4906_v53 }
 0x437   : > { %7616 = vmatmul.msk.f32.gmra.mxu2 %vm2147_vm10, %v10313_v55  ;;  %7632 = vmatmul.msk.f32.gmra.mxu3 %vm2147_vm10, %v10313_v55  ;;  %v3598_v26 = vpop.f32.mrf.mxu0  ;;  %v3663_v56 = vpop.f32.mrf.mxu1 }
 0x438   : > { %7586 = vst [vmem:[%s8936_s26 + $0x620] sm:$0xff] %v3598_v26 }
 0x439   : > { %7587 = vst [vmem:[%s8936_s26 + $0x628] sm:$0xff] %v3663_v56 }
 0x43a   : > { %v3368_v57 = vpop.f32.mrf.mxu2  ;;  %v3433_v58 = vpop.f32.mrf.mxu3  ;;  %7680 = vmatmul.msk.f32.gmra.mxu0 %vm2147_vm10, %v10313_v55  ;;  %7696 = vmatmul.msk.f32.gmra.mxu1 %vm2147_vm10, %v10313_v55 }
 0x43b   : > { %7522 = vst [vmem:[%s8936_s26 + $0x520] sm:$0xff] %v3368_v57 }
 0x43c   : > { %7523 = vst [vmem:[%s8936_s26 + $0x528] sm:$0xff] %v3433_v58 }
 0x43f   : > { %7617 = vmatmul.msk.f32.gmra.mxu2 %vm2147_vm10, %v10328_v32  ;;  %7633 = vmatmul.msk.f32.gmra.mxu3 %vm2147_vm10, %v10328_v32  ;;  %v3601_v59 = vpop.f32.mrf.mxu0  ;;  %v3666_v61 = vpop.f32.mrf.mxu1 }
 0x440   : > { %7588 = vst [vmem:[%s8936_s26 + $0x630] sm:$0xff] %v3601_v59 }
 0x441   : > { %7589 = vst [vmem:[%s8936_s26 + $0x638] sm:$0xff] %v3666_v61 }
 0x442   : > { %v3371_v62 = vpop.f32.mrf.mxu2  ;;  %v3436_v34 = vpop.f32.mrf.mxu3  ;;  %7681 = vmatmul.msk.f32.gmra.mxu0 %vm2147_vm10, %v10328_v32  ;;  %7697 = vmatmul.msk.f32.gmra.mxu1 %vm2147_vm10, %v10328_v32 }
 0x443   : > { %7524 = vst [vmem:[%s8936_s26 + $0x530] sm:$0xff] %v3371_v62 }
 0x444   : > { %7525 = vst [vmem:[%s8936_s26 + $0x538] sm:$0xff] %v3436_v34 }
 0x447   : > { %7618 = vmatmul.msk.f32.gmra.mxu2 %vm2147_vm10, %v10343_v63  ;;  %7634 = vmatmul.msk.f32.gmra.mxu3 %vm2147_vm10, %v10343_v63  ;;  %v3604_v12 = vpop.f32.mrf.mxu0  ;;  %v3669_v0 = vpop.f32.mrf.mxu1 }
 0x448   : > { %7590 = vst [vmem:[%s8936_s26 + $0x640] sm:$0xff] %v3604_v12 }
 0x449   : > { %7591 = vst [vmem:[%s8936_s26 + $0x648] sm:$0xff] %v3669_v0 }
 0x44a   : > { %v3374_v2 = vpop.f32.mrf.mxu2  ;;  %v3439_v19 = vpop.f32.mrf.mxu3  ;;  %7682 = vmatmul.msk.f32.gmra.mxu0 %vm2147_vm10, %v10343_v63  ;;  %7698 = vmatmul.msk.f32.gmra.mxu1 %vm2147_vm10, %v10343_v63 }
 0x44b   : > { %7526 = vst [vmem:[%s8936_s26 + $0x540] sm:$0xff] %v3374_v2 }
 0x44c   : > { %7527 = vst [vmem:[%s8936_s26 + $0x548] sm:$0xff] %v3439_v19 }
 0x44f   : > { %7619 = vmatmul.msk.f32.gmra.mxu2 %vm2147_vm10, %v10358_v3  ;;  %7635 = vmatmul.msk.f32.gmra.mxu3 %vm2147_vm10, %v10358_v3  ;;  %v3607_v4 = vpop.f32.mrf.mxu0  ;;  %v3672_v21 = vpop.f32.mrf.mxu1 }
 0x450   : > { %7592 = vst [vmem:[%s8936_s26 + $0x650] sm:$0xff] %v3607_v4 }
 0x451   : > { %7593 = vst [vmem:[%s8936_s26 + $0x658] sm:$0xff] %v3672_v21 }
 0x452   : > { %v3377_v6 = vpop.f32.mrf.mxu2  ;;  %v3442_v7 = vpop.f32.mrf.mxu3  ;;  %7683 = vmatmul.msk.f32.gmra.mxu0 %vm2147_vm10, %v10358_v3  ;;  %7699 = vmatmul.msk.f32.gmra.mxu1 %vm2147_vm10, %v10358_v3 }
 0x453   : > { %7528 = vst [vmem:[%s8936_s26 + $0x550] sm:$0xff] %v3377_v6 }
 0x454   : > { %7529 = vst [vmem:[%s8936_s26 + $0x558] sm:$0xff] %v3442_v7 }
 0x457   : > { %7620 = vmatmul.msk.f32.gmra.mxu2 %vm2147_vm10, %v10373_v8  ;;  %7636 = vmatmul.msk.f32.gmra.mxu3 %vm2147_vm10, %v10373_v8  ;;  %v3610_v9 = vpop.f32.mrf.mxu0  ;;  %v3675_v10 = vpop.f32.mrf.mxu1 }
 0x458   : > { %7594 = vst [vmem:[%s8936_s26 + $0x660] sm:$0xff] %v3610_v9 }
 0x459   : > { %7595 = vst [vmem:[%s8936_s26 + $0x668] sm:$0xff] %v3675_v10 }
 0x45a   : > { %v3380_v11 = vpop.f32.mrf.mxu2  ;;  %v3445_v13 = vpop.f32.mrf.mxu3  ;;  %7684 = vmatmul.msk.f32.gmra.mxu0 %vm2147_vm10, %v10373_v8  ;;  %7700 = vmatmul.msk.f32.gmra.mxu1 %vm2147_vm10, %v10373_v8 }
 0x45b   : > { %7530 = vst [vmem:[%s8936_s26 + $0x560] sm:$0xff] %v3380_v11 }
 0x45c   : > { %7531 = vst [vmem:[%s8936_s26 + $0x568] sm:$0xff] %v3445_v13 }
 0x45f   : > { %7621 = vmatmul.msk.f32.gmra.mxu2 %vm2147_vm10, %v10152_v60  ;;  %7637 = vmatmul.msk.f32.gmra.mxu3 %vm2147_vm10, %v10152_v60  ;;  %v3613_v25 = vpop.f32.mrf.mxu0  ;;  %v3678_v15 = vpop.f32.mrf.mxu1 }
 0x460   : > { %7596 = vst [vmem:[%s8936_s26 + $0x670] sm:$0xff] %v3613_v25 }
 0x461   : > { %7597 = vst [vmem:[%s8936_s26 + $0x678] sm:$0xff] %v3678_v15 }
 0x462   : > { %v3383_v18 = vpop.f32.mrf.mxu2  ;;  %v3448_v27 = vpop.f32.mrf.mxu3  ;;  %7685 = vmatmul.msk.f32.gmra.mxu0 %vm2147_vm10, %v10152_v60  ;;  %7701 = vmatmul.msk.f32.gmra.mxu1 %vm2147_vm10, %v10152_v60 }
 0x463   : > { %7532 = vst [vmem:[%s8936_s26 + $0x570] sm:$0xff] %v3383_v18 }
 0x464   : > { %7533 = vst [vmem:[%s8936_s26 + $0x578] sm:$0xff] %v3448_v27 }
 0x467   : > { %7622 = vmatmul.msk.f32.gmra.mxu2 %vm2147_vm10, %v10163_v17  ;;  %7638 = vmatmul.msk.f32.gmra.mxu3 %vm2147_vm10, %v10163_v17  ;;  %v3616_v28 = vpop.f32.mrf.mxu0  ;;  %v3681_v29 = vpop.f32.mrf.mxu1 }
 0x468   : > { %7598 = vst [vmem:[%s8936_s26 + $0x680] sm:$0xff] %v3616_v28 }
 0x469   : > { %7599 = vst [vmem:[%s8936_s26 + $0x688] sm:$0xff] %v3681_v29 }
 0x46a   : > { %v3386_v30 = vpop.f32.mrf.mxu2  ;;  %v3451_v35 = vpop.f32.mrf.mxu3  ;;  %7686 = vmatmul.msk.f32.gmra.mxu0 %vm2147_vm10, %v10163_v17  ;;  %7702 = vmatmul.msk.f32.gmra.mxu1 %vm2147_vm10, %v10163_v17 }
 0x46b   : > { %7534 = vst [vmem:[%s8936_s26 + $0x580] sm:$0xff] %v3386_v30 }
 0x46c   : > { %7535 = vst [vmem:[%s8936_s26 + $0x588] sm:$0xff] %v3451_v35 }
 0x46f   : > { %7623 = vmatmul.msk.f32.gmra.mxu2 %vm2147_vm10, %v10178_v1  ;;  %7639 = vmatmul.msk.f32.gmra.mxu3 %vm2147_vm10, %v10178_v1  ;;  %v3619_v36 = vpop.f32.mrf.mxu0  ;;  %v3684_v33 = vpop.f32.mrf.mxu1 }
 0x470   : > { %7600 = vst [vmem:[%s8936_s26 + $0x690] sm:$0xff] %v3619_v36 }
 0x471   : > { %7601 = vst [vmem:[%s8936_s26 + $0x698] sm:$0xff] %v3684_v33 }
 0x472   : > { %v3389_v37 = vpop.f32.mrf.mxu2  ;;  %v3454_v38 = vpop.f32.mrf.mxu3  ;;  %7687 = vmatmul.msk.f32.gmra.mxu0 %vm2147_vm10, %v10178_v1  ;;  %7703 = vmatmul.msk.f32.gmra.mxu1 %vm2147_vm10, %v10178_v1 }
 0x473   : > { %7536 = vst [vmem:[%s8936_s26 + $0x590] sm:$0xff] %v3389_v37 }
 0x474   : > { %7537 = vst [vmem:[%s8936_s26 + $0x598] sm:$0xff] %v3454_v38 }
 0x477   : > { %7624 = vmatmul.msk.f32.gmra.mxu2 %vm2147_vm10, %v10193_v5  ;;  %7640 = vmatmul.msk.f32.gmra.mxu3 %vm2147_vm10, %v10193_v5  ;;  %v3622_v16 = vpop.f32.mrf.mxu0  ;;  %v3687_v40 = vpop.f32.mrf.mxu1 }
 0x478   : > { %7602 = vst [vmem:[%s8936_s26 + $0x6a0] sm:$0xff] %v3622_v16 }
 0x479   : > { %7603 = vst [vmem:[%s8936_s26 + $0x6a8] sm:$0xff] %v3687_v40 }
 0x47a   : > { %v3392_v41 = vpop.f32.mrf.mxu2  ;;  %v3457_v42 = vpop.f32.mrf.mxu3  ;;  %7688 = vmatmul.msk.f32.gmra.mxu0 %vm2147_vm10, %v10193_v5  ;;  %7704 = vmatmul.msk.f32.gmra.mxu1 %vm2147_vm10, %v10193_v5 }
 0x47b   : > { %7538 = vst [vmem:[%s8936_s26 + $0x5a0] sm:$0xff] %v3392_v41 }
 0x47c   : > { %7539 = vst [vmem:[%s8936_s26 + $0x5a8] sm:$0xff] %v3457_v42 }
 0x47f   : > { %7625 = vmatmul.msk.f32.gmra.mxu2 %vm2147_vm10, %v10208_v23  ;;  %7641 = vmatmul.msk.f32.gmra.mxu3 %vm2147_vm10, %v10208_v23  ;;  %v3625_v43 = vpop.f32.mrf.mxu0  ;;  %v3690_v44 = vpop.f32.mrf.mxu1 }
 0x480   : > { %7604 = vst [vmem:[%s8936_s26 + $0x6b0] sm:$0xff] %v3625_v43 }
 0x481   : > { %7605 = vst [vmem:[%s8936_s26 + $0x6b8] sm:$0xff] %v3690_v44 }
 0x482   : > { %v3395_v45 = vpop.f32.mrf.mxu2  ;;  %v3460_v20 = vpop.f32.mrf.mxu3  ;;  %7689 = vmatmul.msk.f32.gmra.mxu0 %vm2147_vm10, %v10208_v23  ;;  %7705 = vmatmul.msk.f32.gmra.mxu1 %vm2147_vm10, %v10208_v23 }
 0x483   : > { %7540 = vst [vmem:[%s8936_s26 + $0x5b0] sm:$0xff] %v3395_v45 }
 0x484   : > { %7541 = vst [vmem:[%s8936_s26 + $0x5b8] sm:$0xff] %v3460_v20 }
 0x487   : > { %7626 = vmatmul.msk.f32.gmra.mxu2 %vm2147_vm10, %v10223_v14  ;;  %7642 = vmatmul.msk.f32.gmra.mxu3 %vm2147_vm10, %v10223_v14  ;;  %v3628_v47 = vpop.f32.mrf.mxu0  ;;  %v3693_v48 = vpop.f32.mrf.mxu1 }
 0x488   : > { %7606 = vst [vmem:[%s8936_s26 + $0x6c0] sm:$0xff] %v3628_v47 }
 0x489   : > { %7607 = vst [vmem:[%s8936_s26 + $0x6c8] sm:$0xff] %v3693_v48 }
 0x48a   : > { %v3398_v51 = vpop.f32.mrf.mxu2  ;;  %v3463_v24 = vpop.f32.mrf.mxu3  ;;  %7690 = vmatmul.msk.f32.gmra.mxu0 %vm2147_vm10, %v10223_v14  ;;  %7706 = vmatmul.msk.f32.gmra.mxu1 %vm2147_vm10, %v10223_v14 }
 0x48b   : > { %7542 = vst [vmem:[%s8936_s26 + $0x5c0] sm:$0xff] %v3398_v51 }
 0x48c   : > { %7543 = vst [vmem:[%s8936_s26 + $0x5c8] sm:$0xff] %v3463_v24 }
 0x48f   : > { %7627 = vmatmul.msk.f32.gmra.mxu2 %vm2147_vm10, %v10238_v31  ;;  %7643 = vmatmul.msk.f32.gmra.mxu3 %vm2147_vm10, %v10238_v31  ;;  %v3631_v26 = vpop.f32.mrf.mxu0  ;;  %v3696_v56 = vpop.f32.mrf.mxu1 }
 0x490   : > { %7608 = vst [vmem:[%s8936_s26 + $0x6d0] sm:$0xff] %v3631_v26 }
 0x491   : > { %7609 = vst [vmem:[%s8936_s26 + $0x6d8] sm:$0xff] %v3696_v56 }
 0x492   : > { %v3401_v57 = vpop.f32.mrf.mxu2  ;;  %v3466_v58 = vpop.f32.mrf.mxu3  ;;  %7691 = vmatmul.msk.f32.gmra.mxu0 %vm2147_vm10, %v10238_v31  ;;  %7707 = vmatmul.msk.f32.gmra.mxu1 %vm2147_vm10, %v10238_v31 }
 0x493   : > { %7544 = vst [vmem:[%s8936_s26 + $0x5d0] sm:$0xff] %v3401_v57 }
 0x494   : > { %7545 = vst [vmem:[%s8936_s26 + $0x5d8] sm:$0xff] %v3466_v58 }
 0x497   : > { %7628 = vmatmul.msk.f32.gmra.mxu2 %vm2147_vm10, %v10253_v39  ;;  %7644 = vmatmul.msk.f32.gmra.mxu3 %vm2147_vm10, %v10253_v39  ;;  %v3634_v59 = vpop.f32.mrf.mxu0  ;;  %v3699_v61 = vpop.f32.mrf.mxu1 }
 0x498   : > { %7610 = vst [vmem:[%s8936_s26 + $0x6e0] sm:$0xff] %v3634_v59 }
 0x499   : > { %7611 = vst [vmem:[%s8936_s26 + $0x6e8] sm:$0xff] %v3699_v61 }
 0x49a   : > { %v3404_v62 = vpop.f32.mrf.mxu2  ;;  %v3469_v34 = vpop.f32.mrf.mxu3  ;;  %7692 = vmatmul.msk.f32.gmra.mxu0 %vm2147_vm10, %v10253_v39  ;;  %7708 = vmatmul.msk.f32.gmra.mxu1 %vm2147_vm10, %v10253_v39 }
 0x49b   : > { %7546 = vst [vmem:[%s8936_s26 + $0x5e0] sm:$0xff] %v3404_v62 }
 0x49c   : > { %7547 = vst [vmem:[%s8936_s26 + $0x5e8] sm:$0xff] %v3469_v34 }
 0x49f   : > { %7629 = vmatmul.msk.f32.gmra.mxu2 %vm2147_vm10, %v10268_v54  ;;  %7645 = vmatmul.msk.f32.gmra.mxu3 %vm2147_vm10, %v10268_v54  ;;  %v3637_v12 = vpop.f32.mrf.mxu0  ;;  %v3702_v0 = vpop.f32.mrf.mxu1 }
 0x4a0   : > { %7612 = vst [vmem:[%s8936_s26 + $0x6f0] sm:$0xff] %v3637_v12 }
 0x4a1   : > { %7613 = vst [vmem:[%s8936_s26 + $0x6f8] sm:$0xff] %v3702_v0 }
 0x4a2   : > { %v3407_v2 = vpop.f32.mrf.mxu2  ;;  %v3472_v19 = vpop.f32.mrf.mxu3  ;;  %7693 = vmatmul.msk.f32.gmra.mxu0 %vm2147_vm10, %v10268_v54  ;;  %7709 = vmatmul.msk.f32.gmra.mxu1 %vm2147_vm10, %v10268_v54 }
 0x4a3   : > { %7548 = vst [vmem:[%s8936_s26 + $0x5f0] sm:$0xff] %v3407_v2  ;;  %v5135_v2 = vld [vmem:[#allocation2 + $0xd0] sm:$0xff] }
 0x4a4   : > { %7549 = vst [vmem:[%s8936_s26 + $0x5f8] sm:$0xff] %v3472_v19  ;;  %v5136_v19 = vld [vmem:[#allocation2 + $0xd8] sm:$0xff] }
 0x4a7   : > { %7742 = vmatmul.msk.f32.vlgmr.msrb.gmra.mxu2 %vm2147_vm10, %v10283_v46  ;;  %7758 = vmatmul.msk.f32.vlgmr.msrb.gmra.mxu3 %vm2147_vm10, %v10283_v46  ;;  %v4052_v4 = vpop.f32.mrf.mxu0  ;;  %v4117_v21 = vpop.f32.mrf.mxu1 }
 0x4a8   : > { %7710 = vst [vmem:[%s8936_s26 + $0x800] sm:$0xff] %v4052_v4  ;;  %5200 = vmatpush.msrb.mxu2 %v5135_v2  ;;  %5265 = vmatpush.msrb.mxu3 %v5136_v19 }
 0x4a9   : > { %7711 = vst [vmem:[%s8936_s26 + $0x808] sm:$0xff] %v4117_v21  ;;  %v5365_v21 = vld [vmem:[#allocation2 + $0xe0] sm:$0xff] }
 0x4aa   : > { %v3822_v6 = vpop.f32.mrf.mxu2  ;;  %v3887_v7 = vpop.f32.mrf.mxu3  ;;  %7806 = vmatmul.msk.f32.vlgmr.msrb.gmra.mxu0 %vm2147_vm10, %v10283_v46  ;;  %7822 = vmatmul.msk.f32.vlgmr.msrb.gmra.mxu1 %vm2147_vm10, %v10283_v46 }
 0x4ab   : > { %7646 = vst [vmem:[%s8936_s26 + $0x700] sm:$0xff] %v3822_v6  ;;  %v5366_v6 = vld [vmem:[#allocation2 + $0xe8] sm:$0xff]  ;;  %5430 = vmatpush.msrb.mxu0 %v5365_v21 }
 0x4ac   : > { %7647 = vst [vmem:[%s8936_s26 + $0x708] sm:$0xff] %v3887_v7  ;;  %5495 = vmatpush.msrb.mxu1 %v5366_v6 }
 0x4af   : > { %7743 = vmatmul.msk.f32.gmra.mxu2 %vm2147_vm10, %v10298_v50  ;;  %7759 = vmatmul.msk.f32.gmra.mxu3 %vm2147_vm10, %v10298_v50  ;;  %v4055_v9 = vpop.f32.mrf.mxu0  ;;  %v4120_v10 = vpop.f32.mrf.mxu1 }
 0x4b0   : > { %7712 = vst [vmem:[%s8936_s26 + $0x810] sm:$0xff] %v4055_v9 }
 0x4b1   : > { %7713 = vst [vmem:[%s8936_s26 + $0x818] sm:$0xff] %v4120_v10 }
 0x4b2   : > { %v3825_v11 = vpop.f32.mrf.mxu2  ;;  %v3890_v13 = vpop.f32.mrf.mxu3  ;;  %7807 = vmatmul.msk.f32.gmra.mxu0 %vm2147_vm10, %v10298_v50  ;;  %7823 = vmatmul.msk.f32.gmra.mxu1 %vm2147_vm10, %v10298_v50 }
 0x4b3   : > { %7648 = vst [vmem:[%s8936_s26 + $0x710] sm:$0xff] %v3825_v11 }
 0x4b4   : > { %7649 = vst [vmem:[%s8936_s26 + $0x718] sm:$0xff] %v3890_v13 }
 0x4b7   : > { %7744 = vmatmul.msk.f32.gmra.mxu2 %vm2147_vm10, %v10313_v55  ;;  %7760 = vmatmul.msk.f32.gmra.mxu3 %vm2147_vm10, %v10313_v55  ;;  %v4058_v25 = vpop.f32.mrf.mxu0  ;;  %v4123_v15 = vpop.f32.mrf.mxu1 }
 0x4b8   : > { %7714 = vst [vmem:[%s8936_s26 + $0x820] sm:$0xff] %v4058_v25 }
 0x4b9   : > { %7715 = vst [vmem:[%s8936_s26 + $0x828] sm:$0xff] %v4123_v15 }
 0x4ba   : > { %v3828_v18 = vpop.f32.mrf.mxu2  ;;  %v3893_v27 = vpop.f32.mrf.mxu3  ;;  %7808 = vmatmul.msk.f32.gmra.mxu0 %vm2147_vm10, %v10313_v55  ;;  %7824 = vmatmul.msk.f32.gmra.mxu1 %vm2147_vm10, %v10313_v55 }
 0x4bb   : > { %7650 = vst [vmem:[%s8936_s26 + $0x720] sm:$0xff] %v3828_v18 }
 0x4bc   : > { %7651 = vst [vmem:[%s8936_s26 + $0x728] sm:$0xff] %v3893_v27 }
 0x4bf   : > { %7745 = vmatmul.msk.f32.gmra.mxu2 %vm2147_vm10, %v10328_v32  ;;  %7761 = vmatmul.msk.f32.gmra.mxu3 %vm2147_vm10, %v10328_v32  ;;  %v4061_v28 = vpop.f32.mrf.mxu0  ;;  %v4126_v29 = vpop.f32.mrf.mxu1 }
 0x4c0   : > { %7716 = vst [vmem:[%s8936_s26 + $0x830] sm:$0xff] %v4061_v28 }
 0x4c1   : > { %7717 = vst [vmem:[%s8936_s26 + $0x838] sm:$0xff] %v4126_v29 }
 0x4c2   : > { %v3831_v30 = vpop.f32.mrf.mxu2  ;;  %v3896_v35 = vpop.f32.mrf.mxu3  ;;  %7809 = vmatmul.msk.f32.gmra.mxu0 %vm2147_vm10, %v10328_v32  ;;  %7825 = vmatmul.msk.f32.gmra.mxu1 %vm2147_vm10, %v10328_v32 }
 0x4c3   : > { %7652 = vst [vmem:[%s8936_s26 + $0x730] sm:$0xff] %v3831_v30 }
 0x4c4   : > { %7653 = vst [vmem:[%s8936_s26 + $0x738] sm:$0xff] %v3896_v35 }
 0x4c7   : > { %7746 = vmatmul.msk.f32.gmra.mxu2 %vm2147_vm10, %v10343_v63  ;;  %7762 = vmatmul.msk.f32.gmra.mxu3 %vm2147_vm10, %v10343_v63  ;;  %v4064_v36 = vpop.f32.mrf.mxu0  ;;  %v4129_v33 = vpop.f32.mrf.mxu1 }
 0x4c8   : > { %7718 = vst [vmem:[%s8936_s26 + $0x840] sm:$0xff] %v4064_v36 }
 0x4c9   : > { %7719 = vst [vmem:[%s8936_s26 + $0x848] sm:$0xff] %v4129_v33 }
 0x4ca   : > { %v3834_v37 = vpop.f32.mrf.mxu2  ;;  %v3899_v38 = vpop.f32.mrf.mxu3  ;;  %7810 = vmatmul.msk.f32.gmra.mxu0 %vm2147_vm10, %v10343_v63  ;;  %7826 = vmatmul.msk.f32.gmra.mxu1 %vm2147_vm10, %v10343_v63 }
 0x4cb   : > { %7654 = vst [vmem:[%s8936_s26 + $0x740] sm:$0xff] %v3834_v37 }
 0x4cc   : > { %7655 = vst [vmem:[%s8936_s26 + $0x748] sm:$0xff] %v3899_v38 }
 0x4cf   : > { %7747 = vmatmul.msk.f32.gmra.mxu2 %vm2147_vm10, %v10358_v3  ;;  %7763 = vmatmul.msk.f32.gmra.mxu3 %vm2147_vm10, %v10358_v3  ;;  %v4067_v16 = vpop.f32.mrf.mxu0  ;;  %v4132_v40 = vpop.f32.mrf.mxu1 }
 0x4d0   : > { %7720 = vst [vmem:[%s8936_s26 + $0x850] sm:$0xff] %v4067_v16 }
 0x4d1   : > { %7721 = vst [vmem:[%s8936_s26 + $0x858] sm:$0xff] %v4132_v40 }
 0x4d2   : > { %v3837_v41 = vpop.f32.mrf.mxu2  ;;  %v3902_v42 = vpop.f32.mrf.mxu3  ;;  %7811 = vmatmul.msk.f32.gmra.mxu0 %vm2147_vm10, %v10358_v3  ;;  %7827 = vmatmul.msk.f32.gmra.mxu1 %vm2147_vm10, %v10358_v3 }
 0x4d3   : > { %7656 = vst [vmem:[%s8936_s26 + $0x750] sm:$0xff] %v3837_v41 }
 0x4d4   : > { %7657 = vst [vmem:[%s8936_s26 + $0x758] sm:$0xff] %v3902_v42 }
 0x4d7   : > { %7748 = vmatmul.msk.f32.gmra.mxu2 %vm2147_vm10, %v10373_v8  ;;  %7764 = vmatmul.msk.f32.gmra.mxu3 %vm2147_vm10, %v10373_v8  ;;  %v4070_v43 = vpop.f32.mrf.mxu0  ;;  %v4135_v44 = vpop.f32.mrf.mxu1 }
 0x4d8   : > { %7722 = vst [vmem:[%s8936_s26 + $0x860] sm:$0xff] %v4070_v43 }
 0x4d9   : > { %7723 = vst [vmem:[%s8936_s26 + $0x868] sm:$0xff] %v4135_v44 }
 0x4da   : > { %v3840_v45 = vpop.f32.mrf.mxu2  ;;  %v3905_v20 = vpop.f32.mrf.mxu3  ;;  %7812 = vmatmul.msk.f32.gmra.mxu0 %vm2147_vm10, %v10373_v8  ;;  %7828 = vmatmul.msk.f32.gmra.mxu1 %vm2147_vm10, %v10373_v8 }
 0x4db   : > { %7658 = vst [vmem:[%s8936_s26 + $0x760] sm:$0xff] %v3840_v45 }
 0x4dc   : > { %7659 = vst [vmem:[%s8936_s26 + $0x768] sm:$0xff] %v3905_v20 }
 0x4df   : > { %7749 = vmatmul.msk.f32.gmra.mxu2 %vm2147_vm10, %v10152_v60  ;;  %7765 = vmatmul.msk.f32.gmra.mxu3 %vm2147_vm10, %v10152_v60  ;;  %v4073_v47 = vpop.f32.mrf.mxu0  ;;  %v4138_v48 = vpop.f32.mrf.mxu1 }
 0x4e0   : > { %7724 = vst [vmem:[%s8936_s26 + $0x870] sm:$0xff] %v4073_v47 }
 0x4e1   : > { %7725 = vst [vmem:[%s8936_s26 + $0x878] sm:$0xff] %v4138_v48 }
 0x4e2   : > { %v3843_v22 = vpop.f32.mrf.mxu2  ;;  %v3908_v49 = vpop.f32.mrf.mxu3  ;;  %7813 = vmatmul.msk.f32.gmra.mxu0 %vm2147_vm10, %v10152_v60  ;;  %7829 = vmatmul.msk.f32.gmra.mxu1 %vm2147_vm10, %v10152_v60 }
 0x4e3   : > { %7660 = vst [vmem:[%s8936_s26 + $0x770] sm:$0xff] %v3843_v22 }
 0x4e4   : > { %7661 = vst [vmem:[%s8936_s26 + $0x778] sm:$0xff] %v3908_v49 }
 0x4e7   : > { %7750 = vmatmul.msk.f32.gmra.mxu2 %vm2147_vm10, %v10163_v17  ;;  %7766 = vmatmul.msk.f32.gmra.mxu3 %vm2147_vm10, %v10163_v17  ;;  %v4076_v51 = vpop.f32.mrf.mxu0  ;;  %v4141_v24 = vpop.f32.mrf.mxu1 }
 0x4e8   : > { %7726 = vst [vmem:[%s8936_s26 + $0x880] sm:$0xff] %v4076_v51 }
 0x4e9   : > { %7727 = vst [vmem:[%s8936_s26 + $0x888] sm:$0xff] %v4141_v24 }
 0x4ea   : > { %v3846_v52 = vpop.f32.mrf.mxu2  ;;  %v3911_v53 = vpop.f32.mrf.mxu3  ;;  %7814 = vmatmul.msk.f32.gmra.mxu0 %vm2147_vm10, %v10163_v17  ;;  %7830 = vmatmul.msk.f32.gmra.mxu1 %vm2147_vm10, %v10163_v17 }
 0x4eb   : > { %7662 = vst [vmem:[%s8936_s26 + $0x780] sm:$0xff] %v3846_v52 }
 0x4ec   : > { %7663 = vst [vmem:[%s8936_s26 + $0x788] sm:$0xff] %v3911_v53 }
 0x4ef   : > { %7751 = vmatmul.msk.f32.gmra.mxu2 %vm2147_vm10, %v10178_v1  ;;  %7767 = vmatmul.msk.f32.gmra.mxu3 %vm2147_vm10, %v10178_v1  ;;  %v4079_v60 = vpop.f32.mrf.mxu0  ;;  %v4144_v26 = vpop.f32.mrf.mxu1 }
 0x4f0   : > { %7728 = vst [vmem:[%s8936_s26 + $0x890] sm:$0xff] %v4079_v60 }
 0x4f1   : > { %7729 = vst [vmem:[%s8936_s26 + $0x898] sm:$0xff] %v4144_v26 }
 0x4f2   : > { %v3849_v56 = vpop.f32.mrf.mxu2  ;;  %v3914_v57 = vpop.f32.mrf.mxu3  ;;  %7815 = vmatmul.msk.f32.gmra.mxu0 %vm2147_vm10, %v10178_v1  ;;  %7831 = vmatmul.msk.f32.gmra.mxu1 %vm2147_vm10, %v10178_v1 }
 0x4f3   : > { %7664 = vst [vmem:[%s8936_s26 + $0x790] sm:$0xff] %v3849_v56 }
 0x4f4   : > { %7665 = vst [vmem:[%s8936_s26 + $0x798] sm:$0xff] %v3914_v57 }
 0x4f7   : > { %7752 = vmatmul.msk.f32.gmra.mxu2 %vm2147_vm10, %v10193_v5  ;;  %7768 = vmatmul.msk.f32.gmra.mxu3 %vm2147_vm10, %v10193_v5  ;;  %v4082_v17 = vpop.f32.mrf.mxu0  ;;  %v4147_v58 = vpop.f32.mrf.mxu1 }
 0x4f8   : > { %7730 = vst [vmem:[%s8936_s26 + $0x8a0] sm:$0xff] %v4082_v17 }
 0x4f9   : > { %7731 = vst [vmem:[%s8936_s26 + $0x8a8] sm:$0xff] %v4147_v58 }
 0x4fa   : > { %v3852_v59 = vpop.f32.mrf.mxu2  ;;  %v3917_v61 = vpop.f32.mrf.mxu3  ;;  %7816 = vmatmul.msk.f32.gmra.mxu0 %vm2147_vm10, %v10193_v5  ;;  %7832 = vmatmul.msk.f32.gmra.mxu1 %vm2147_vm10, %v10193_v5 }
 0x4fb   : > { %7666 = vst [vmem:[%s8936_s26 + $0x7a0] sm:$0xff] %v3852_v59  ;;  %v10802_v59 = vld [vmem:[%s8934_s6 + $0x48] sm:$0xff] }
 0x4fc   : > { %7667 = vst [vmem:[%s8936_s26 + $0x7a8] sm:$0xff] %v3917_v61 }
 0x4ff   : > { %7753 = vmatmul.msk.f32.gmra.mxu2 %vm2147_vm10, %v10208_v23  ;;  %7769 = vmatmul.msk.f32.gmra.mxu3 %vm2147_vm10, %v10208_v23  ;;  %v4085_v1 = vpop.f32.mrf.mxu0  ;;  %v4150_v62 = vpop.f32.mrf.mxu1 }
 0x500   : > { %7732 = vst [vmem:[%s8936_s26 + $0x8b0] sm:$0xff] %v4085_v1 }
 0x501   : > { %7733 = vst [vmem:[%s8936_s26 + $0x8b8] sm:$0xff] %v4150_v62 }
 0x502   : > { %v3855_v34 = vpop.f32.mrf.mxu2  ;;  %v3920_v12 = vpop.f32.mrf.mxu3  ;;  %7817 = vmatmul.msk.f32.gmra.mxu0 %vm2147_vm10, %v10208_v23  ;;  %7833 = vmatmul.msk.f32.gmra.mxu1 %vm2147_vm10, %v10208_v23 }
 0x503   : > { %7668 = vst [vmem:[%s8936_s26 + $0x7b0] sm:$0xff] %v3855_v34 }
 0x504   : > { %7669 = vst [vmem:[%s8936_s26 + $0x7b8] sm:$0xff] %v3920_v12  ;;  %v10817_v12 = vld [vmem:[%s8934_s6 + $0x50] sm:$0xff] }
 0x507   : > { %7754 = vmatmul.msk.f32.gmra.mxu2 %vm2147_vm10, %v10223_v14  ;;  %7770 = vmatmul.msk.f32.gmra.mxu3 %vm2147_vm10, %v10223_v14  ;;  %v4088_v5 = vpop.f32.mrf.mxu0  ;;  %v4153_v0 = vpop.f32.mrf.mxu1 }
 0x508   : > { %7734 = vst [vmem:[%s8936_s26 + $0x8c0] sm:$0xff] %v4088_v5 }
 0x509   : > { %7735 = vst [vmem:[%s8936_s26 + $0x8c8] sm:$0xff] %v4153_v0 }
 0x50a   : > { %v3858_v23 = vpop.f32.mrf.mxu2  ;;  %v3923_v4 = vpop.f32.mrf.mxu3  ;;  %7818 = vmatmul.msk.f32.gmra.mxu0 %vm2147_vm10, %v10223_v14  ;;  %7834 = vmatmul.msk.f32.gmra.mxu1 %vm2147_vm10, %v10223_v14 }
 0x50b   : > { %7670 = vst [vmem:[%s8936_s26 + $0x7c0] sm:$0xff] %v3858_v23  ;;  %v10832_v23 = vld [vmem:[%s8934_s6 + $0x58] sm:$0xff] }
 0x50c   : > { %7671 = vst [vmem:[%s8936_s26 + $0x7c8] sm:$0xff] %v3923_v4 }
 0x50f   : > { %7755 = vmatmul.msk.f32.gmra.mxu2 %vm2147_vm10, %v10238_v31  ;;  %7771 = vmatmul.msk.f32.gmra.mxu3 %vm2147_vm10, %v10238_v31  ;;  %v4091_v7 = vpop.f32.mrf.mxu0  ;;  %v4156_v9 = vpop.f32.mrf.mxu1 }
 0x510   : > { %7736 = vst [vmem:[%s8936_s26 + $0x8d0] sm:$0xff] %v4091_v7 }
 0x511   : > { %7737 = vst [vmem:[%s8936_s26 + $0x8d8] sm:$0xff] %v4156_v9  ;;  %v10847_v9 = vld [vmem:[%s8934_s6 + $0x60] sm:$0xff] }
 0x512   : > { %v3861_v14 = vpop.f32.mrf.mxu2  ;;  %v3926_v10 = vpop.f32.mrf.mxu3  ;;  %7819 = vmatmul.msk.f32.gmra.mxu0 %vm2147_vm10, %v10238_v31  ;;  %7835 = vmatmul.msk.f32.gmra.mxu1 %vm2147_vm10, %v10238_v31 }
 0x513   : > { %7672 = vst [vmem:[%s8936_s26 + $0x7d0] sm:$0xff] %v3861_v14 }
 0x514   : > { %7673 = vst [vmem:[%s8936_s26 + $0x7d8] sm:$0xff] %v3926_v10 }
 0x517   : > { %7756 = vmatmul.msk.f32.gmra.mxu2 %vm2147_vm10, %v10253_v39  ;;  %7772 = vmatmul.msk.f32.gmra.mxu3 %vm2147_vm10, %v10253_v39  ;;  %v4094_v11 = vpop.f32.mrf.mxu0  ;;  %v4159_v13 = vpop.f32.mrf.mxu1 }
 0x518   : > { %7738 = vst [vmem:[%s8936_s26 + $0x8e0] sm:$0xff] %v4094_v11  ;;  %v5595_v11 = vld [vmem:[#allocation2 + $0xf0] sm:$0xff] }
 0x519   : > { %7739 = vst [vmem:[%s8936_s26 + $0x8e8] sm:$0xff] %v4159_v13  ;;  %v5596_v13 = vld [vmem:[#allocation2 + $0xf8] sm:$0xff] }
 0x51a   : > { %v3864_v25 = vpop.f32.mrf.mxu2  ;;  %v3929_v15 = vpop.f32.mrf.mxu3  ;;  %7820 = vmatmul.msk.f32.gmra.mxu0 %vm2147_vm10, %v10253_v39  ;;  %7836 = vmatmul.msk.f32.gmra.mxu1 %vm2147_vm10, %v10253_v39 }
 0x51b   : > { %7674 = vst [vmem:[%s8936_s26 + $0x7e0] sm:$0xff] %v3864_v25 }
 0x51c   : > { %7675 = vst [vmem:[%s8936_s26 + $0x7e8] sm:$0xff] %v3929_v15 }
 0x51f   : > { %7757 = vmatmul.msk.f32.gmra.mxu2 %vm2147_vm10, %v10268_v54  ;;  %7773 = vmatmul.msk.f32.gmra.mxu3 %vm2147_vm10, %v10268_v54  ;;  %v4097_v31 = vpop.f32.mrf.mxu0  ;;  %v4162_v18 = vpop.f32.mrf.mxu1 }
 0x520   : > { %7740 = vst [vmem:[%s8936_s26 + $0x8f0] sm:$0xff] %v4097_v31  ;;  %v10862_v31 = vld [vmem:[%s8934_s6 + $0x68] sm:$0xff] }
 0x521   : > { %7741 = vst [vmem:[%s8936_s26 + $0x8f8] sm:$0xff] %v4162_v18  ;;  %v5825_v18 = vld [vmem:[#allocation2 + $0x100] sm:$0xff] }
 0x522   : > { %v3867_v27 = vpop.f32.mrf.mxu2  ;;  %v3932_v28 = vpop.f32.mrf.mxu3  ;;  %7821 = vmatmul.msk.f32.gmra.mxu0 %vm2147_vm10, %v10268_v54  ;;  %7837 = vmatmul.msk.f32.gmra.mxu1 %vm2147_vm10, %v10268_v54 }
 0x523   : > { %7676 = vst [vmem:[%s8936_s26 + $0x7f0] sm:$0xff] %v3867_v27  ;;  %v5826_v27 = vld [vmem:[#allocation2 + $0x108] sm:$0xff] }
 0x524   : > { %7677 = vst [vmem:[%s8936_s26 + $0x7f8] sm:$0xff] %v3932_v28 }
 0x527   : > { %7870 = vmatmul.msk.f32.vlgmr.msra.gmra.mxu2 %vm2147_vm10, %v10283_v46  ;;  %7886 = vmatmul.msk.f32.vlgmr.msra.gmra.mxu3 %vm2147_vm10, %v10283_v46  ;;  %v4512_v39 = vpop.f32.mrf.mxu0  ;;  %v4577_v29 = vpop.f32.mrf.mxu1 }
 0x528   : > { %7838 = vst [vmem:[%s8936_s26 + $0xa00] sm:$0xff] %v4512_v39  ;;  %5660 = vmatpush.msra.mxu2 %v5595_v11  ;;  %5725 = vmatpush.msra.mxu3 %v5596_v13 }
 0x529   : > { %7839 = vst [vmem:[%s8936_s26 + $0xa08] sm:$0xff] %v4577_v29 }
 0x52a   : > { %v4282_v30 = vpop.f32.mrf.mxu2  ;;  %v4347_v35 = vpop.f32.mrf.mxu3  ;;  %7934 = vmatmul.msk.f32.vlgmr.msra.gmra.mxu0 %vm2147_vm10, %v10283_v46  ;;  %7950 = vmatmul.msk.f32.vlgmr.msra.gmra.mxu1 %vm2147_vm10, %v10283_v46 }
 0x52b   : > { %7774 = vst [vmem:[%s8936_s26 + $0x900] sm:$0xff] %v4282_v30  ;;  %5890 = vmatpush.msra.mxu0 %v5825_v18  ;;  %5955 = vmatpush.msra.mxu1 %v5826_v27 }
 0x52c   : > { %7775 = vst [vmem:[%s8936_s26 + $0x908] sm:$0xff] %v4347_v35  ;;  %v10877_v35 = vld [vmem:[%s8934_s6 + $0x70] sm:$0xff] }
 0x52f   : > { %7871 = vmatmul.msk.f32.gmra.mxu2 %vm2147_vm10, %v10298_v50  ;;  %7887 = vmatmul.msk.f32.gmra.mxu3 %vm2147_vm10, %v10298_v50  ;;  %v4515_v54 = vpop.f32.mrf.mxu0  ;;  %v4580_v36 = vpop.f32.mrf.mxu1 }
 0x530   : > { %7840 = vst [vmem:[%s8936_s26 + $0xa10] sm:$0xff] %v4515_v54 }
 0x531   : > { %7841 = vst [vmem:[%s8936_s26 + $0xa18] sm:$0xff] %v4580_v36 }
 0x532   : > { %v4285_v33 = vpop.f32.mrf.mxu2  ;;  %v4350_v37 = vpop.f32.mrf.mxu3  ;;  %7935 = vmatmul.msk.f32.gmra.mxu0 %vm2147_vm10, %v10298_v50  ;;  %7951 = vmatmul.msk.f32.gmra.mxu1 %vm2147_vm10, %v10298_v50 }
 0x533   : > { %7776 = vst [vmem:[%s8936_s26 + $0x910] sm:$0xff] %v4285_v33 }
 0x534   : > { %7777 = vst [vmem:[%s8936_s26 + $0x918] sm:$0xff] %v4350_v37 }
 0x537   : > { %7872 = vmatmul.msk.f32.gmra.mxu2 %vm2147_vm10, %v10313_v55  ;;  %7888 = vmatmul.msk.f32.gmra.mxu3 %vm2147_vm10, %v10313_v55  ;;  %v4518_v46 = vpop.f32.mrf.mxu0  ;;  %v4583_v38 = vpop.f32.mrf.mxu1 }
 0x538   : > { %7842 = vst [vmem:[%s8936_s26 + $0xa20] sm:$0xff] %v4518_v46  ;;  %v10892_v46 = vld [vmem:[%s8934_s6 + $0x78] sm:$0xff] }
 0x539   : > { %7843 = vst [vmem:[%s8936_s26 + $0xa28] sm:$0xff] %v4583_v38 }
 0x53a   : > { %v4288_v16 = vpop.f32.mrf.mxu2  ;;  %v4353_v40 = vpop.f32.mrf.mxu3  ;;  %7936 = vmatmul.msk.f32.gmra.mxu0 %vm2147_vm10, %v10313_v55  ;;  %7952 = vmatmul.msk.f32.gmra.mxu1 %vm2147_vm10, %v10313_v55 }
 0x53b   : > { %7778 = vst [vmem:[%s8936_s26 + $0x920] sm:$0xff] %v4288_v16 }
 0x53c   : > { %7779 = vst [vmem:[%s8936_s26 + $0x928] sm:$0xff] %v4353_v40 }
 0x53f   : > { %7873 = vmatmul.msk.f32.gmra.mxu2 %vm2147_vm10, %v10328_v32  ;;  %7889 = vmatmul.msk.f32.gmra.mxu3 %vm2147_vm10, %v10328_v32  ;;  %v4521_v50 = vpop.f32.mrf.mxu0  ;;  %v4586_v41 = vpop.f32.mrf.mxu1 }
 0x540   : > { %7844 = vst [vmem:[%s8936_s26 + $0xa30] sm:$0xff] %v4521_v50 }
 0x541   : > { %7845 = vst [vmem:[%s8936_s26 + $0xa38] sm:$0xff] %v4586_v41  ;;  %v10907_v41 = vld [vmem:[%s8934_s6] sm:$0xff] }
 0x542   : > { %v4291_v42 = vpop.f32.mrf.mxu2  ;;  %v4356_v43 = vpop.f32.mrf.mxu3  ;;  %7937 = vmatmul.msk.f32.gmra.mxu0 %vm2147_vm10, %v10328_v32  ;;  %7953 = vmatmul.msk.f32.gmra.mxu1 %vm2147_vm10, %v10328_v32 }
 0x543   : > { %7780 = vst [vmem:[%s8936_s26 + $0x930] sm:$0xff] %v4291_v42 }
 0x544   : > { %7781 = vst [vmem:[%s8936_s26 + $0x938] sm:$0xff] %v4356_v43 }
 0x547   : > { %7874 = vmatmul.msk.f32.gmra.mxu2 %vm2147_vm10, %v10343_v63  ;;  %7890 = vmatmul.msk.f32.gmra.mxu3 %vm2147_vm10, %v10343_v63  ;;  %v4524_v55 = vpop.f32.mrf.mxu0  ;;  %v4589_v44 = vpop.f32.mrf.mxu1 }
 0x548   : > { %7846 = vst [vmem:[%s8936_s26 + $0xa40] sm:$0xff] %v4524_v55 }
 0x549   : > { %7847 = vst [vmem:[%s8936_s26 + $0xa48] sm:$0xff] %v4589_v44 }
 0x54a   : > { %v4294_v45 = vpop.f32.mrf.mxu2  ;;  %v4359_v20 = vpop.f32.mrf.mxu3  ;;  %7938 = vmatmul.msk.f32.gmra.mxu0 %vm2147_vm10, %v10343_v63  ;;  %7954 = vmatmul.msk.f32.gmra.mxu1 %vm2147_vm10, %v10343_v63 }
 0x54b   : > { %7782 = vst [vmem:[%s8936_s26 + $0x940] sm:$0xff] %v4294_v45  ;;  %v10922_v45 = vld [vmem:[%s8934_s6 + $0x8] sm:$0xff] }
 0x54c   : > { %7783 = vst [vmem:[%s8936_s26 + $0x948] sm:$0xff] %v4359_v20 }
 0x54f   : > { %7875 = vmatmul.msk.f32.gmra.mxu2 %vm2147_vm10, %v10358_v3  ;;  %7891 = vmatmul.msk.f32.gmra.mxu3 %vm2147_vm10, %v10358_v3  ;;  %v4527_v32 = vpop.f32.mrf.mxu0  ;;  %v4592_v47 = vpop.f32.mrf.mxu1 }
 0x550   : > { %7848 = vst [vmem:[%s8936_s26 + $0xa50] sm:$0xff] %v4527_v32 }
 0x551   : > { %7849 = vst [vmem:[%s8936_s26 + $0xa58] sm:$0xff] %v4592_v47 }
 0x552   : > { %v4297_v48 = vpop.f32.mrf.mxu2  ;;  %v4362_v22 = vpop.f32.mrf.mxu3  ;;  %7939 = vmatmul.msk.f32.gmra.mxu0 %vm2147_vm10, %v10358_v3  ;;  %7955 = vmatmul.msk.f32.gmra.mxu1 %vm2147_vm10, %v10358_v3  ;;  %v10772_v3 = vld [vmem:[%s8934_s6 + $0x38] sm:$0xff] }
 0x553   : > { %7784 = vst [vmem:[%s8936_s26 + $0x950] sm:$0xff] %v4297_v48 }
 0x554   : > { %7785 = vst [vmem:[%s8936_s26 + $0x958] sm:$0xff] %v4362_v22  ;;  %v10937_v22 = vld [vmem:[%s8934_s6 + $0x10] sm:$0xff] }
 0x557   : > { %7876 = vmatmul.msk.f32.gmra.mxu2 %vm2147_vm10, %v10373_v8  ;;  %7892 = vmatmul.msk.f32.gmra.mxu3 %vm2147_vm10, %v10373_v8  ;;  %v4530_v63 = vpop.f32.mrf.mxu0  ;;  %v4595_v49 = vpop.f32.mrf.mxu1 }
 0x558   : > { %7850 = vst [vmem:[%s8936_s26 + $0xa60] sm:$0xff] %v4530_v63 }
 0x559   : > { %7851 = vst [vmem:[%s8936_s26 + $0xa68] sm:$0xff] %v4595_v49 }
 0x55a   : > { %v4300_v51 = vpop.f32.mrf.mxu2  ;;  %v4365_v24 = vpop.f32.mrf.mxu3  ;;  %7940 = vmatmul.msk.f32.gmra.mxu0 %vm2147_vm10, %v10373_v8  ;;  %7956 = vmatmul.msk.f32.gmra.mxu1 %vm2147_vm10, %v10373_v8  ;;  %v10787_v8 = vld [vmem:[%s8934_s6 + $0x40] sm:$0xff] }
 0x55b   : > { %7786 = vst [vmem:[%s8936_s26 + $0x960] sm:$0xff] %v4300_v51 }
 0x55c   : > { %7787 = vst [vmem:[%s8936_s26 + $0x968] sm:$0xff] %v4365_v24 }
 0x55f   : > { %7877 = vmatmul.msk.f32.gmra.mxu2 %vm2147_vm10, %v10772_v3  ;;  %7893 = vmatmul.msk.f32.gmra.mxu3 %vm2147_vm10, %v10772_v3  ;;  %v4533_v52 = vpop.f32.mrf.mxu0  ;;  %v4598_v53 = vpop.f32.mrf.mxu1 }
 0x560   : > { %7852 = vst [vmem:[%s8936_s26 + $0xa70] sm:$0xff] %v4533_v52  ;;  %v10952_v52 = vld [vmem:[%s8934_s6 + $0x18] sm:$0xff] }
 0x561   : > { %7853 = vst [vmem:[%s8936_s26 + $0xa78] sm:$0xff] %v4598_v53 }
 0x562   : > { %v4303_v60 = vpop.f32.mrf.mxu2  ;;  %v4368_v26 = vpop.f32.mrf.mxu3  ;;  %7941 = vmatmul.msk.f32.gmra.mxu0 %vm2147_vm10, %v10772_v3  ;;  %7957 = vmatmul.msk.f32.gmra.mxu1 %vm2147_vm10, %v10772_v3 }
 0x563   : > { %7788 = vst [vmem:[%s8936_s26 + $0x970] sm:$0xff] %v4303_v60 }
 0x564   : > { %7789 = vst [vmem:[%s8936_s26 + $0x978] sm:$0xff] %v4368_v26 }
 0x567   : > { %7878 = vmatmul.msk.f32.gmra.mxu2 %vm2147_vm10, %v10787_v8  ;;  %7894 = vmatmul.msk.f32.gmra.mxu3 %vm2147_vm10, %v10787_v8  ;;  %v4536_v56 = vpop.f32.mrf.mxu0  ;;  %v4601_v57 = vpop.f32.mrf.mxu1 }
 0x568   : > { %7854 = vst [vmem:[%s8936_s26 + $0xa80] sm:$0xff] %v4536_v56 }
 0x569   : > { %7855 = vst [vmem:[%s8936_s26 + $0xa88] sm:$0xff] %v4601_v57  ;;  %v10967_v57 = vld [vmem:[%s8934_s6 + $0x20] sm:$0xff] }
 0x56a   : > { %v4306_v17 = vpop.f32.mrf.mxu2  ;;  %v4371_v58 = vpop.f32.mrf.mxu3  ;;  %7942 = vmatmul.msk.f32.gmra.mxu0 %vm2147_vm10, %v10787_v8  ;;  %7958 = vmatmul.msk.f32.gmra.mxu1 %vm2147_vm10, %v10787_v8 }
 0x56b   : > { %7790 = vst [vmem:[%s8936_s26 + $0x980] sm:$0xff] %v4306_v17 }
 0x56c   : > { %7791 = vst [vmem:[%s8936_s26 + $0x988] sm:$0xff] %v4371_v58 }
 0x56f   : > { %7879 = vmatmul.msk.f32.gmra.mxu2 %vm2147_vm10, %v10802_v59  ;;  %7895 = vmatmul.msk.f32.gmra.mxu3 %vm2147_vm10, %v10802_v59  ;;  %v4539_v61 = vpop.f32.mrf.mxu0  ;;  %v4604_v1 = vpop.f32.mrf.mxu1 }
 0x570   : > { %7856 = vst [vmem:[%s8936_s26 + $0xa90] sm:$0xff] %v4539_v61 }
 0x571   : > { %7857 = vst [vmem:[%s8936_s26 + $0xa98] sm:$0xff] %v4604_v1 }
 0x572   : > { %v4309_v62 = vpop.f32.mrf.mxu2  ;;  %v4374_v34 = vpop.f32.mrf.mxu3  ;;  %7943 = vmatmul.msk.f32.gmra.mxu0 %vm2147_vm10, %v10802_v59  ;;  %7959 = vmatmul.msk.f32.gmra.mxu1 %vm2147_vm10, %v10802_v59 }
 0x573   : > { %7792 = vst [vmem:[%s8936_s26 + $0x990] sm:$0xff] %v4309_v62  ;;  %v10982_v62 = vld [vmem:[%s8934_s6 + $0x28] sm:$0xff] }
 0x574   : > { %7793 = vst [vmem:[%s8936_s26 + $0x998] sm:$0xff] %v4374_v34 }
 0x577   : > { %7880 = vmatmul.msk.f32.gmra.mxu2 %vm2147_vm10, %v10817_v12  ;;  %7896 = vmatmul.msk.f32.gmra.mxu3 %vm2147_vm10, %v10817_v12  ;;  %v4542_v5 = vpop.f32.mrf.mxu0  ;;  %v4607_v0 = vpop.f32.mrf.mxu1 }
 0x578   : > { %7858 = vst [vmem:[%s8936_s26 + $0xaa0] sm:$0xff] %v4542_v5 }
 0x579   : > { %7859 = vst [vmem:[%s8936_s26 + $0xaa8] sm:$0xff] %v4607_v0 }
 0x57a   : > { %v4312_v2 = vpop.f32.mrf.mxu2  ;;  %v4377_v19 = vpop.f32.mrf.mxu3  ;;  %7944 = vmatmul.msk.f32.gmra.mxu0 %vm2147_vm10, %v10817_v12  ;;  %7960 = vmatmul.msk.f32.gmra.mxu1 %vm2147_vm10, %v10817_v12 }
 0x57b   : > { %7794 = vst [vmem:[%s8936_s26 + $0x9a0] sm:$0xff] %v4312_v2 }
 0x57c   : > { %7795 = vst [vmem:[%s8936_s26 + $0x9a8] sm:$0xff] %v4377_v19  ;;  %v10997_v19 = vld [vmem:[%s8934_s6 + $0x30] sm:$0xff] }
 0x57f   : > { %7881 = vmatmul.msk.f32.gmra.mxu2 %vm2147_vm10, %v10832_v23  ;;  %7897 = vmatmul.msk.f32.gmra.mxu3 %vm2147_vm10, %v10832_v23  ;;  %v4545_v4 = vpop.f32.mrf.mxu0  ;;  %v4610_v21 = vpop.f32.mrf.mxu1 }
 0x580   : > { %7860 = vst [vmem:[%s8936_s26 + $0xab0] sm:$0xff] %v4545_v4 }
 0x581   : > { %7861 = vst [vmem:[%s8936_s26 + $0xab8] sm:$0xff] %v4610_v21 }
 0x582   : > { %v4315_v6 = vpop.f32.mrf.mxu2  ;;  %v4380_v7 = vpop.f32.mrf.mxu3  ;;  %7945 = vmatmul.msk.f32.gmra.mxu0 %vm2147_vm10, %v10832_v23  ;;  %7961 = vmatmul.msk.f32.gmra.mxu1 %vm2147_vm10, %v10832_v23 }
 0x583   : > { %7796 = vst [vmem:[%s8936_s26 + $0x9b0] sm:$0xff] %v4315_v6 }
 0x584   : > { %7797 = vst [vmem:[%s8936_s26 + $0x9b8] sm:$0xff] %v4380_v7 }
 0x587   : > { %7882 = vmatmul.msk.f32.gmra.mxu2 %vm2147_vm10, %v10847_v9  ;;  %7898 = vmatmul.msk.f32.gmra.mxu3 %vm2147_vm10, %v10847_v9  ;;  %v4548_v14 = vpop.f32.mrf.mxu0  ;;  %v4613_v10 = vpop.f32.mrf.mxu1 }
 0x588   : > { %7862 = vst [vmem:[%s8936_s26 + $0xac0] sm:$0xff] %v4548_v14 }
 0x589   : > { %7863 = vst [vmem:[%s8936_s26 + $0xac8] sm:$0xff] %v4613_v10 }
 0x58a   : > { %v4318_v25 = vpop.f32.mrf.mxu2  ;;  %v4383_v15 = vpop.f32.mrf.mxu3  ;;  %7946 = vmatmul.msk.f32.gmra.mxu0 %vm2147_vm10, %v10847_v9  ;;  %7962 = vmatmul.msk.f32.gmra.mxu1 %vm2147_vm10, %v10847_v9 }
 0x58b   : > { %7798 = vst [vmem:[%s8936_s26 + $0x9c0] sm:$0xff] %v4318_v25 }
 0x58c   : > { %7799 = vst [vmem:[%s8936_s26 + $0x9c8] sm:$0xff] %v4383_v15 }
 0x58f   : > { %7883 = vmatmul.msk.f32.gmra.mxu2 %vm2147_vm10, %v10862_v31  ;;  %7899 = vmatmul.msk.f32.gmra.mxu3 %vm2147_vm10, %v10862_v31  ;;  %v4551_v28 = vpop.f32.mrf.mxu0  ;;  %v4616_v39 = vpop.f32.mrf.mxu1 }
 0x590   : > { %7864 = vst [vmem:[%s8936_s26 + $0xad0] sm:$0xff] %v4551_v28 }
 0x591   : > { %7865 = vst [vmem:[%s8936_s26 + $0xad8] sm:$0xff] %v4616_v39 }
 0x592   : > { %v4321_v29 = vpop.f32.mrf.mxu2  ;;  %v4386_v30 = vpop.f32.mrf.mxu3  ;;  %7947 = vmatmul.msk.f32.gmra.mxu0 %vm2147_vm10, %v10862_v31  ;;  %7963 = vmatmul.msk.f32.gmra.mxu1 %vm2147_vm10, %v10862_v31 }
 0x593   : > { %7800 = vst [vmem:[%s8936_s26 + $0x9d0] sm:$0xff] %v4321_v29 }
 0x594   : > { %7801 = vst [vmem:[%s8936_s26 + $0x9d8] sm:$0xff] %v4386_v30 }
 0x597   : > { %7884 = vmatmul.msk.f32.gmra.mxu2 %vm2147_vm10, %v10877_v35  ;;  %7900 = vmatmul.msk.f32.gmra.mxu3 %vm2147_vm10, %v10877_v35  ;;  %v4554_v54 = vpop.f32.mrf.mxu0  ;;  %v4619_v36 = vpop.f32.mrf.mxu1 }
 0x598   : > { %7866 = vst [vmem:[%s8936_s26 + $0xae0] sm:$0xff] %v4554_v54 }
 0x599   : > { %7867 = vst [vmem:[%s8936_s26 + $0xae8] sm:$0xff] %v4619_v36 }
 0x59a   : > { %v4324_v33 = vpop.f32.mrf.mxu2  ;;  %v4389_v37 = vpop.f32.mrf.mxu3  ;;  %7948 = vmatmul.msk.f32.gmra.mxu0 %vm2147_vm10, %v10877_v35  ;;  %7964 = vmatmul.msk.f32.gmra.mxu1 %vm2147_vm10, %v10877_v35 }
 0x59b   : > { %7802 = vst [vmem:[%s8936_s26 + $0x9e0] sm:$0xff] %v4324_v33 }
 0x59c   : > { %7803 = vst [vmem:[%s8936_s26 + $0x9e8] sm:$0xff] %v4389_v37 }
 0x59f   : > { %7885 = vmatmul.msk.f32.gmra.mxu2 %vm2147_vm10, %v10892_v46  ;;  %7901 = vmatmul.msk.f32.gmra.mxu3 %vm2147_vm10, %v10892_v46  ;;  %v4557_v38 = vpop.f32.mrf.mxu0  ;;  %v4622_v16 = vpop.f32.mrf.mxu1 }
 0x5a0   : > { %7868 = vst [vmem:[%s8936_s26 + $0xaf0] sm:$0xff] %v4557_v38 }
 0x5a1   : > { %7869 = vst [vmem:[%s8936_s26 + $0xaf8] sm:$0xff] %v4622_v16 }
 0x5a2   : > { %v4327_v40 = vpop.f32.mrf.mxu2  ;;  %v4392_v50 = vpop.f32.mrf.mxu3  ;;  %7949 = vmatmul.msk.f32.gmra.mxu0 %vm2147_vm10, %v10892_v46  ;;  %7965 = vmatmul.msk.f32.gmra.mxu1 %vm2147_vm10, %v10892_v46 }
 0x5a3   : > { %7804 = vst [vmem:[%s8936_s26 + $0x9f0] sm:$0xff] %v4327_v40 }
 0x5a4   : > { %7805 = vst [vmem:[%s8936_s26 + $0x9f8] sm:$0xff] %v4392_v50 }
 0x5a7   : > { %7998 = vmatmul.msk.f32.vlgmr.msrb.gmra.mxu2 %vm2147_vm10, %v10907_v41  ;;  %8014 = vmatmul.msk.f32.vlgmr.msrb.gmra.mxu3 %vm2147_vm10, %v10907_v41  ;;  %v4972_v42 = vpop.f32.mrf.mxu0  ;;  %v5037_v43 = vpop.f32.mrf.mxu1 }
 0x5a8   : > { %7966 = vst [vmem:[%s8936_s26 + $0xc00] sm:$0xff] %v4972_v42 }
 0x5a9   : > { %7967 = vst [vmem:[%s8936_s26 + $0xc08] sm:$0xff] %v5037_v43 }
 0x5aa   : > { %v4742_v55 = vpop.f32.mrf.mxu2  ;;  %v4807_v44 = vpop.f32.mrf.mxu3  ;;  %8062 = vmatmul.msk.f32.vlgmr.msrb.gmra.mxu0 %vm2147_vm10, %v10907_v41  ;;  %8078 = vmatmul.msk.f32.vlgmr.msrb.gmra.mxu1 %vm2147_vm10, %v10907_v41 }
 0x5ab   : > { %7902 = vst [vmem:[%s8936_s26 + $0xb00] sm:$0xff] %v4742_v55  ;;  %v6055_v55 = vld [vmem:[#allocation2 + $0x110] sm:$0xff] }
 0x5ac   : > { %7903 = vst [vmem:[%s8936_s26 + $0xb08] sm:$0xff] %v4807_v44  ;;  %v6056_v44 = vld [vmem:[#allocation2 + $0x118] sm:$0xff]  ;;  %6120 = vmatpush.msrb.mxu2 %v6055_v55 }
 0x5ad   : > { %6185 = vmatpush.msrb.mxu3 %v6056_v44 }
 0x5af   : > { %7999 = vmatmul.msk.f32.gmra.mxu2 %vm2147_vm10, %v10922_v45  ;;  %8015 = vmatmul.msk.f32.gmra.mxu3 %vm2147_vm10, %v10922_v45  ;;  %v4975_v20 = vpop.f32.mrf.mxu0  ;;  %v5040_v32 = vpop.f32.mrf.mxu1 }
 0x5b0   : > { %7968 = vst [vmem:[%s8936_s26 + $0xc10] sm:$0xff] %v4975_v20 }
 0x5b1   : > { %7969 = vst [vmem:[%s8936_s26 + $0xc18] sm:$0xff] %v5040_v32 }
 0x5b2   : > { %v4745_v47 = vpop.f32.mrf.mxu2  ;;  %v4810_v48 = vpop.f32.mrf.mxu3  ;;  %8063 = vmatmul.msk.f32.gmra.mxu0 %vm2147_vm10, %v10922_v45  ;;  %8079 = vmatmul.msk.f32.gmra.mxu1 %vm2147_vm10, %v10922_v45 }
 0x5b3   : > { %7904 = vst [vmem:[%s8936_s26 + $0xb10] sm:$0xff] %v4745_v47  ;;  %v6285_v47 = vld [vmem:[#allocation2 + $0x120] sm:$0xff] }
 0x5b4   : > { %7905 = vst [vmem:[%s8936_s26 + $0xb18] sm:$0xff] %v4810_v48  ;;  %v6286_v48 = vld [vmem:[#allocation2 + $0x128] sm:$0xff]  ;;  %6350 = vmatpush.msrb.mxu0 %v6285_v47 }
 0x5b5   : > { %6415 = vmatpush.msrb.mxu1 %v6286_v48 }
 0x5b7   : > { %8000 = vmatmul.msk.f32.gmra.mxu2 %vm2147_vm10, %v10937_v22  ;;  %8016 = vmatmul.msk.f32.gmra.mxu3 %vm2147_vm10, %v10937_v22  ;;  %v4978_v63 = vpop.f32.mrf.mxu0  ;;  %v5043_v49 = vpop.f32.mrf.mxu1 }
 0x5b8   : > { %7970 = vst [vmem:[%s8936_s26 + $0xc20] sm:$0xff] %v4978_v63 }
 0x5b9   : > { %7971 = vst [vmem:[%s8936_s26 + $0xc28] sm:$0xff] %v5043_v49 }
 0x5ba   : > { %v4748_v51 = vpop.f32.mrf.mxu2  ;;  %v4813_v24 = vpop.f32.mrf.mxu3  ;;  %8064 = vmatmul.msk.f32.gmra.mxu0 %vm2147_vm10, %v10937_v22  ;;  %8080 = vmatmul.msk.f32.gmra.mxu1 %vm2147_vm10, %v10937_v22 }
 0x5bb   : > { %7906 = vst [vmem:[%s8936_s26 + $0xb20] sm:$0xff] %v4748_v51 }
 0x5bc   : > { %7907 = vst [vmem:[%s8936_s26 + $0xb28] sm:$0xff] %v4813_v24 }
 0x5bf   : > { %8001 = vmatmul.msk.f32.gmra.mxu2 %vm2147_vm10, %v10952_v52  ;;  %8017 = vmatmul.msk.f32.gmra.mxu3 %vm2147_vm10, %v10952_v52  ;;  %v4981_v53 = vpop.f32.mrf.mxu0  ;;  %v5046_v60 = vpop.f32.mrf.mxu1 }
 0x5c0   : > { %7972 = vst [vmem:[%s8936_s26 + $0xc30] sm:$0xff] %v4981_v53 }
 0x5c1   : > { %7973 = vst [vmem:[%s8936_s26 + $0xc38] sm:$0xff] %v5046_v60 }
 0x5c2   : > { %v4751_v26 = vpop.f32.mrf.mxu2  ;;  %v4816_v56 = vpop.f32.mrf.mxu3  ;;  %8065 = vmatmul.msk.f32.gmra.mxu0 %vm2147_vm10, %v10952_v52  ;;  %8081 = vmatmul.msk.f32.gmra.mxu1 %vm2147_vm10, %v10952_v52 }
 0x5c3   : > { %7908 = vst [vmem:[%s8936_s26 + $0xb30] sm:$0xff] %v4751_v26 }
 0x5c4   : > { %7909 = vst [vmem:[%s8936_s26 + $0xb38] sm:$0xff] %v4816_v56 }
 0x5c7   : > { %8002 = vmatmul.msk.f32.gmra.mxu2 %vm2147_vm10, %v10967_v57  ;;  %8018 = vmatmul.msk.f32.gmra.mxu3 %vm2147_vm10, %v10967_v57  ;;  %v4984_v17 = vpop.f32.mrf.mxu0  ;;  %v5049_v58 = vpop.f32.mrf.mxu1 }
 0x5c8   : > { %7974 = vst [vmem:[%s8936_s26 + $0xc40] sm:$0xff] %v4984_v17 }
 0x5c9   : > { %7975 = vst [vmem:[%s8936_s26 + $0xc48] sm:$0xff] %v5049_v58 }
 0x5ca   : > { %v4754_v61 = vpop.f32.mrf.mxu2  ;;  %v4819_v1 = vpop.f32.mrf.mxu3  ;;  %8066 = vmatmul.msk.f32.gmra.mxu0 %vm2147_vm10, %v10967_v57  ;;  %8082 = vmatmul.msk.f32.gmra.mxu1 %vm2147_vm10, %v10967_v57 }
 0x5cb   : > { %7910 = vst [vmem:[%s8936_s26 + $0xb40] sm:$0xff] %v4754_v61 }
 0x5cc   : > { %7911 = vst [vmem:[%s8936_s26 + $0xb48] sm:$0xff] %v4819_v1 }
 0x5cf   : > { %8003 = vmatmul.msk.f32.gmra.mxu2 %vm2147_vm10, %v10982_v62  ;;  %8019 = vmatmul.msk.f32.gmra.mxu3 %vm2147_vm10, %v10982_v62  ;;  %v4987_v34 = vpop.f32.mrf.mxu0  ;;  %v5052_v5 = vpop.f32.mrf.mxu1 }
 0x5d0   : > { %7976 = vst [vmem:[%s8936_s26 + $0xc50] sm:$0xff] %v4987_v34 }
 0x5d1   : > { %7977 = vst [vmem:[%s8936_s26 + $0xc58] sm:$0xff] %v5052_v5 }
 0x5d2   : > { %v4757_v0 = vpop.f32.mrf.mxu2  ;;  %v4822_v2 = vpop.f32.mrf.mxu3  ;;  %8067 = vmatmul.msk.f32.gmra.mxu0 %vm2147_vm10, %v10982_v62  ;;  %8083 = vmatmul.msk.f32.gmra.mxu1 %vm2147_vm10, %v10982_v62 }
 0x5d3   : > { %7912 = vst [vmem:[%s8936_s26 + $0xb50] sm:$0xff] %v4757_v0 }
 0x5d4   : > { %7913 = vst [vmem:[%s8936_s26 + $0xb58] sm:$0xff] %v4822_v2 }
 0x5d7   : > { %8004 = vmatmul.msk.f32.gmra.mxu2 %vm2147_vm10, %v10997_v19  ;;  %8020 = vmatmul.msk.f32.gmra.mxu3 %vm2147_vm10, %v10997_v19  ;;  %v4990_v4 = vpop.f32.mrf.mxu0  ;;  %v5055_v21 = vpop.f32.mrf.mxu1 }
 0x5d8   : > { %7978 = vst [vmem:[%s8936_s26 + $0xc60] sm:$0xff] %v4990_v4 }
 0x5d9   : > { %7979 = vst [vmem:[%s8936_s26 + $0xc68] sm:$0xff] %v5055_v21 }
 0x5da   : > { %v4760_v6 = vpop.f32.mrf.mxu2  ;;  %v4825_v7 = vpop.f32.mrf.mxu3  ;;  %8068 = vmatmul.msk.f32.gmra.mxu0 %vm2147_vm10, %v10997_v19  ;;  %8084 = vmatmul.msk.f32.gmra.mxu1 %vm2147_vm10, %v10997_v19 }
 0x5db   : > { %7914 = vst [vmem:[%s8936_s26 + $0xb60] sm:$0xff] %v4760_v6 }
 0x5dc   : > { %7915 = vst [vmem:[%s8936_s26 + $0xb68] sm:$0xff] %v4825_v7 }
 0x5df   : > { %8005 = vmatmul.msk.f32.gmra.mxu2 %vm2147_vm10, %v10772_v3  ;;  %8021 = vmatmul.msk.f32.gmra.mxu3 %vm2147_vm10, %v10772_v3  ;;  %v4993_v14 = vpop.f32.mrf.mxu0  ;;  %v5058_v10 = vpop.f32.mrf.mxu1 }
 0x5e0   : > { %7980 = vst [vmem:[%s8936_s26 + $0xc70] sm:$0xff] %v4993_v14 }
 0x5e1   : > { %7981 = vst [vmem:[%s8936_s26 + $0xc78] sm:$0xff] %v5058_v10 }
 0x5e2   : > { %v4763_v11 = vpop.f32.mrf.mxu2  ;;  %v4828_v13 = vpop.f32.mrf.mxu3  ;;  %8069 = vmatmul.msk.f32.gmra.mxu0 %vm2147_vm10, %v10772_v3  ;;  %8085 = vmatmul.msk.f32.gmra.mxu1 %vm2147_vm10, %v10772_v3 }
 0x5e3   : > { %7916 = vst [vmem:[%s8936_s26 + $0xb70] sm:$0xff] %v4763_v11 }
 0x5e4   : > { %7917 = vst [vmem:[%s8936_s26 + $0xb78] sm:$0xff] %v4828_v13 }
 0x5e7   : > { %8006 = vmatmul.msk.f32.gmra.mxu2 %vm2147_vm10, %v10787_v8  ;;  %8022 = vmatmul.msk.f32.gmra.mxu3 %vm2147_vm10, %v10787_v8  ;;  %v4996_v25 = vpop.f32.mrf.mxu0  ;;  %v5061_v15 = vpop.f32.mrf.mxu1 }
 0x5e8   : > { %7982 = vst [vmem:[%s8936_s26 + $0xc80] sm:$0xff] %v4996_v25 }
 0x5e9   : > { %7983 = vst [vmem:[%s8936_s26 + $0xc88] sm:$0xff] %v5061_v15 }
 0x5ea   : > { %v4766_v18 = vpop.f32.mrf.mxu2  ;;  %v4831_v27 = vpop.f32.mrf.mxu3  ;;  %8070 = vmatmul.msk.f32.gmra.mxu0 %vm2147_vm10, %v10787_v8  ;;  %8086 = vmatmul.msk.f32.gmra.mxu1 %vm2147_vm10, %v10787_v8 }
 0x5eb   : > { %7918 = vst [vmem:[%s8936_s26 + $0xb80] sm:$0xff] %v4766_v18 }
 0x5ec   : > { %7919 = vst [vmem:[%s8936_s26 + $0xb88] sm:$0xff] %v4831_v27 }
 0x5ef   : > { %8007 = vmatmul.msk.f32.gmra.mxu2 %vm2147_vm10, %v10802_v59  ;;  %8023 = vmatmul.msk.f32.gmra.mxu3 %vm2147_vm10, %v10802_v59  ;;  %v4999_v28 = vpop.f32.mrf.mxu0  ;;  %v5064_v39 = vpop.f32.mrf.mxu1 }
 0x5f0   : > { %7984 = vst [vmem:[%s8936_s26 + $0xc90] sm:$0xff] %v4999_v28 }
 0x5f1   : > { %7985 = vst [vmem:[%s8936_s26 + $0xc98] sm:$0xff] %v5064_v39 }
 0x5f2   : > { %v4769_v29 = vpop.f32.mrf.mxu2  ;;  %v4834_v30 = vpop.f32.mrf.mxu3  ;;  %8071 = vmatmul.msk.f32.gmra.mxu0 %vm2147_vm10, %v10802_v59  ;;  %8087 = vmatmul.msk.f32.gmra.mxu1 %vm2147_vm10, %v10802_v59 }
 0x5f3   : > { %7920 = vst [vmem:[%s8936_s26 + $0xb90] sm:$0xff] %v4769_v29 }
 0x5f4   : > { %7921 = vst [vmem:[%s8936_s26 + $0xb98] sm:$0xff] %v4834_v30 }
 0x5f7   : > { %8008 = vmatmul.msk.f32.gmra.mxu2 %vm2147_vm10, %v10817_v12  ;;  %8024 = vmatmul.msk.f32.gmra.mxu3 %vm2147_vm10, %v10817_v12  ;;  %v5002_v54 = vpop.f32.mrf.mxu0  ;;  %v5067_v36 = vpop.f32.mrf.mxu1 }
 0x5f8   : > { %7986 = vst [vmem:[%s8936_s26 + $0xca0] sm:$0xff] %v5002_v54 }
 0x5f9   : > { %7987 = vst [vmem:[%s8936_s26 + $0xca8] sm:$0xff] %v5067_v36 }
 0x5fa   : > { %v4772_v33 = vpop.f32.mrf.mxu2  ;;  %v4837_v37 = vpop.f32.mrf.mxu3  ;;  %8072 = vmatmul.msk.f32.gmra.mxu0 %vm2147_vm10, %v10817_v12  ;;  %8088 = vmatmul.msk.f32.gmra.mxu1 %vm2147_vm10, %v10817_v12 }
 0x5fb   : > { %7922 = vst [vmem:[%s8936_s26 + $0xba0] sm:$0xff] %v4772_v33 }
 0x5fc   : > { %7923 = vst [vmem:[%s8936_s26 + $0xba8] sm:$0xff] %v4837_v37 }
 0x5ff   : > { %8009 = vmatmul.msk.f32.gmra.mxu2 %vm2147_vm10, %v10832_v23  ;;  %8025 = vmatmul.msk.f32.gmra.mxu3 %vm2147_vm10, %v10832_v23  ;;  %v5005_v38 = vpop.f32.mrf.mxu0  ;;  %v5070_v16 = vpop.f32.mrf.mxu1 }
 0x600   : > { %7988 = vst [vmem:[%s8936_s26 + $0xcb0] sm:$0xff] %v5005_v38 }
 0x601   : > { %7989 = vst [vmem:[%s8936_s26 + $0xcb8] sm:$0xff] %v5070_v16 }
 0x602   : > { %v4775_v40 = vpop.f32.mrf.mxu2  ;;  %v4840_v50 = vpop.f32.mrf.mxu3  ;;  %8073 = vmatmul.msk.f32.gmra.mxu0 %vm2147_vm10, %v10832_v23  ;;  %8089 = vmatmul.msk.f32.gmra.mxu1 %vm2147_vm10, %v10832_v23 }
 0x603   : > { %7924 = vst [vmem:[%s8936_s26 + $0xbb0] sm:$0xff] %v4775_v40 }
 0x604   : > { %7925 = vst [vmem:[%s8936_s26 + $0xbb8] sm:$0xff] %v4840_v50 }
 0x607   : > { %8010 = vmatmul.msk.f32.gmra.mxu2 %vm2147_vm10, %v10847_v9  ;;  %8026 = vmatmul.msk.f32.gmra.mxu3 %vm2147_vm10, %v10847_v9  ;;  %v5008_v42 = vpop.f32.mrf.mxu0  ;;  %v5073_v43 = vpop.f32.mrf.mxu1 }
 0x608   : > { %7990 = vst [vmem:[%s8936_s26 + $0xcc0] sm:$0xff] %v5008_v42 }
 0x609   : > { %7991 = vst [vmem:[%s8936_s26 + $0xcc8] sm:$0xff] %v5073_v43 }
 0x60a   : > { %v4778_v20 = vpop.f32.mrf.mxu2  ;;  %v4843_v32 = vpop.f32.mrf.mxu3  ;;  %8074 = vmatmul.msk.f32.gmra.mxu0 %vm2147_vm10, %v10847_v9  ;;  %8090 = vmatmul.msk.f32.gmra.mxu1 %vm2147_vm10, %v10847_v9 }
 0x60b   : > { %7926 = vst [vmem:[%s8936_s26 + $0xbc0] sm:$0xff] %v4778_v20 }
 0x60c   : > { %7927 = vst [vmem:[%s8936_s26 + $0xbc8] sm:$0xff] %v4843_v32 }
 0x60f   : > { %8011 = vmatmul.msk.f32.gmra.mxu2 %vm2147_vm10, %v10862_v31  ;;  %8027 = vmatmul.msk.f32.gmra.mxu3 %vm2147_vm10, %v10862_v31  ;;  %v5011_v63 = vpop.f32.mrf.mxu0  ;;  %v5076_v49 = vpop.f32.mrf.mxu1 }
 0x610   : > { %7992 = vst [vmem:[%s8936_s26 + $0xcd0] sm:$0xff] %v5011_v63 }
 0x611   : > { %7993 = vst [vmem:[%s8936_s26 + $0xcd8] sm:$0xff] %v5076_v49 }
 0x612   : > { %v4781_v51 = vpop.f32.mrf.mxu2  ;;  %v4846_v24 = vpop.f32.mrf.mxu3  ;;  %8075 = vmatmul.msk.f32.gmra.mxu0 %vm2147_vm10, %v10862_v31  ;;  %8091 = vmatmul.msk.f32.gmra.mxu1 %vm2147_vm10, %v10862_v31 }
 0x613   : > { %7928 = vst [vmem:[%s8936_s26 + $0xbd0] sm:$0xff] %v4781_v51 }
 0x614   : > { %7929 = vst [vmem:[%s8936_s26 + $0xbd8] sm:$0xff] %v4846_v24 }
 0x617   : > { %8012 = vmatmul.msk.f32.gmra.mxu2 %vm2147_vm10, %v10877_v35  ;;  %8028 = vmatmul.msk.f32.gmra.mxu3 %vm2147_vm10, %v10877_v35  ;;  %v5014_v53 = vpop.f32.mrf.mxu0  ;;  %v5079_v60 = vpop.f32.mrf.mxu1 }
 0x618   : > { %7994 = vst [vmem:[%s8936_s26 + $0xce0] sm:$0xff] %v5014_v53 }
 0x619   : > { %7995 = vst [vmem:[%s8936_s26 + $0xce8] sm:$0xff] %v5079_v60 }
 0x61a   : > { %v4784_v26 = vpop.f32.mrf.mxu2  ;;  %v4849_v56 = vpop.f32.mrf.mxu3  ;;  %8076 = vmatmul.msk.f32.gmra.mxu0 %vm2147_vm10, %v10877_v35  ;;  %8092 = vmatmul.msk.f32.gmra.mxu1 %vm2147_vm10, %v10877_v35 }
 0x61b   : > { %7930 = vst [vmem:[%s8936_s26 + $0xbe0] sm:$0xff] %v4784_v26 }
 0x61c   : > { %7931 = vst [vmem:[%s8936_s26 + $0xbe8] sm:$0xff] %v4849_v56 }
 0x61f   : > { %8013 = vmatmul.msk.f32.gmra.mxu2 %vm2147_vm10, %v10892_v46  ;;  %8029 = vmatmul.msk.f32.gmra.mxu3 %vm2147_vm10, %v10892_v46  ;;  %v5017_v17 = vpop.f32.mrf.mxu0  ;;  %v5082_v58 = vpop.f32.mrf.mxu1 }
 0x620   : > { %7996 = vst [vmem:[%s8936_s26 + $0xcf0] sm:$0xff] %v5017_v17 }
 0x621   : > { %7997 = vst [vmem:[%s8936_s26 + $0xcf8] sm:$0xff] %v5082_v58 }
 0x622   : > { %v4787_v61 = vpop.f32.mrf.mxu2  ;;  %v4852_v1 = vpop.f32.mrf.mxu3  ;;  %8077 = vmatmul.msk.f32.gmra.mxu0 %vm2147_vm10, %v10892_v46  ;;  %8093 = vmatmul.msk.f32.gmra.mxu1 %vm2147_vm10, %v10892_v46 }
 0x623   : > { %7932 = vst [vmem:[%s8936_s26 + $0xbf0] sm:$0xff] %v4787_v61  ;;  %v6515_v61 = vld [vmem:[#allocation2 + $0x130] sm:$0xff] }
 0x624   : > { %7933 = vst [vmem:[%s8936_s26 + $0xbf8] sm:$0xff] %v4852_v1  ;;  %v6516_v1 = vld [vmem:[#allocation2 + $0x138] sm:$0xff] }
 0x627   : > { %8126 = vmatmul.msk.f32.vlgmr.msra.gmra.mxu2 %vm2147_vm10, %v10907_v41  ;;  %8142 = vmatmul.msk.f32.vlgmr.msra.gmra.mxu3 %vm2147_vm10, %v10907_v41  ;;  %v5432_v34 = vpop.f32.mrf.mxu0  ;;  %v5497_v5 = vpop.f32.mrf.mxu1 }
 0x628   : > { %8094 = vst [vmem:[%s8936_s26 + $0xe00] sm:$0xff] %v5432_v34  ;;  %6580 = vmatpush.msra.mxu2 %v6515_v61  ;;  %6645 = vmatpush.msra.mxu3 %v6516_v1 }
 0x629   : > { %8095 = vst [vmem:[%s8936_s26 + $0xe08] sm:$0xff] %v5497_v5  ;;  %v6745_v5 = vld [vmem:[#allocation2 + $0x140] sm:$0xff] }
 0x62a   : > { %v5202_v0 = vpop.f32.mrf.mxu2  ;;  %v5267_v2 = vpop.f32.mrf.mxu3  ;;  %8190 = vmatmul.msk.f32.vlgmr.msra.gmra.mxu0 %vm2147_vm10, %v10907_v41  ;;  %8206 = vmatmul.msk.f32.vlgmr.msra.gmra.mxu1 %vm2147_vm10, %v10907_v41 }
 0x62b   : > { %8030 = vst [vmem:[%s8936_s26 + $0xd00] sm:$0xff] %v5202_v0  ;;  %v6746_v0 = vld [vmem:[#allocation2 + $0x148] sm:$0xff]  ;;  %6810 = vmatpush.msra.mxu0 %v6745_v5 }
 0x62c   : > { %8031 = vst [vmem:[%s8936_s26 + $0xd08] sm:$0xff] %v5267_v2  ;;  %6875 = vmatpush.msra.mxu1 %v6746_v0 }
 0x62f   : > { %8127 = vmatmul.msk.f32.gmra.mxu2 %vm2147_vm10, %v10922_v45  ;;  %8143 = vmatmul.msk.f32.gmra.mxu3 %vm2147_vm10, %v10922_v45  ;;  %v5435_v4 = vpop.f32.mrf.mxu0  ;;  %v5500_v21 = vpop.f32.mrf.mxu1 }
 0x630   : > { %8096 = vst [vmem:[%s8936_s26 + $0xe10] sm:$0xff] %v5435_v4 }
 0x631   : > { %8097 = vst [vmem:[%s8936_s26 + $0xe18] sm:$0xff] %v5500_v21 }
 0x632   : > { %v5205_v6 = vpop.f32.mrf.mxu2  ;;  %v5270_v7 = vpop.f32.mrf.mxu3  ;;  %8191 = vmatmul.msk.f32.gmra.mxu0 %vm2147_vm10, %v10922_v45  ;;  %8207 = vmatmul.msk.f32.gmra.mxu1 %vm2147_vm10, %v10922_v45 }
 0x633   : > { %8032 = vst [vmem:[%s8936_s26 + $0xd10] sm:$0xff] %v5205_v6 }
 0x634   : > { %8033 = vst [vmem:[%s8936_s26 + $0xd18] sm:$0xff] %v5270_v7 }
 0x637   : > { %8128 = vmatmul.msk.f32.gmra.mxu2 %vm2147_vm10, %v10937_v22  ;;  %8144 = vmatmul.msk.f32.gmra.mxu3 %vm2147_vm10, %v10937_v22  ;;  %v5438_v14 = vpop.f32.mrf.mxu0  ;;  %v5503_v10 = vpop.f32.mrf.mxu1 }
 0x638   : > { %8098 = vst [vmem:[%s8936_s26 + $0xe20] sm:$0xff] %v5438_v14 }
 0x639   : > { %8099 = vst [vmem:[%s8936_s26 + $0xe28] sm:$0xff] %v5503_v10 }
 0x63a   : > { %v5208_v11 = vpop.f32.mrf.mxu2  ;;  %v5273_v13 = vpop.f32.mrf.mxu3  ;;  %8192 = vmatmul.msk.f32.gmra.mxu0 %vm2147_vm10, %v10937_v22  ;;  %8208 = vmatmul.msk.f32.gmra.mxu1 %vm2147_vm10, %v10937_v22 }
 0x63b   : > { %8034 = vst [vmem:[%s8936_s26 + $0xd20] sm:$0xff] %v5208_v11 }
 0x63c   : > { %8035 = vst [vmem:[%s8936_s26 + $0xd28] sm:$0xff] %v5273_v13 }
 0x63f   : > { %8129 = vmatmul.msk.f32.gmra.mxu2 %vm2147_vm10, %v10952_v52  ;;  %8145 = vmatmul.msk.f32.gmra.mxu3 %vm2147_vm10, %v10952_v52  ;;  %v5441_v25 = vpop.f32.mrf.mxu0  ;;  %v5506_v15 = vpop.f32.mrf.mxu1 }
 0x640   : > { %8100 = vst [vmem:[%s8936_s26 + $0xe30] sm:$0xff] %v5441_v25 }
 0x641   : > { %8101 = vst [vmem:[%s8936_s26 + $0xe38] sm:$0xff] %v5506_v15 }
 0x642   : > { %v5211_v18 = vpop.f32.mrf.mxu2  ;;  %v5276_v27 = vpop.f32.mrf.mxu3  ;;  %8193 = vmatmul.msk.f32.gmra.mxu0 %vm2147_vm10, %v10952_v52  ;;  %8209 = vmatmul.msk.f32.gmra.mxu1 %vm2147_vm10, %v10952_v52 }
 0x643   : > { %8036 = vst [vmem:[%s8936_s26 + $0xd30] sm:$0xff] %v5211_v18 }
 0x644   : > { %8037 = vst [vmem:[%s8936_s26 + $0xd38] sm:$0xff] %v5276_v27 }
 0x647   : > { %8130 = vmatmul.msk.f32.gmra.mxu2 %vm2147_vm10, %v10967_v57  ;;  %8146 = vmatmul.msk.f32.gmra.mxu3 %vm2147_vm10, %v10967_v57  ;;  %v5444_v28 = vpop.f32.mrf.mxu0  ;;  %v5509_v39 = vpop.f32.mrf.mxu1 }
 0x648   : > { %8102 = vst [vmem:[%s8936_s26 + $0xe40] sm:$0xff] %v5444_v28 }
 0x649   : > { %8103 = vst [vmem:[%s8936_s26 + $0xe48] sm:$0xff] %v5509_v39 }
 0x64a   : > { %v5214_v29 = vpop.f32.mrf.mxu2  ;;  %v5279_v30 = vpop.f32.mrf.mxu3  ;;  %8194 = vmatmul.msk.f32.gmra.mxu0 %vm2147_vm10, %v10967_v57  ;;  %8210 = vmatmul.msk.f32.gmra.mxu1 %vm2147_vm10, %v10967_v57 }
 0x64b   : > { %8038 = vst [vmem:[%s8936_s26 + $0xd40] sm:$0xff] %v5214_v29 }
 0x64c   : > { %8039 = vst [vmem:[%s8936_s26 + $0xd48] sm:$0xff] %v5279_v30 }
 0x64f   : > { %8131 = vmatmul.msk.f32.gmra.mxu2 %vm2147_vm10, %v10982_v62  ;;  %8147 = vmatmul.msk.f32.gmra.mxu3 %vm2147_vm10, %v10982_v62  ;;  %v5447_v54 = vpop.f32.mrf.mxu0  ;;  %v5512_v36 = vpop.f32.mrf.mxu1 }
 0x650   : > { %8104 = vst [vmem:[%s8936_s26 + $0xe50] sm:$0xff] %v5447_v54 }
 0x651   : > { %8105 = vst [vmem:[%s8936_s26 + $0xe58] sm:$0xff] %v5512_v36 }
 0x652   : > { %v5217_v33 = vpop.f32.mrf.mxu2  ;;  %v5282_v37 = vpop.f32.mrf.mxu3  ;;  %8195 = vmatmul.msk.f32.gmra.mxu0 %vm2147_vm10, %v10982_v62  ;;  %8211 = vmatmul.msk.f32.gmra.mxu1 %vm2147_vm10, %v10982_v62 }
 0x653   : > { %8040 = vst [vmem:[%s8936_s26 + $0xd50] sm:$0xff] %v5217_v33 }
 0x654   : > { %8041 = vst [vmem:[%s8936_s26 + $0xd58] sm:$0xff] %v5282_v37 }
 0x657   : > { %8132 = vmatmul.msk.f32.gmra.mxu2 %vm2147_vm10, %v10997_v19  ;;  %8148 = vmatmul.msk.f32.gmra.mxu3 %vm2147_vm10, %v10997_v19  ;;  %v5450_v38 = vpop.f32.mrf.mxu0  ;;  %v5515_v16 = vpop.f32.mrf.mxu1 }
 0x658   : > { %8106 = vst [vmem:[%s8936_s26 + $0xe60] sm:$0xff] %v5450_v38 }
 0x659   : > { %8107 = vst [vmem:[%s8936_s26 + $0xe68] sm:$0xff] %v5515_v16 }
 0x65a   : > { %v5220_v40 = vpop.f32.mrf.mxu2  ;;  %v5285_v50 = vpop.f32.mrf.mxu3  ;;  %8196 = vmatmul.msk.f32.gmra.mxu0 %vm2147_vm10, %v10997_v19  ;;  %8212 = vmatmul.msk.f32.gmra.mxu1 %vm2147_vm10, %v10997_v19 }
 0x65b   : > { %8042 = vst [vmem:[%s8936_s26 + $0xd60] sm:$0xff] %v5220_v40 }
 0x65c   : > { %8043 = vst [vmem:[%s8936_s26 + $0xd68] sm:$0xff] %v5285_v50 }
 0x65f   : > { %8133 = vmatmul.msk.f32.gmra.mxu2 %vm2147_vm10, %v10772_v3  ;;  %8149 = vmatmul.msk.f32.gmra.mxu3 %vm2147_vm10, %v10772_v3  ;;  %v5453_v42 = vpop.f32.mrf.mxu0  ;;  %v5518_v43 = vpop.f32.mrf.mxu1 }
 0x660   : > { %8108 = vst [vmem:[%s8936_s26 + $0xe70] sm:$0xff] %v5453_v42 }
 0x661   : > { %8109 = vst [vmem:[%s8936_s26 + $0xe78] sm:$0xff] %v5518_v43 }
 0x662   : > { %v5223_v55 = vpop.f32.mrf.mxu2  ;;  %v5288_v44 = vpop.f32.mrf.mxu3  ;;  %8197 = vmatmul.msk.f32.gmra.mxu0 %vm2147_vm10, %v10772_v3  ;;  %8213 = vmatmul.msk.f32.gmra.mxu1 %vm2147_vm10, %v10772_v3 }
 0x663   : > { %8044 = vst [vmem:[%s8936_s26 + $0xd70] sm:$0xff] %v5223_v55 }
 0x664   : > { %8045 = vst [vmem:[%s8936_s26 + $0xd78] sm:$0xff] %v5288_v44 }
 0x667   : > { %8134 = vmatmul.msk.f32.gmra.mxu2 %vm2147_vm10, %v10787_v8  ;;  %8150 = vmatmul.msk.f32.gmra.mxu3 %vm2147_vm10, %v10787_v8  ;;  %v5456_v20 = vpop.f32.mrf.mxu0  ;;  %v5521_v32 = vpop.f32.mrf.mxu1 }
 0x668   : > { %8110 = vst [vmem:[%s8936_s26 + $0xe80] sm:$0xff] %v5456_v20 }
 0x669   : > { %8111 = vst [vmem:[%s8936_s26 + $0xe88] sm:$0xff] %v5521_v32 }
 0x66a   : > { %v5226_v47 = vpop.f32.mrf.mxu2  ;;  %v5291_v48 = vpop.f32.mrf.mxu3  ;;  %8198 = vmatmul.msk.f32.gmra.mxu0 %vm2147_vm10, %v10787_v8  ;;  %8214 = vmatmul.msk.f32.gmra.mxu1 %vm2147_vm10, %v10787_v8 }
 0x66b   : > { %8046 = vst [vmem:[%s8936_s26 + $0xd80] sm:$0xff] %v5226_v47 }
 0x66c   : > { %8047 = vst [vmem:[%s8936_s26 + $0xd88] sm:$0xff] %v5291_v48 }
 0x66f   : > { %8135 = vmatmul.msk.f32.gmra.mxu2 %vm2147_vm10, %v10802_v59  ;;  %8151 = vmatmul.msk.f32.gmra.mxu3 %vm2147_vm10, %v10802_v59  ;;  %v5459_v3 = vpop.f32.mrf.mxu0  ;;  %v5524_v63 = vpop.f32.mrf.mxu1 }
 0x670   : > { %8112 = vst [vmem:[%s8936_s26 + $0xe90] sm:$0xff] %v5459_v3 }
 0x671   : > { %8113 = vst [vmem:[%s8936_s26 + $0xe98] sm:$0xff] %v5524_v63 }
 0x672   : > { %v5229_v49 = vpop.f32.mrf.mxu2  ;;  %v5294_v51 = vpop.f32.mrf.mxu3  ;;  %8199 = vmatmul.msk.f32.gmra.mxu0 %vm2147_vm10, %v10802_v59  ;;  %8215 = vmatmul.msk.f32.gmra.mxu1 %vm2147_vm10, %v10802_v59 }
 0x673   : > { %8048 = vst [vmem:[%s8936_s26 + $0xd90] sm:$0xff] %v5229_v49 }
 0x674   : > { %8049 = vst [vmem:[%s8936_s26 + $0xd98] sm:$0xff] %v5294_v51 }
 0x677   : > { %8136 = vmatmul.msk.f32.gmra.mxu2 %vm2147_vm10, %v10817_v12  ;;  %8152 = vmatmul.msk.f32.gmra.mxu3 %vm2147_vm10, %v10817_v12  ;;  %v5462_v8 = vpop.f32.mrf.mxu0  ;;  %v5527_v24 = vpop.f32.mrf.mxu1 }
 0x678   : > { %8114 = vst [vmem:[%s8936_s26 + $0xea0] sm:$0xff] %v5462_v8 }
 0x679   : > { %8115 = vst [vmem:[%s8936_s26 + $0xea8] sm:$0xff] %v5527_v24 }
 0x67a   : > { %v5232_v53 = vpop.f32.mrf.mxu2  ;;  %v5297_v60 = vpop.f32.mrf.mxu3  ;;  %8200 = vmatmul.msk.f32.gmra.mxu0 %vm2147_vm10, %v10817_v12  ;;  %8216 = vmatmul.msk.f32.gmra.mxu1 %vm2147_vm10, %v10817_v12 }
 0x67b   : > { %8050 = vst [vmem:[%s8936_s26 + $0xda0] sm:$0xff] %v5232_v53  ;;  %v11426_v53 = vld [vmem:[%s8934_s6 + $0x48] sm:$0xff] }
 0x67c   : > { %8051 = vst [vmem:[%s8936_s26 + $0xda8] sm:$0xff] %v5297_v60 }
 0x67f   : > { %8137 = vmatmul.msk.f32.gmra.mxu2 %vm2147_vm10, %v10832_v23  ;;  %8153 = vmatmul.msk.f32.gmra.mxu3 %vm2147_vm10, %v10832_v23  ;;  %v5465_v59 = vpop.f32.mrf.mxu0  ;;  %v5530_v26 = vpop.f32.mrf.mxu1 }
 0x680   : > { %8116 = vst [vmem:[%s8936_s26 + $0xeb0] sm:$0xff] %v5465_v59 }
 0x681   : > { %8117 = vst [vmem:[%s8936_s26 + $0xeb8] sm:$0xff] %v5530_v26 }
 0x682   : > { %v5235_v56 = vpop.f32.mrf.mxu2  ;;  %v5300_v17 = vpop.f32.mrf.mxu3  ;;  %8201 = vmatmul.msk.f32.gmra.mxu0 %vm2147_vm10, %v10832_v23  ;;  %8217 = vmatmul.msk.f32.gmra.mxu1 %vm2147_vm10, %v10832_v23 }
 0x683   : > { %8052 = vst [vmem:[%s8936_s26 + $0xdb0] sm:$0xff] %v5235_v56 }
 0x684   : > { %8053 = vst [vmem:[%s8936_s26 + $0xdb8] sm:$0xff] %v5300_v17  ;;  %v11441_v17 = vld [vmem:[%s8934_s6 + $0x50] sm:$0xff] }
 0x687   : > { %8138 = vmatmul.msk.f32.gmra.mxu2 %vm2147_vm10, %v10847_v9  ;;  %8154 = vmatmul.msk.f32.gmra.mxu3 %vm2147_vm10, %v10847_v9  ;;  %v5468_v12 = vpop.f32.mrf.mxu0  ;;  %v5533_v58 = vpop.f32.mrf.mxu1 }
 0x688   : > { %8118 = vst [vmem:[%s8936_s26 + $0xec0] sm:$0xff] %v5468_v12 }
 0x689   : > { %8119 = vst [vmem:[%s8936_s26 + $0xec8] sm:$0xff] %v5533_v58 }
 0x68a   : > { %v5238_v23 = vpop.f32.mrf.mxu2  ;;  %v5303_v34 = vpop.f32.mrf.mxu3  ;;  %8202 = vmatmul.msk.f32.gmra.mxu0 %vm2147_vm10, %v10847_v9  ;;  %8218 = vmatmul.msk.f32.gmra.mxu1 %vm2147_vm10, %v10847_v9 }
 0x68b   : > { %8054 = vst [vmem:[%s8936_s26 + $0xdc0] sm:$0xff] %v5238_v23  ;;  %v11456_v23 = vld [vmem:[%s8934_s6 + $0x58] sm:$0xff] }
 0x68c   : > { %8055 = vst [vmem:[%s8936_s26 + $0xdc8] sm:$0xff] %v5303_v34 }
 0x68f   : > { %8139 = vmatmul.msk.f32.gmra.mxu2 %vm2147_vm10, %v10862_v31  ;;  %8155 = vmatmul.msk.f32.gmra.mxu3 %vm2147_vm10, %v10862_v31  ;;  %v5471_v2 = vpop.f32.mrf.mxu0  ;;  %v5536_v4 = vpop.f32.mrf.mxu1 }
 0x690   : > { %8120 = vst [vmem:[%s8936_s26 + $0xed0] sm:$0xff] %v5471_v2 }
 0x691   : > { %8121 = vst [vmem:[%s8936_s26 + $0xed8] sm:$0xff] %v5536_v4  ;;  %v11471_v4 = vld [vmem:[%s8934_s6 + $0x60] sm:$0xff] }
 0x692   : > { %v5241_v9 = vpop.f32.mrf.mxu2  ;;  %v5306_v21 = vpop.f32.mrf.mxu3  ;;  %8203 = vmatmul.msk.f32.gmra.mxu0 %vm2147_vm10, %v10862_v31  ;;  %8219 = vmatmul.msk.f32.gmra.mxu1 %vm2147_vm10, %v10862_v31 }
 0x693   : > { %8056 = vst [vmem:[%s8936_s26 + $0xdd0] sm:$0xff] %v5241_v9 }
 0x694   : > { %8057 = vst [vmem:[%s8936_s26 + $0xdd8] sm:$0xff] %v5306_v21 }
 0x697   : > { %8140 = vmatmul.msk.f32.gmra.mxu2 %vm2147_vm10, %v10877_v35  ;;  %8156 = vmatmul.msk.f32.gmra.mxu3 %vm2147_vm10, %v10877_v35  ;;  %v5474_v6 = vpop.f32.mrf.mxu0  ;;  %v5539_v7 = vpop.f32.mrf.mxu1 }
 0x698   : > { %8122 = vst [vmem:[%s8936_s26 + $0xee0] sm:$0xff] %v5474_v6 }
 0x699   : > { %8123 = vst [vmem:[%s8936_s26 + $0xee8] sm:$0xff] %v5539_v7 }
 0x69a   : > { %v5244_v14 = vpop.f32.mrf.mxu2  ;;  %v5309_v10 = vpop.f32.mrf.mxu3  ;;  %8204 = vmatmul.msk.f32.gmra.mxu0 %vm2147_vm10, %v10877_v35  ;;  %8220 = vmatmul.msk.f32.gmra.mxu1 %vm2147_vm10, %v10877_v35 }
 0x69b   : > { %8058 = vst [vmem:[%s8936_s26 + $0xde0] sm:$0xff] %v5244_v14  ;;  %v11486_v14 = vld [vmem:[%s8934_s6 + $0x68] sm:$0xff] }
 0x69c   : > { %8059 = vst [vmem:[%s8936_s26 + $0xde8] sm:$0xff] %v5309_v10 }
 0x69f   : > { %8141 = vmatmul.msk.f32.gmra.mxu2 %vm2147_vm10, %v10892_v46  ;;  %8157 = vmatmul.msk.f32.gmra.mxu3 %vm2147_vm10, %v10892_v46  ;;  %v5477_v31 = vpop.f32.mrf.mxu0  ;;  %v5542_v11 = vpop.f32.mrf.mxu1 }
 0x6a0   : > { %8124 = vst [vmem:[%s8936_s26 + $0xef0] sm:$0xff] %v5477_v31 }
 0x6a1   : > { %8125 = vst [vmem:[%s8936_s26 + $0xef8] sm:$0xff] %v5542_v11 }
 0x6a2   : > { %v5247_v13 = vpop.f32.mrf.mxu2  ;;  %v5312_v25 = vpop.f32.mrf.mxu3  ;;  %8205 = vmatmul.msk.f32.gmra.mxu0 %vm2147_vm10, %v10892_v46  ;;  %8221 = vmatmul.msk.f32.gmra.mxu1 %vm2147_vm10, %v10892_v46 }
 0x6a3   : > { %8060 = vst [vmem:[%s8936_s26 + $0xdf0] sm:$0xff] %v5247_v13 }
 0x6a4   : > { %8061 = vst [vmem:[%s8936_s26 + $0xdf8] sm:$0xff] %v5312_v25  ;;  %v11501_v25 = vld [vmem:[%s8934_s6 + $0x70] sm:$0xff] }
 0x6a7   : > { %8254 = vmatmul.msk.f32.vlgmr.msrb.gmra.mxu2 %vm2147_vm10, %v10907_v41  ;;  %8270 = vmatmul.msk.f32.vlgmr.msrb.gmra.mxu3 %vm2147_vm10, %v10907_v41  ;;  %v5892_v35 = vpop.f32.mrf.mxu0  ;;  %v5957_v15 = vpop.f32.mrf.mxu1 }
 0x6a8   : > { %8222 = vst [vmem:[%s8936_s26 + $0x1000] sm:$0xff] %v5892_v35 }
 0x6a9   : > { %8223 = vst [vmem:[%s8936_s26 + $0x1008] sm:$0xff] %v5957_v15 }
 0x6aa   : > { %v5662_v18 = vpop.f32.mrf.mxu2  ;;  %v5727_v27 = vpop.f32.mrf.mxu3  ;;  %8318 = vmatmul.msk.f32.vlgmr.msrb.gmra.mxu0 %vm2147_vm10, %v10907_v41  ;;  %8334 = vmatmul.msk.f32.vlgmr.msrb.gmra.mxu1 %vm2147_vm10, %v10907_v41 }
 0x6ab   : > { %8158 = vst [vmem:[%s8936_s26 + $0xf00] sm:$0xff] %v5662_v18 }
 0x6ac   : > { %8159 = vst [vmem:[%s8936_s26 + $0xf08] sm:$0xff] %v5727_v27 }
 0x6af   : > { %8255 = vmatmul.msk.f32.gmra.mxu2 %vm2147_vm10, %v10922_v45  ;;  %8271 = vmatmul.msk.f32.gmra.mxu3 %vm2147_vm10, %v10922_v45  ;;  %v5895_v46 = vpop.f32.mrf.mxu0  ;;  %v5960_v28 = vpop.f32.mrf.mxu1 }
 0x6b0   : > { %8224 = vst [vmem:[%s8936_s26 + $0x1010] sm:$0xff] %v5895_v46  ;;  %v11516_v46 = vld [vmem:[%s8934_s6 + $0x78] sm:$0xff] }
 0x6b1   : > { %8225 = vst [vmem:[%s8936_s26 + $0x1018] sm:$0xff] %v5960_v28 }
 0x6b2   : > { %v5665_v39 = vpop.f32.mrf.mxu2  ;;  %v5730_v29 = vpop.f32.mrf.mxu3  ;;  %8319 = vmatmul.msk.f32.gmra.mxu0 %vm2147_vm10, %v10922_v45  ;;  %8335 = vmatmul.msk.f32.gmra.mxu1 %vm2147_vm10, %v10922_v45 }
 0x6b3   : > { %8160 = vst [vmem:[%s8936_s26 + $0xf10] sm:$0xff] %v5665_v39 }
 0x6b4   : > { %8161 = vst [vmem:[%s8936_s26 + $0xf18] sm:$0xff] %v5730_v29 }
 0x6b7   : > { %8256 = vmatmul.msk.f32.gmra.mxu2 %vm2147_vm10, %v10937_v22  ;;  %8272 = vmatmul.msk.f32.gmra.mxu3 %vm2147_vm10, %v10937_v22  ;;  %v5898_v41 = vpop.f32.mrf.mxu0  ;;  %v5963_v30 = vpop.f32.mrf.mxu1 }
 0x6b8   : > { %8226 = vst [vmem:[%s8936_s26 + $0x1020] sm:$0xff] %v5898_v41 }
 0x6b9   : > { %8227 = vst [vmem:[%s8936_s26 + $0x1028] sm:$0xff] %v5963_v30  ;;  %v6498_v30 = vld [vmem:[%s8934_s6] sm:$0xff] }
 0x6ba   : > { %v5668_v54 = vpop.f32.mrf.mxu2  ;;  %v5733_v36 = vpop.f32.mrf.mxu3  ;;  %8320 = vmatmul.msk.f32.gmra.mxu0 %vm2147_vm10, %v10937_v22  ;;  %8336 = vmatmul.msk.f32.gmra.mxu1 %vm2147_vm10, %v10937_v22 }
 0x6bb   : > { %8162 = vst [vmem:[%s8936_s26 + $0xf20] sm:$0xff] %v5668_v54 }
 0x6bc   : > { %8163 = vst [vmem:[%s8936_s26 + $0xf28] sm:$0xff] %v5733_v36 }
 0x6bf   : > { %8257 = vmatmul.msk.f32.gmra.mxu2 %vm2147_vm10, %v10952_v52  ;;  %8273 = vmatmul.msk.f32.gmra.mxu3 %vm2147_vm10, %v10952_v52  ;;  %v5901_v45 = vpop.f32.mrf.mxu0  ;;  %v5966_v33 = vpop.f32.mrf.mxu1 }
 0x6c0   : > { %8228 = vst [vmem:[%s8936_s26 + $0x1030] sm:$0xff] %v5901_v45 }
 0x6c1   : > { %8229 = vst [vmem:[%s8936_s26 + $0x1038] sm:$0xff] %v5966_v33 }
 0x6c2   : > { %v5671_v37 = vpop.f32.mrf.mxu2  ;;  %v5736_v38 = vpop.f32.mrf.mxu3  ;;  %8321 = vmatmul.msk.f32.gmra.mxu0 %vm2147_vm10, %v10952_v52  ;;  %8337 = vmatmul.msk.f32.gmra.mxu1 %vm2147_vm10, %v10952_v52 }
 0x6c3   : > { %8164 = vst [vmem:[%s8936_s26 + $0xf30] sm:$0xff] %v5671_v37  ;;  %v6499_v37 = vld [vmem:[%s8934_s6 + $0x8] sm:$0xff] }
 0x6c4   : > { %8165 = vst [vmem:[%s8936_s26 + $0xf38] sm:$0xff] %v5736_v38 }
 0x6c7   : > { %8258 = vmatmul.msk.f32.gmra.mxu2 %vm2147_vm10, %v10967_v57  ;;  %8274 = vmatmul.msk.f32.gmra.mxu3 %vm2147_vm10, %v10967_v57  ;;  %v5904_v22 = vpop.f32.mrf.mxu0  ;;  %v5969_v16 = vpop.f32.mrf.mxu1 }
 0x6c8   : > { %8230 = vst [vmem:[%s8936_s26 + $0x1040] sm:$0xff] %v5904_v22 }
 0x6c9   : > { %8231 = vst [vmem:[%s8936_s26 + $0x1048] sm:$0xff] %v5969_v16 }
 0x6ca   : > { %v5674_v40 = vpop.f32.mrf.mxu2  ;;  %v5739_v50 = vpop.f32.mrf.mxu3  ;;  %8322 = vmatmul.msk.f32.gmra.mxu0 %vm2147_vm10, %v10967_v57  ;;  %8338 = vmatmul.msk.f32.gmra.mxu1 %vm2147_vm10, %v10967_v57 }
 0x6cb   : > { %8166 = vst [vmem:[%s8936_s26 + $0xf40] sm:$0xff] %v5674_v40 }
 0x6cc   : > { %8167 = vst [vmem:[%s8936_s26 + $0xf48] sm:$0xff] %v5739_v50  ;;  %v6500_v50 = vld [vmem:[%s8934_s6 + $0x10] sm:$0xff] }
 0x6cf   : > { %8259 = vmatmul.msk.f32.gmra.mxu2 %vm2147_vm10, %v10982_v62  ;;  %8275 = vmatmul.msk.f32.gmra.mxu3 %vm2147_vm10, %v10982_v62  ;;  %v5907_v52 = vpop.f32.mrf.mxu0  ;;  %v5972_v42 = vpop.f32.mrf.mxu1 }
 0x6d0   : > { %8232 = vst [vmem:[%s8936_s26 + $0x1050] sm:$0xff] %v5907_v52 }
 0x6d1   : > { %8233 = vst [vmem:[%s8936_s26 + $0x1058] sm:$0xff] %v5972_v42 }
 0x6d2   : > { %v5677_v43 = vpop.f32.mrf.mxu2  ;;  %v5742_v55 = vpop.f32.mrf.mxu3  ;;  %8323 = vmatmul.msk.f32.gmra.mxu0 %vm2147_vm10, %v10982_v62  ;;  %8339 = vmatmul.msk.f32.gmra.mxu1 %vm2147_vm10, %v10982_v62  ;;  %v11396_v62 = vld [vmem:[%s8934_s6 + $0x38] sm:$0xff] }
 0x6d3   : > { %8168 = vst [vmem:[%s8936_s26 + $0xf50] sm:$0xff] %v5677_v43 }
 0x6d4   : > { %8169 = vst [vmem:[%s8936_s26 + $0xf58] sm:$0xff] %v5742_v55 }
 0x6d7   : > { %8260 = vmatmul.msk.f32.gmra.mxu2 %vm2147_vm10, %v10997_v19  ;;  %8276 = vmatmul.msk.f32.gmra.mxu3 %vm2147_vm10, %v10997_v19  ;;  %v5910_v57 = vpop.f32.mrf.mxu0  ;;  %v5975_v44 = vpop.f32.mrf.mxu1 }
 0x6d8   : > { %8234 = vst [vmem:[%s8936_s26 + $0x1060] sm:$0xff] %v5910_v57  ;;  %v6501_v57 = vld [vmem:[%s8934_s6 + $0x18] sm:$0xff] }
 0x6d9   : > { %8235 = vst [vmem:[%s8936_s26 + $0x1068] sm:$0xff] %v5975_v44 }
 0x6da   : > { %v5680_v20 = vpop.f32.mrf.mxu2  ;;  %v5745_v32 = vpop.f32.mrf.mxu3  ;;  %8324 = vmatmul.msk.f32.gmra.mxu0 %vm2147_vm10, %v10997_v19  ;;  %8340 = vmatmul.msk.f32.gmra.mxu1 %vm2147_vm10, %v10997_v19  ;;  %v11411_v19 = vld [vmem:[%s8934_s6 + $0x40] sm:$0xff] }
 0x6db   : > { %8170 = vst [vmem:[%s8936_s26 + $0xf60] sm:$0xff] %v5680_v20 }
 0x6dc   : > { %8171 = vst [vmem:[%s8936_s26 + $0xf68] sm:$0xff] %v5745_v32 }
 0x6df   : > { %8261 = vmatmul.msk.f32.gmra.mxu2 %vm2147_vm10, %v11396_v62  ;;  %8277 = vmatmul.msk.f32.gmra.mxu3 %vm2147_vm10, %v11396_v62  ;;  %v5913_v47 = vpop.f32.mrf.mxu0  ;;  %v5978_v48 = vpop.f32.mrf.mxu1 }
 0x6e0   : > { %8236 = vst [vmem:[%s8936_s26 + $0x1070] sm:$0xff] %v5913_v47 }
 0x6e1   : > { %8237 = vst [vmem:[%s8936_s26 + $0x1078] sm:$0xff] %v5978_v48  ;;  %v6502_v48 = vld [vmem:[%s8934_s6 + $0x20] sm:$0xff] }
 0x6e2   : > { %v5683_v3 = vpop.f32.mrf.mxu2  ;;  %v5748_v63 = vpop.f32.mrf.mxu3  ;;  %8325 = vmatmul.msk.f32.gmra.mxu0 %vm2147_vm10, %v11396_v62  ;;  %8341 = vmatmul.msk.f32.gmra.mxu1 %vm2147_vm10, %v11396_v62 }
 0x6e3   : > { %8172 = vst [vmem:[%s8936_s26 + $0xf70] sm:$0xff] %v5683_v3 }
 0x6e4   : > { %8173 = vst [vmem:[%s8936_s26 + $0xf78] sm:$0xff] %v5748_v63 }
 0x6e7   : > { %8262 = vmatmul.msk.f32.gmra.mxu2 %vm2147_vm10, %v11411_v19  ;;  %8278 = vmatmul.msk.f32.gmra.mxu3 %vm2147_vm10, %v11411_v19  ;;  %v5916_v49 = vpop.f32.mrf.mxu0  ;;  %v5981_v51 = vpop.f32.mrf.mxu1 }
 0x6e8   : > { %8238 = vst [vmem:[%s8936_s26 + $0x1080] sm:$0xff] %v5916_v49 }
 0x6e9   : > { %8239 = vst [vmem:[%s8936_s26 + $0x1088] sm:$0xff] %v5981_v51 }
 0x6ea   : > { %v5686_v8 = vpop.f32.mrf.mxu2  ;;  %v5751_v24 = vpop.f32.mrf.mxu3  ;;  %8326 = vmatmul.msk.f32.gmra.mxu0 %vm2147_vm10, %v11411_v19  ;;  %8342 = vmatmul.msk.f32.gmra.mxu1 %vm2147_vm10, %v11411_v19 }
 0x6eb   : > { %8174 = vst [vmem:[%s8936_s26 + $0xf80] sm:$0xff] %v5686_v8  ;;  %v6503_v8 = vld [vmem:[%s8934_s6 + $0x28] sm:$0xff] }
 0x6ec   : > { %8175 = vst [vmem:[%s8936_s26 + $0xf88] sm:$0xff] %v5751_v24 }
 0x6ef   : > { %8263 = vmatmul.msk.f32.gmra.mxu2 %vm2147_vm10, %v11426_v53  ;;  %8279 = vmatmul.msk.f32.gmra.mxu3 %vm2147_vm10, %v11426_v53  ;;  %v5919_v60 = vpop.f32.mrf.mxu0  ;;  %v5984_v59 = vpop.f32.mrf.mxu1 }
 0x6f0   : > { %8240 = vst [vmem:[%s8936_s26 + $0x1090] sm:$0xff] %v5919_v60 }
 0x6f1   : > { %8241 = vst [vmem:[%s8936_s26 + $0x1098] sm:$0xff] %v5984_v59 }
 0x6f2   : > { %v5689_v26 = vpop.f32.mrf.mxu2  ;;  %v5754_v56 = vpop.f32.mrf.mxu3  ;;  %8327 = vmatmul.msk.f32.gmra.mxu0 %vm2147_vm10, %v11426_v53  ;;  %8343 = vmatmul.msk.f32.gmra.mxu1 %vm2147_vm10, %v11426_v53 }
 0x6f3   : > { %8176 = vst [vmem:[%s8936_s26 + $0xf90] sm:$0xff] %v5689_v26 }
 0x6f4   : > { %8177 = vst [vmem:[%s8936_s26 + $0xf98] sm:$0xff] %v5754_v56  ;;  %v6504_v56 = vld [vmem:[%s8934_s6 + $0x30] sm:$0xff]  ;;  %s6959_s6 = scalar_lea.sflag [#allocation5], %s311_s24 }
 0x6f7   : > { %8264 = vmatmul.msk.f32.gmra.mxu2 %vm2147_vm10, %v11441_v17  ;;  %8280 = vmatmul.msk.f32.gmra.mxu3 %vm2147_vm10, %v11441_v17  ;;  %v5922_v12 = vpop.f32.mrf.mxu0  ;;  %v5987_v58 = vpop.f32.mrf.mxu1 }
 0x6f8   : > { %8242 = vst [vmem:[%s8936_s26 + $0x10a0] sm:$0xff] %v5922_v12 }
 0x6f9   : > { %8243 = vst [vmem:[%s8936_s26 + $0x10a8] sm:$0xff] %v5987_v58 }
 0x6fa   : > { %v5692_v61 = vpop.f32.mrf.mxu2  ;;  %v5757_v1 = vpop.f32.mrf.mxu3  ;;  %8328 = vmatmul.msk.f32.gmra.mxu0 %vm2147_vm10, %v11441_v17  ;;  %8344 = vmatmul.msk.f32.gmra.mxu1 %vm2147_vm10, %v11441_v17 }
 0x6fb   : > { %8178 = vst [vmem:[%s8936_s26 + $0xfa0] sm:$0xff] %v5692_v61 }
 0x6fc   : > { %8179 = vst [vmem:[%s8936_s26 + $0xfa8] sm:$0xff] %v5757_v1 }
 0x6ff   : > { %8265 = vmatmul.msk.f32.gmra.mxu2 %vm2147_vm10, %v11456_v23  ;;  %8281 = vmatmul.msk.f32.gmra.mxu3 %vm2147_vm10, %v11456_v23  ;;  %v5925_v34 = vpop.f32.mrf.mxu0  ;;  %v5990_v5 = vpop.f32.mrf.mxu1 }
 0x700   : > { %8244 = vst [vmem:[%s8936_s26 + $0x10b0] sm:$0xff] %v5925_v34 }
 0x701   : > { %8245 = vst [vmem:[%s8936_s26 + $0x10b8] sm:$0xff] %v5990_v5 }
 0x702   : > { %v5695_v0 = vpop.f32.mrf.mxu2  ;;  %v5760_v2 = vpop.f32.mrf.mxu3  ;;  %8329 = vmatmul.msk.f32.gmra.mxu0 %vm2147_vm10, %v11456_v23  ;;  %8345 = vmatmul.msk.f32.gmra.mxu1 %vm2147_vm10, %v11456_v23 }
 0x703   : > { %8180 = vst [vmem:[%s8936_s26 + $0xfb0] sm:$0xff] %v5695_v0 }
 0x704   : > { %8181 = vst [vmem:[%s8936_s26 + $0xfb8] sm:$0xff] %v5760_v2 }
 0x707   : > { %8266 = vmatmul.msk.f32.gmra.mxu2 %vm2147_vm10, %v11471_v4  ;;  %8282 = vmatmul.msk.f32.gmra.mxu3 %vm2147_vm10, %v11471_v4  ;;  %v5928_v9 = vpop.f32.mrf.mxu0  ;;  %v5993_v21 = vpop.f32.mrf.mxu1 }
 0x708   : > { %8246 = vst [vmem:[%s8936_s26 + $0x10c0] sm:$0xff] %v5928_v9 }
 0x709   : > { %8247 = vst [vmem:[%s8936_s26 + $0x10c8] sm:$0xff] %v5993_v21 }
 0x70a   : > { %v5698_v6 = vpop.f32.mrf.mxu2  ;;  %v5763_v7 = vpop.f32.mrf.mxu3  ;;  %8330 = vmatmul.msk.f32.gmra.mxu0 %vm2147_vm10, %v11471_v4  ;;  %8346 = vmatmul.msk.f32.gmra.mxu1 %vm2147_vm10, %v11471_v4 }
 0x70b   : > { %8182 = vst [vmem:[%s8936_s26 + $0xfc0] sm:$0xff] %v5698_v6 }
 0x70c   : > { %8183 = vst [vmem:[%s8936_s26 + $0xfc8] sm:$0xff] %v5763_v7 }
 0x70f   : > { %8267 = vmatmul.msk.f32.gmra.mxu2 %vm2147_vm10, %v11486_v14  ;;  %8283 = vmatmul.msk.f32.gmra.mxu3 %vm2147_vm10, %v11486_v14  ;;  %v5931_v10 = vpop.f32.mrf.mxu0  ;;  %v5996_v31 = vpop.f32.mrf.mxu1 }
 0x710   : > { %8248 = vst [vmem:[%s8936_s26 + $0x10d0] sm:$0xff] %v5931_v10 }
 0x711   : > { %8249 = vst [vmem:[%s8936_s26 + $0x10d8] sm:$0xff] %v5996_v31 }
 0x712   : > { %v5701_v11 = vpop.f32.mrf.mxu2  ;;  %v5766_v13 = vpop.f32.mrf.mxu3  ;;  %8331 = vmatmul.msk.f32.gmra.mxu0 %vm2147_vm10, %v11486_v14  ;;  %8347 = vmatmul.msk.f32.gmra.mxu1 %vm2147_vm10, %v11486_v14 }
 0x713   : > { %8184 = vst [vmem:[%s8936_s26 + $0xfd0] sm:$0xff] %v5701_v11 }
 0x714   : > { %8185 = vst [vmem:[%s8936_s26 + $0xfd8] sm:$0xff] %v5766_v13 }
 0x717   : > { %8268 = vmatmul.msk.f32.gmra.mxu2 %vm2147_vm10, %v11501_v25  ;;  %8284 = vmatmul.msk.f32.gmra.mxu3 %vm2147_vm10, %v11501_v25  ;;  %v5934_v35 = vpop.f32.mrf.mxu0  ;;  %v5999_v15 = vpop.f32.mrf.mxu1 }
 0x718   : > { %8250 = vst [vmem:[%s8936_s26 + $0x10e0] sm:$0xff] %v5934_v35 }
 0x719   : > { %8251 = vst [vmem:[%s8936_s26 + $0x10e8] sm:$0xff] %v5999_v15 }
 0x71a   : > { %v5704_v18 = vpop.f32.mrf.mxu2  ;;  %v5769_v27 = vpop.f32.mrf.mxu3  ;;  %8332 = vmatmul.msk.f32.gmra.mxu0 %vm2147_vm10, %v11501_v25  ;;  %8348 = vmatmul.msk.f32.gmra.mxu1 %vm2147_vm10, %v11501_v25 }
 0x71b   : > { %8186 = vst [vmem:[%s8936_s26 + $0xfe0] sm:$0xff] %v5704_v18 }
 0x71c   : > { %8187 = vst [vmem:[%s8936_s26 + $0xfe8] sm:$0xff] %v5769_v27 }
 0x71f   : > { %8269 = vmatmul.msk.f32.gmra.mxu2 %vm2147_vm10, %v11516_v46  ;;  %8285 = vmatmul.msk.f32.gmra.mxu3 %vm2147_vm10, %v11516_v46  ;;  %v5937_v28 = vpop.f32.mrf.mxu0  ;;  %v6002_v39 = vpop.f32.mrf.mxu1 }
 0x720   : > { %8252 = vst [vmem:[%s8936_s26 + $0x10f0] sm:$0xff] %v5937_v28 }
 0x721   : > { %8253 = vst [vmem:[%s8936_s26 + $0x10f8] sm:$0xff] %v6002_v39 }
 0x722   : > { %v5707_v29 = vpop.f32.mrf.mxu2  ;;  %v5772_v41 = vpop.f32.mrf.mxu3  ;;  %8333 = vmatmul.msk.f32.gmra.mxu0 %vm2147_vm10, %v11516_v46  ;;  %8349 = vmatmul.msk.f32.gmra.mxu1 %vm2147_vm10, %v11516_v46 }
 0x723   : > { %8188 = vst [vmem:[%s8936_s26 + $0xff0] sm:$0xff] %v5707_v29 }
 0x724   : > { %8189 = vst [vmem:[%s8936_s26 + $0xff8] sm:$0xff] %v5772_v41 }
 0x727   : > { %8382 = vmatmul.msk.f32.vlgmr.msra.gmra.mxu2 %vm2147_vm10, %v6498_v30  ;;  %8398 = vmatmul.msk.f32.vlgmr.msra.gmra.mxu3 %vm2147_vm10, %v6498_v30  ;;  %v6352_v54 = vpop.f32.mrf.mxu0  ;;  %v6417_v36 = vpop.f32.mrf.mxu1 }
 0x728   : > { %8350 = vst [vmem:[%s8936_s26 + $0x1200] sm:$0xff] %v6352_v54 }
 0x729   : > { %8351 = vst [vmem:[%s8936_s26 + $0x1208] sm:$0xff] %v6417_v36 }
 0x72a   : > { %v6122_v45 = vpop.f32.mrf.mxu2  ;;  %v6187_v33 = vpop.f32.mrf.mxu3  ;;  %8446 = vmatmul.msk.f32.vlgmr.msra.gmra.mxu0 %vm2147_vm10, %v6498_v30  ;;  %8462 = vmatmul.msk.f32.vlgmr.msra.gmra.mxu1 %vm2147_vm10, %v6498_v30 }
 0x72b   : > { %8286 = vst [vmem:[%s8936_s26 + $0x1100] sm:$0xff] %v6122_v45 }
 0x72c   : > { %8287 = vst [vmem:[%s8936_s26 + $0x1108] sm:$0xff] %v6187_v33 }
 0x72f   : > { %8383 = vmatmul.msk.f32.gmra.mxu2 %vm2147_vm10, %v6499_v37  ;;  %8399 = vmatmul.msk.f32.gmra.mxu3 %vm2147_vm10, %v6499_v37  ;;  %v6355_v38 = vpop.f32.mrf.mxu0  ;;  %v6420_v22 = vpop.f32.mrf.mxu1 }
 0x730   : > { %8352 = vst [vmem:[%s8936_s26 + $0x1210] sm:$0xff] %v6355_v38 }
 0x731   : > { %8353 = vst [vmem:[%s8936_s26 + $0x1218] sm:$0xff] %v6420_v22 }
 0x732   : > { %v6125_v16 = vpop.f32.mrf.mxu2  ;;  %v6190_v40 = vpop.f32.mrf.mxu3  ;;  %8447 = vmatmul.msk.f32.gmra.mxu0 %vm2147_vm10, %v6499_v37  ;;  %8463 = vmatmul.msk.f32.gmra.mxu1 %vm2147_vm10, %v6499_v37 }
 0x733   : > { %8288 = vst [vmem:[%s8936_s26 + $0x1110] sm:$0xff] %v6125_v16 }
 0x734   : > { %8289 = vst [vmem:[%s8936_s26 + $0x1118] sm:$0xff] %v6190_v40 }
 0x737   : > { %8384 = vmatmul.msk.f32.gmra.mxu2 %vm2147_vm10, %v6500_v50  ;;  %8400 = vmatmul.msk.f32.gmra.mxu3 %vm2147_vm10, %v6500_v50  ;;  %v6358_v52 = vpop.f32.mrf.mxu0  ;;  %v6423_v42 = vpop.f32.mrf.mxu1 }
 0x738   : > { %8354 = vst [vmem:[%s8936_s26 + $0x1220] sm:$0xff] %v6358_v52 }
 0x739   : > { %8355 = vst [vmem:[%s8936_s26 + $0x1228] sm:$0xff] %v6423_v42 }
 0x73a   : > { %v6128_v43 = vpop.f32.mrf.mxu2  ;;  %v6193_v55 = vpop.f32.mrf.mxu3  ;;  %8448 = vmatmul.msk.f32.gmra.mxu0 %vm2147_vm10, %v6500_v50  ;;  %8464 = vmatmul.msk.f32.gmra.mxu1 %vm2147_vm10, %v6500_v50 }
 0x73b   : > { %8290 = vst [vmem:[%s8936_s26 + $0x1120] sm:$0xff] %v6128_v43 }
 0x73c   : > { %8291 = vst [vmem:[%s8936_s26 + $0x1128] sm:$0xff] %v6193_v55 }
 0x73f   : > { %8385 = vmatmul.msk.f32.gmra.mxu2 %vm2147_vm10, %v6501_v57  ;;  %8401 = vmatmul.msk.f32.gmra.mxu3 %vm2147_vm10, %v6501_v57  ;;  %v6361_v44 = vpop.f32.mrf.mxu0  ;;  %v6426_v20 = vpop.f32.mrf.mxu1 }
 0x740   : > { %8356 = vst [vmem:[%s8936_s26 + $0x1230] sm:$0xff] %v6361_v44 }
 0x741   : > { %8357 = vst [vmem:[%s8936_s26 + $0x1238] sm:$0xff] %v6426_v20 }
 0x742   : > { %v6131_v32 = vpop.f32.mrf.mxu2  ;;  %v6196_v47 = vpop.f32.mrf.mxu3  ;;  %8449 = vmatmul.msk.f32.gmra.mxu0 %vm2147_vm10, %v6501_v57  ;;  %8465 = vmatmul.msk.f32.gmra.mxu1 %vm2147_vm10, %v6501_v57 }
 0x743   : > { %8292 = vst [vmem:[%s8936_s26 + $0x1130] sm:$0xff] %v6131_v32 }
 0x744   : > { %8293 = vst [vmem:[%s8936_s26 + $0x1138] sm:$0xff] %v6196_v47 }
 0x747   : > { %8386 = vmatmul.msk.f32.gmra.mxu2 %vm2147_vm10, %v6502_v48  ;;  %8402 = vmatmul.msk.f32.gmra.mxu3 %vm2147_vm10, %v6502_v48  ;;  %v6364_v3 = vpop.f32.mrf.mxu0  ;;  %v6429_v63 = vpop.f32.mrf.mxu1 }
 0x748   : > { %8358 = vst [vmem:[%s8936_s26 + $0x1240] sm:$0xff] %v6364_v3 }
 0x749   : > { %8359 = vst [vmem:[%s8936_s26 + $0x1248] sm:$0xff] %v6429_v63 }
 0x74a   : > { %v6134_v49 = vpop.f32.mrf.mxu2  ;;  %v6199_v51 = vpop.f32.mrf.mxu3  ;;  %8450 = vmatmul.msk.f32.gmra.mxu0 %vm2147_vm10, %v6502_v48  ;;  %8466 = vmatmul.msk.f32.gmra.mxu1 %vm2147_vm10, %v6502_v48 }
 0x74b   : > { %8294 = vst [vmem:[%s8936_s26 + $0x1140] sm:$0xff] %v6134_v49 }
 0x74c   : > { %8295 = vst [vmem:[%s8936_s26 + $0x1148] sm:$0xff] %v6199_v51 }
 0x74f   : > { %8387 = vmatmul.msk.f32.gmra.mxu2 %vm2147_vm10, %v6503_v8  ;;  %8403 = vmatmul.msk.f32.gmra.mxu3 %vm2147_vm10, %v6503_v8  ;;  %v6367_v24 = vpop.f32.mrf.mxu0  ;;  %v6432_v60 = vpop.f32.mrf.mxu1 }
 0x750   : > { %8360 = vst [vmem:[%s8936_s26 + $0x1250] sm:$0xff] %v6367_v24 }
 0x751   : > { %8361 = vst [vmem:[%s8936_s26 + $0x1258] sm:$0xff] %v6432_v60 }
 0x752   : > { %v6137_v59 = vpop.f32.mrf.mxu2  ;;  %v6202_v26 = vpop.f32.mrf.mxu3  ;;  %8451 = vmatmul.msk.f32.gmra.mxu0 %vm2147_vm10, %v6503_v8  ;;  %8467 = vmatmul.msk.f32.gmra.mxu1 %vm2147_vm10, %v6503_v8 }
 0x753   : > { %8296 = vst [vmem:[%s8936_s26 + $0x1150] sm:$0xff] %v6137_v59 }
 0x754   : > { %8297 = vst [vmem:[%s8936_s26 + $0x1158] sm:$0xff] %v6202_v26 }
 0x757   : > { %8388 = vmatmul.msk.f32.gmra.mxu2 %vm2147_vm10, %v6504_v56  ;;  %8404 = vmatmul.msk.f32.gmra.mxu3 %vm2147_vm10, %v6504_v56  ;;  %v6370_v12 = vpop.f32.mrf.mxu0  ;;  %v6435_v58 = vpop.f32.mrf.mxu1 }
 0x758   : > { %8362 = vst [vmem:[%s8936_s26 + $0x1260] sm:$0xff] %v6370_v12 }
 0x759   : > { %8363 = vst [vmem:[%s8936_s26 + $0x1268] sm:$0xff] %v6435_v58 }
 0x75a   : > { %v6140_v61 = vpop.f32.mrf.mxu2  ;;  %v6205_v1 = vpop.f32.mrf.mxu3  ;;  %8452 = vmatmul.msk.f32.gmra.mxu0 %vm2147_vm10, %v6504_v56  ;;  %8468 = vmatmul.msk.f32.gmra.mxu1 %vm2147_vm10, %v6504_v56 }
 0x75b   : > { %8298 = vst [vmem:[%s8936_s26 + $0x1160] sm:$0xff] %v6140_v61 }
 0x75c   : > { %8299 = vst [vmem:[%s8936_s26 + $0x1168] sm:$0xff] %v6205_v1 }
 0x75f   : > { %8389 = vmatmul.msk.f32.gmra.mxu2 %vm2147_vm10, %v11396_v62  ;;  %8405 = vmatmul.msk.f32.gmra.mxu3 %vm2147_vm10, %v11396_v62  ;;  %v6373_v34 = vpop.f32.mrf.mxu0  ;;  %v6438_v5 = vpop.f32.mrf.mxu1 }
 0x760   : > { %8364 = vst [vmem:[%s8936_s26 + $0x1270] sm:$0xff] %v6373_v34 }
 0x761   : > { %8365 = vst [vmem:[%s8936_s26 + $0x1278] sm:$0xff] %v6438_v5 }
 0x762   : > { %v6143_v0 = vpop.f32.mrf.mxu2  ;;  %v6208_v2 = vpop.f32.mrf.mxu3  ;;  %8453 = vmatmul.msk.f32.gmra.mxu0 %vm2147_vm10, %v11396_v62  ;;  %8469 = vmatmul.msk.f32.gmra.mxu1 %vm2147_vm10, %v11396_v62 }
 0x763   : > { %8300 = vst [vmem:[%s8936_s26 + $0x1170] sm:$0xff] %v6143_v0 }
 0x764   : > { %8301 = vst [vmem:[%s8936_s26 + $0x1178] sm:$0xff] %v6208_v2 }
 0x767   : > { %8390 = vmatmul.msk.f32.gmra.mxu2 %vm2147_vm10, %v11411_v19  ;;  %8406 = vmatmul.msk.f32.gmra.mxu3 %vm2147_vm10, %v11411_v19  ;;  %v6376_v9 = vpop.f32.mrf.mxu0  ;;  %v6441_v21 = vpop.f32.mrf.mxu1 }
 0x768   : > { %8366 = vst [vmem:[%s8936_s26 + $0x1280] sm:$0xff] %v6376_v9 }
 0x769   : > { %8367 = vst [vmem:[%s8936_s26 + $0x1288] sm:$0xff] %v6441_v21 }
 0x76a   : > { %v6146_v6 = vpop.f32.mrf.mxu2  ;;  %v6211_v7 = vpop.f32.mrf.mxu3  ;;  %8454 = vmatmul.msk.f32.gmra.mxu0 %vm2147_vm10, %v11411_v19  ;;  %8470 = vmatmul.msk.f32.gmra.mxu1 %vm2147_vm10, %v11411_v19 }
 0x76b   : > { %8302 = vst [vmem:[%s8936_s26 + $0x1180] sm:$0xff] %v6146_v6 }
 0x76c   : > { %8303 = vst [vmem:[%s8936_s26 + $0x1188] sm:$0xff] %v6211_v7 }
 0x76f   : > { %8391 = vmatmul.msk.f32.gmra.mxu2 %vm2147_vm10, %v11426_v53  ;;  %8407 = vmatmul.msk.f32.gmra.mxu3 %vm2147_vm10, %v11426_v53  ;;  %v6379_v62 = vpop.f32.mrf.mxu0  ;;  %v6444_v10 = vpop.f32.mrf.mxu1 }
 0x770   : > { %8368 = vst [vmem:[%s8936_s26 + $0x1290] sm:$0xff] %v6379_v62 }
 0x771   : > { %8369 = vst [vmem:[%s8936_s26 + $0x1298] sm:$0xff] %v6444_v10 }
 0x772   : > { %v6149_v31 = vpop.f32.mrf.mxu2  ;;  %v6214_v11 = vpop.f32.mrf.mxu3  ;;  %8455 = vmatmul.msk.f32.gmra.mxu0 %vm2147_vm10, %v11426_v53  ;;  %8471 = vmatmul.msk.f32.gmra.mxu1 %vm2147_vm10, %v11426_v53 }
 0x773   : > { %8304 = vst [vmem:[%s8936_s26 + $0x1190] sm:$0xff] %v6149_v31 }
 0x774   : > { %8305 = vst [vmem:[%s8936_s26 + $0x1198] sm:$0xff] %v6214_v11 }
 0x777   : > { %8392 = vmatmul.msk.f32.gmra.mxu2 %vm2147_vm10, %v11441_v17  ;;  %8408 = vmatmul.msk.f32.gmra.mxu3 %vm2147_vm10, %v11441_v17  ;;  %v6382_v19 = vpop.f32.mrf.mxu0  ;;  %v6447_v13 = vpop.f32.mrf.mxu1 }
 0x778   : > { %8370 = vst [vmem:[%s8936_s26 + $0x12a0] sm:$0xff] %v6382_v19 }
 0x779   : > { %8371 = vst [vmem:[%s8936_s26 + $0x12a8] sm:$0xff] %v6447_v13 }
 0x77a   : > { %v6152_v35 = vpop.f32.mrf.mxu2  ;;  %v6217_v15 = vpop.f32.mrf.mxu3  ;;  %8456 = vmatmul.msk.f32.gmra.mxu0 %vm2147_vm10, %v11441_v17  ;;  %8472 = vmatmul.msk.f32.gmra.mxu1 %vm2147_vm10, %v11441_v17 }
 0x77b   : > { %8306 = vst [vmem:[%s8936_s26 + $0x11a0] sm:$0xff] %v6152_v35 }
 0x77c   : > { %8307 = vst [vmem:[%s8936_s26 + $0x11a8] sm:$0xff] %v6217_v15 }
 0x77f   : > { %8393 = vmatmul.msk.f32.gmra.mxu2 %vm2147_vm10, %v11456_v23  ;;  %8409 = vmatmul.msk.f32.gmra.mxu3 %vm2147_vm10, %v11456_v23  ;;  %v6385_v53 = vpop.f32.mrf.mxu0  ;;  %v6450_v18 = vpop.f32.mrf.mxu1 }
 0x780   : > { %8372 = vst [vmem:[%s8936_s26 + $0x12b0] sm:$0xff] %v6385_v53 }
 0x781   : > { %8373 = vst [vmem:[%s8936_s26 + $0x12b8] sm:$0xff] %v6450_v18 }
 0x782   : > { %v6155_v27 = vpop.f32.mrf.mxu2  ;;  %v6220_v28 = vpop.f32.mrf.mxu3  ;;  %8457 = vmatmul.msk.f32.gmra.mxu0 %vm2147_vm10, %v11456_v23  ;;  %8473 = vmatmul.msk.f32.gmra.mxu1 %vm2147_vm10, %v11456_v23 }
 0x783   : > { %8308 = vst [vmem:[%s8936_s26 + $0x11b0] sm:$0xff] %v6155_v27 }
 0x784   : > { %8309 = vst [vmem:[%s8936_s26 + $0x11b8] sm:$0xff] %v6220_v28 }
 0x787   : > { %8394 = vmatmul.msk.f32.gmra.mxu2 %vm2147_vm10, %v11471_v4  ;;  %8410 = vmatmul.msk.f32.gmra.mxu3 %vm2147_vm10, %v11471_v4  ;;  %v6388_v17 = vpop.f32.mrf.mxu0  ;;  %v6453_v39 = vpop.f32.mrf.mxu1 }
 0x788   : > { %8374 = vst [vmem:[%s8936_s26 + $0x12c0] sm:$0xff] %v6388_v17 }
 0x789   : > { %8375 = vst [vmem:[%s8936_s26 + $0x12c8] sm:$0xff] %v6453_v39 }
 0x78a   : > { %v6158_v29 = vpop.f32.mrf.mxu2  ;;  %v6223_v41 = vpop.f32.mrf.mxu3  ;;  %8458 = vmatmul.msk.f32.gmra.mxu0 %vm2147_vm10, %v11471_v4  ;;  %8474 = vmatmul.msk.f32.gmra.mxu1 %vm2147_vm10, %v11471_v4 }
 0x78b   : > { %8310 = vst [vmem:[%s8936_s26 + $0x11c0] sm:$0xff] %v6158_v29 }
 0x78c   : > { %8311 = vst [vmem:[%s8936_s26 + $0x11c8] sm:$0xff] %v6223_v41 }
 0x78f   : > { %8395 = vmatmul.msk.f32.gmra.mxu2 %vm2147_vm10, %v11486_v14  ;;  %8411 = vmatmul.msk.f32.gmra.mxu3 %vm2147_vm10, %v11486_v14  ;;  %v6391_v23 = vpop.f32.mrf.mxu0  ;;  %v6456_v30 = vpop.f32.mrf.mxu1 }
 0x790   : > { %8376 = vst [vmem:[%s8936_s26 + $0x12d0] sm:$0xff] %v6391_v23 }
 0x791   : > { %8377 = vst [vmem:[%s8936_s26 + $0x12d8] sm:$0xff] %v6456_v30 }
 0x792   : > { %v6161_v54 = vpop.f32.mrf.mxu2  ;;  %v6226_v36 = vpop.f32.mrf.mxu3  ;;  %8459 = vmatmul.msk.f32.gmra.mxu0 %vm2147_vm10, %v11486_v14  ;;  %8475 = vmatmul.msk.f32.gmra.mxu1 %vm2147_vm10, %v11486_v14 }
 0x793   : > { %8312 = vst [vmem:[%s8936_s26 + $0x11d0] sm:$0xff] %v6161_v54 }
 0x794   : > { %8313 = vst [vmem:[%s8936_s26 + $0x11d8] sm:$0xff] %v6226_v36 }
 0x797   : > { %8396 = vmatmul.msk.f32.gmra.mxu2 %vm2147_vm10, %v11501_v25  ;;  %8412 = vmatmul.msk.f32.gmra.mxu3 %vm2147_vm10, %v11501_v25  ;;  %v6394_v4 = vpop.f32.mrf.mxu0  ;;  %v6459_v45 = vpop.f32.mrf.mxu1 }
 0x798   : > { %8378 = vst [vmem:[%s8936_s26 + $0x12e0] sm:$0xff] %v6394_v4 }
 0x799   : > { %8379 = vst [vmem:[%s8936_s26 + $0x12e8] sm:$0xff] %v6459_v45 }
 0x79a   : > { %v6164_v33 = vpop.f32.mrf.mxu2  ;;  %v6229_v37 = vpop.f32.mrf.mxu3  ;;  %8460 = vmatmul.msk.f32.gmra.mxu0 %vm2147_vm10, %v11501_v25  ;;  %8476 = vmatmul.msk.f32.gmra.mxu1 %vm2147_vm10, %v11501_v25 }
 0x79b   : > { %8314 = vst [vmem:[%s8936_s26 + $0x11e0] sm:$0xff] %v6164_v33 }
 0x79c   : > { %8315 = vst [vmem:[%s8936_s26 + $0x11e8] sm:$0xff] %v6229_v37 }
 0x79f   : > { %8397 = vmatmul.msk.f32.gmra.mxu2 %vm2147_vm10, %v11516_v46  ;;  %8413 = vmatmul.msk.f32.gmra.mxu3 %vm2147_vm10, %v11516_v46  ;;  %v6397_v14 = vpop.f32.mrf.mxu0  ;;  %v6462_v38 = vpop.f32.mrf.mxu1 }
 0x7a0   : > { %8380 = vst [vmem:[%s8936_s26 + $0x12f0] sm:$0xff] %v6397_v14 }
 0x7a1   : > { %8381 = vst [vmem:[%s8936_s26 + $0x12f8] sm:$0xff] %v6462_v38 }
 0x7a2   : > { %v6167_v22 = vpop.f32.mrf.mxu2  ;;  %v6232_v16 = vpop.f32.mrf.mxu3  ;;  %8461 = vmatmul.msk.f32.gmra.mxu0 %vm2147_vm10, %v11516_v46  ;;  %8477 = vmatmul.msk.f32.gmra.mxu1 %vm2147_vm10, %v11516_v46 }
 0x7a3   : > { %8316 = vst [vmem:[%s8936_s26 + $0x11f0] sm:$0xff] %v6167_v22 }
 0x7a4   : > { %8317 = vst [vmem:[%s8936_s26 + $0x11f8] sm:$0xff] %v6232_v16 }
 0x7a7   : > { %v6812_v25 = vpop.f32.mrf.mxu0  ;;  %v6877_v40 = vpop.f32.mrf.mxu1 }
 0x7a8   : > { %8478 = vst [vmem:[%s8936_s26 + $0x1400] sm:$0xff] %v6812_v25 }
 0x7a9   : > { %8479 = vst [vmem:[%s8936_s26 + $0x1408] sm:$0xff] %v6877_v40 }
 0x7aa   : > { %v6582_v50 = vpop.f32.mrf.mxu2  ;;  %v6647_v52 = vpop.f32.mrf.mxu3 }
 0x7ab   : > { %8414 = vst [vmem:[%s8936_s26 + $0x1300] sm:$0xff] %v6582_v50 }
 0x7ac   : > { %8415 = vst [vmem:[%s8936_s26 + $0x1308] sm:$0xff] %v6647_v52 }
 0x7af   : > { %v6815_v42 = vpop.f32.mrf.mxu0  ;;  %v6880_v43 = vpop.f32.mrf.mxu1 }
 0x7b0   : > { %8480 = vst [vmem:[%s8936_s26 + $0x1410] sm:$0xff] %v6815_v42 }
 0x7b1   : > { %8481 = vst [vmem:[%s8936_s26 + $0x1418] sm:$0xff] %v6880_v43 }
 0x7b2   : > { %v6585_v46 = vpop.f32.mrf.mxu2  ;;  %v6650_v55 = vpop.f32.mrf.mxu3 }
 0x7b3   : > { %8416 = vst [vmem:[%s8936_s26 + $0x1310] sm:$0xff] %v6585_v46 }
 0x7b4   : > { %8417 = vst [vmem:[%s8936_s26 + $0x1318] sm:$0xff] %v6650_v55 }
 0x7b7   : > { %v6818_v57 = vpop.f32.mrf.mxu0  ;;  %v6883_v44 = vpop.f32.mrf.mxu1 }
 0x7b8   : > { %8482 = vst [vmem:[%s8936_s26 + $0x1420] sm:$0xff] %v6818_v57 }
 0x7b9   : > { %8483 = vst [vmem:[%s8936_s26 + $0x1428] sm:$0xff] %v6883_v44 }
 0x7ba   : > { %v6588_v20 = vpop.f32.mrf.mxu2  ;;  %v6653_v32 = vpop.f32.mrf.mxu3 }
 0x7bb   : > { %8418 = vst [vmem:[%s8936_s26 + $0x1320] sm:$0xff] %v6588_v20 }
 0x7bc   : > { %8419 = vst [vmem:[%s8936_s26 + $0x1328] sm:$0xff] %v6653_v32 }
 0x7bf   : > { %v6821_v47 = vpop.f32.mrf.mxu0  ;;  %v6886_v48 = vpop.f32.mrf.mxu1 }
 0x7c0   : > { %8484 = vst [vmem:[%s8936_s26 + $0x1430] sm:$0xff] %v6821_v47 }
 0x7c1   : > { %8485 = vst [vmem:[%s8936_s26 + $0x1438] sm:$0xff] %v6886_v48 }
 0x7c2   : > { %v6591_v3 = vpop.f32.mrf.mxu2  ;;  %v6656_v63 = vpop.f32.mrf.mxu3 }
 0x7c3   : > { %8420 = vst [vmem:[%s8936_s26 + $0x1330] sm:$0xff] %v6591_v3 }
 0x7c4   : > { %8421 = vst [vmem:[%s8936_s26 + $0x1338] sm:$0xff] %v6656_v63 }
 0x7c7   : > { %v6824_v49 = vpop.f32.mrf.mxu0  ;;  %v6889_v51 = vpop.f32.mrf.mxu1 }
 0x7c8   : > { %8486 = vst [vmem:[%s8936_s26 + $0x1440] sm:$0xff] %v6824_v49 }
 0x7c9   : > { %8487 = vst [vmem:[%s8936_s26 + $0x1448] sm:$0xff] %v6889_v51 }
 0x7ca   : > { %v6594_v8 = vpop.f32.mrf.mxu2  ;;  %v6659_v24 = vpop.f32.mrf.mxu3 }
 0x7cb   : > { %8422 = vst [vmem:[%s8936_s26 + $0x1340] sm:$0xff] %v6594_v8 }
 0x7cc   : > { %8423 = vst [vmem:[%s8936_s26 + $0x1348] sm:$0xff] %v6659_v24 }
 0x7cf   : > { %v6827_v60 = vpop.f32.mrf.mxu0  ;;  %v6892_v59 = vpop.f32.mrf.mxu1 }
 0x7d0   : > { %8488 = vst [vmem:[%s8936_s26 + $0x1450] sm:$0xff] %v6827_v60 }
 0x7d1   : > { %8489 = vst [vmem:[%s8936_s26 + $0x1458] sm:$0xff] %v6892_v59 }
 0x7d2   : > { %v6597_v26 = vpop.f32.mrf.mxu2  ;;  %v6662_v56 = vpop.f32.mrf.mxu3 }
 0x7d3   : > { %8424 = vst [vmem:[%s8936_s26 + $0x1350] sm:$0xff] %v6597_v26 }
 0x7d4   : > { %8425 = vst [vmem:[%s8936_s26 + $0x1358] sm:$0xff] %v6662_v56 }
 0x7d7   : > { %v6830_v12 = vpop.f32.mrf.mxu0  ;;  %v6895_v58 = vpop.f32.mrf.mxu1 }
 0x7d8   : > { %8490 = vst [vmem:[%s8936_s26 + $0x1460] sm:$0xff] %v6830_v12 }
 0x7d9   : > { %8491 = vst [vmem:[%s8936_s26 + $0x1468] sm:$0xff] %v6895_v58 }
 0x7da   : > { %v6600_v61 = vpop.f32.mrf.mxu2  ;;  %v6665_v1 = vpop.f32.mrf.mxu3 }
 0x7db   : > { %8426 = vst [vmem:[%s8936_s26 + $0x1360] sm:$0xff] %v6600_v61 }
 0x7dc   : > { %8427 = vst [vmem:[%s8936_s26 + $0x1368] sm:$0xff] %v6665_v1 }
 0x7df   : > { %v6833_v34 = vpop.f32.mrf.mxu0  ;;  %v6898_v5 = vpop.f32.mrf.mxu1 }
 0x7e0   : > { %8492 = vst [vmem:[%s8936_s26 + $0x1470] sm:$0xff] %v6833_v34 }
 0x7e1   : > { %8493 = vst [vmem:[%s8936_s26 + $0x1478] sm:$0xff] %v6898_v5 }
 0x7e2   : > { %v6603_v0 = vpop.f32.mrf.mxu2  ;;  %v6668_v2 = vpop.f32.mrf.mxu3 }
 0x7e3   : > { %8428 = vst [vmem:[%s8936_s26 + $0x1370] sm:$0xff] %v6603_v0 }
 0x7e4   : > { %8429 = vst [vmem:[%s8936_s26 + $0x1378] sm:$0xff] %v6668_v2 }
 0x7e7   : > { %v6836_v9 = vpop.f32.mrf.mxu0  ;;  %v6901_v21 = vpop.f32.mrf.mxu1 }
 0x7e8   : > { %8494 = vst [vmem:[%s8936_s26 + $0x1480] sm:$0xff] %v6836_v9 }
 0x7e9   : > { %8495 = vst [vmem:[%s8936_s26 + $0x1488] sm:$0xff] %v6901_v21 }
 0x7ea   : > { %v6606_v6 = vpop.f32.mrf.mxu2  ;;  %v6671_v7 = vpop.f32.mrf.mxu3 }
 0x7eb   : > { %8430 = vst [vmem:[%s8936_s26 + $0x1380] sm:$0xff] %v6606_v6 }
 0x7ec   : > { %8431 = vst [vmem:[%s8936_s26 + $0x1388] sm:$0xff] %v6671_v7 }
 0x7ef   : > { %v6839_v62 = vpop.f32.mrf.mxu0  ;;  %v6904_v10 = vpop.f32.mrf.mxu1 }
 0x7f0   : > { %8496 = vst [vmem:[%s8936_s26 + $0x1490] sm:$0xff] %v6839_v62 }
 0x7f1   : > { %8497 = vst [vmem:[%s8936_s26 + $0x1498] sm:$0xff] %v6904_v10 }
 0x7f2   : > { %v6609_v31 = vpop.f32.mrf.mxu2  ;;  %v6674_v11 = vpop.f32.mrf.mxu3 }
 0x7f3   : > { %8432 = vst [vmem:[%s8936_s26 + $0x1390] sm:$0xff] %v6609_v31 }
 0x7f4   : > { %8433 = vst [vmem:[%s8936_s26 + $0x1398] sm:$0xff] %v6674_v11 }
 0x7f7   : > { %v6842_v19 = vpop.f32.mrf.mxu0  ;;  %v6907_v13 = vpop.f32.mrf.mxu1 }
 0x7f8   : > { %8498 = vst [vmem:[%s8936_s26 + $0x14a0] sm:$0xff] %v6842_v19 }
 0x7f9   : > { %8499 = vst [vmem:[%s8936_s26 + $0x14a8] sm:$0xff] %v6907_v13 }
 0x7fa   : > { %v6612_v35 = vpop.f32.mrf.mxu2  ;;  %v6677_v15 = vpop.f32.mrf.mxu3 }
 0x7fb   : > { %8434 = vst [vmem:[%s8936_s26 + $0x13a0] sm:$0xff] %v6612_v35 }
 0x7fc   : > { %8435 = vst [vmem:[%s8936_s26 + $0x13a8] sm:$0xff] %v6677_v15 }
 0x7ff   : > { %v6845_v53 = vpop.f32.mrf.mxu0  ;;  %v6910_v18 = vpop.f32.mrf.mxu1 }
 0x800   : > { %8500 = vst [vmem:[%s8936_s26 + $0x14b0] sm:$0xff] %v6845_v53 }
 0x801   : > { %8501 = vst [vmem:[%s8936_s26 + $0x14b8] sm:$0xff] %v6910_v18 }
 0x802   : > { %v6615_v27 = vpop.f32.mrf.mxu2  ;;  %v6680_v28 = vpop.f32.mrf.mxu3 }
 0x803   : > { %8436 = vst [vmem:[%s8936_s26 + $0x13b0] sm:$0xff] %v6615_v27 }
 0x804   : > { %8437 = vst [vmem:[%s8936_s26 + $0x13b8] sm:$0xff] %v6680_v28 }
 0x807   : > { %v6848_v17 = vpop.f32.mrf.mxu0  ;;  %v6913_v39 = vpop.f32.mrf.mxu1 }
 0x808   : > { %8502 = vst [vmem:[%s8936_s26 + $0x14c0] sm:$0xff] %v6848_v17 }
 0x809   : > { %8503 = vst [vmem:[%s8936_s26 + $0x14c8] sm:$0xff] %v6913_v39 }
 0x80a   : > { %v6618_v29 = vpop.f32.mrf.mxu2  ;;  %v6683_v41 = vpop.f32.mrf.mxu3 }
 0x80b   : > { %8438 = vst [vmem:[%s8936_s26 + $0x13c0] sm:$0xff] %v6618_v29 }
 0x80c   : > { %8439 = vst [vmem:[%s8936_s26 + $0x13c8] sm:$0xff] %v6683_v41 }
 0x80f   : > { %v6851_v23 = vpop.f32.mrf.mxu0  ;;  %v6916_v30 = vpop.f32.mrf.mxu1 }
 0x810   : > { %8504 = vst [vmem:[%s8936_s26 + $0x14d0] sm:$0xff] %v6851_v23 }
 0x811   : > { %8505 = vst [vmem:[%s8936_s26 + $0x14d8] sm:$0xff] %v6916_v30 }
 0x812   : > { %v6621_v54 = vpop.f32.mrf.mxu2  ;;  %v6686_v36 = vpop.f32.mrf.mxu3 }
 0x813   : > { %8440 = vst [vmem:[%s8936_s26 + $0x13d0] sm:$0xff] %v6621_v54 }
 0x814   : > { %8441 = vst [vmem:[%s8936_s26 + $0x13d8] sm:$0xff] %v6686_v36 }
 0x817   : > { %v6854_v4 = vpop.f32.mrf.mxu0  ;;  %v6919_v45 = vpop.f32.mrf.mxu1 }
 0x818   : > { %8506 = vst [vmem:[%s8936_s26 + $0x14e0] sm:$0xff] %v6854_v4 }
 0x819   : > { %8507 = vst [vmem:[%s8936_s26 + $0x14e8] sm:$0xff] %v6919_v45 }
 0x81a   : > { %v6624_v33 = vpop.f32.mrf.mxu2  ;;  %v6689_v37 = vpop.f32.mrf.mxu3 }
 0x81b   : > { %8442 = vst [vmem:[%s8936_s26 + $0x13e0] sm:$0xff] %v6624_v33 }
 0x81c   : > { %8443 = vst [vmem:[%s8936_s26 + $0x13e8] sm:$0xff] %v6689_v37 }
 0x81f   : > { %v6857_v14 = vpop.f32.mrf.mxu0  ;;  %v6922_v38 = vpop.f32.mrf.mxu1 }
 0x820   : > { %8508 = vst [vmem:[%s8936_s26 + $0x14f0] sm:$0xff] %v6857_v14 }
 0x821   : > { %8509 = vst [vmem:[%s8936_s26 + $0x14f8] sm:$0xff] %v6922_v38 }
 0x822   : > { %v6627_v22 = vpop.f32.mrf.mxu2  ;;  %v6692_v16 = vpop.f32.mrf.mxu3 }
 0x823   : > { %8444 = vst [vmem:[%s8936_s26 + $0x13f0] sm:$0xff] %v6627_v22 }
 0x824   : > { %8445 = vst [vmem:[%s8936_s26 + $0x13f8] sm:$0xff] %v6692_v16 }
 0x825   : > { %s8516_s10 = sshll.u32 %s8755_s21, 5  ;;  %s8520_s28 = smul.u32 1344, %s8759_s22 }
 0x826   : > { %s6987_s29 = sshll.u32 %s8936_s26, 4  ;;  %s8785_s13 = smov 4096   ;;  %s6988_s29 = int_to_ptr.vmem [resolvable:$true] %s6987_s29 }
 0x827   : > { %s6974_s30 = sadd.s32 %s8520_s28, %s8516_s10  ;;  %8529 = sst [smem:[#allocation10]] (%p8873_p3), %s8785_s13 }
 0x828   : > { %s8512_s11 = sshll.u32 %s6974_s30, 3  ;;  %s8786_s17 = smov 8192  }
 0x829   : > { %s6976_s15 = scalar_lea.hbm %s11820_s5, %s8512_s11  ;;  %8530 = sst [smem:[#allocation10 + $0x1]] (%p8873_p3), %s8786_s17 }
 0x82a   : > { %s6989_s12 = sshll.u32 %s6976_s15, 4  ;;  %s8787_s21 = smov 16   ;;  %s6990_s12 = int_to_ptr.hbm [resolvable:$true] %s6989_s12 }
 0x82b   : > { %8531 = sst [smem:[#allocation10 + $0x2]] (%p8873_p3), %s8787_s21  ;;  %s8788_s22 = smov 256  }
 0x82c   : > { %8532 = sst [smem:[#allocation10 + $0x3]] (%p8873_p3), %s8788_s22  ;;  %s8789_s26 = smov [#allocation9]  }
 0x82d   : > { %8533 = sst [smem:[#allocation10 + $0x4]] (%p8873_p3), %s8788_s22  ;;  %s8790_s27 = smov 0  }
 0x82e   : > { %8534 = sst [smem:[#allocation10 + $0x5]] (%p8873_p3), %s8787_s21 }
 0x82f   : > { %8535 = dma.general (%p8873_p3), %s6988_s29, 86016, %s6990_s12, %s6959_s6, %s8789_s26, [#allocation10], %s8790_s27, 0  }
 0x830 PF: > { %p8552_p5 = scmp.ge.s32.totalorder %s8771_s25, 2  ;;  %s7017_s9 = sand.u32 1, %s8743_s18  }
 0x831   : > { %s7018_s10 = scalar_lea.sflag [#allocation5], %s7017_s9 }
 0x832   : > { %p8545_p6 = pnand %p8552_p5, %p8882_p8 }
 0x834   : > { %p8546_p7 = pneg %p8545_p6 }
 0x836   : > { %8738 = dma.done.wait (%p8546_p7), %s7018_s10, 86016  }
 0x837   : > { %8740 = vsyncadd (%p8546_p7), %s7018_s10, 4294881280  ;;  %s20_s25 = sadd.s32 1, %s8771_s25   ;;  %s11833_s22 = sld [smem:[#allocation14_spill]] }
 0x838   : > { %p17_p9 = scmp.ge.s32.totalorder %s20_s25, 6   ;;  %s11834_s7 = sld [smem:[#allocation15_spill]] }
 0x839   : > { %s11835_s24 = sld [smem:[#allocation16_spill]]  ;;  %s11836_s18 = smov %s8747_s19 }
 0x83a   : > { %s11837_s19 = smov %s8751_s20  ;;  %s11838_s20 = smov %s8903_s16 }
 0x83b   : > { %s11839_s21 = smov %s8763_s23  ;;  %19 = sbr.rel (!%p17_p9) target bundleno = 7 (0x7), region = 307 }
 0x83e   : > { %s11840_s23 = smov %s11834_s7 }
 0x840   :  { %7024 = vsyncpa [#allocation4], 1 }
 0x841   :  { %7026 = vsyncpa [#allocation4 + $0x1], 1 }
 0x842   :  { %7027 = vsyncpa [#allocation7], 1 }
 0x843   :  { %7028 = vsyncpa [#allocation5], 1 }
 0x844   :  { %7030 = vsyncpa [#allocation5 + $0x1], 1 }

</bundles_post_ra>
